<compile_context>
chip_gen: v7x
topology: tpu7x:2x2x1
jax: 0.10.0
libtpu: 0.0.40
codegen_flags: <defaults>
</compile_context>

<pallas_src>
import jax
import jax.numpy as jnp
from jax.experimental import pallas as pl
from jax.experimental.pallas import tpu as pltpu

# MXU operand dtype.  bf16 operands + f32 accumulation runs the MXU at full
# rate on v6e/v7x and halves weight DMA bytes; set to jnp.float32 for
# bit-faithful f32 numerics.
MXU_DTYPE = jnp.bfloat16


def _resblock_kernel(H, W, C):
    def kernel(x_ref, w1_ref, s1_ref, b1_ref, w2_ref, b2_ref, o_ref,
               xp_ref, hp_ref):
        x = x_ref[0]                                     # (H, W, C) f32

        # In-kernel zero padding (no HBM pad pass).  Zeroed every grid step so
        # the kernel stays correct however the "parallel" axis is sharded
        # across TensorCores.
        xp_ref[...] = jnp.zeros_like(xp_ref)
        hp_ref[...] = jnp.zeros_like(hp_ref)
        xp_ref[1:H + 1, 1:W + 1, :] = x

        def conv3x3(pad_ref, w_ref):
            xp = pad_ref[...]                            # (H+2, W+2, C)
            cols = [xp[dy:dy + H, dx:dx + W, :]
                    for dy in range(3) for dx in range(3)]
            patches = jnp.concatenate(cols, axis=-1)     # (H, W, 9C)
            patches = patches.reshape(H * W, 9 * C).astype(w_ref.dtype)
            return jnp.dot(patches, w_ref[...],
                           preferred_element_type=jnp.float32)  # (H*W, C) f32

        # conv1 -> folded BN -> ReLU   (intermediate stays in VMEM)
        h = conv3x3(xp_ref, w1_ref) * s1_ref[...] + b1_ref[...]
        h = jnp.maximum(h, 0.0)
        hp_ref[1:H + 1, 1:W + 1, :] = h.reshape(H, W, C)

        # conv2 + bias + residual add + ReLU
        out = conv3x3(hp_ref, w2_ref) + b2_ref[...]
        out = out + x.reshape(H * W, C)
        out = jnp.maximum(out, 0.0)
        o_ref[0] = out.reshape(H, W, C)

    return kernel


def fused_residual_block_nhwc(x, w1, s1, b1, w2, b2):
    """x: (B, H, W, C) f32.  w1/w2: (9*C, C) im2col weights in MXU_DTYPE.
       s1/b1: folded-BN scale/shift (1, C) f32.  b2: conv2 bias (1, C) f32."""
    B, H, W, C = x.shape
    const = lambda b: (0, 0)

    return pl.pallas_call(
        _resblock_kernel(H, W, C),
        out_shape=jax.ShapeDtypeStruct((B, H, W, C), jnp.float32),
        grid=(B,),
        in_specs=[
            pl.BlockSpec((1, H, W, C), lambda b: (b, 0, 0, 0)),
            pl.BlockSpec((9 * C, C), const),
            pl.BlockSpec((1, C), const),
            pl.BlockSpec((1, C), const),
            pl.BlockSpec((9 * C, C), const),
            pl.BlockSpec((1, C), const),
        ],
        out_specs=pl.BlockSpec((1, H, W, C), lambda b: (b, 0, 0, 0)),
        scratch_shapes=[pltpu.VMEM((H + 2, W + 2, C), jnp.float32),
                        pltpu.VMEM((H + 2, W + 2, C), jnp.float32)],
        compiler_params=pltpu.CompilerParams(
            dimension_semantics=("parallel",)),
    )(x, w1, s1, b1, w2, b2)


def residual_block_forward(params, x_nchw, eps=1e-5):
    """PyTorch-semantics forward.  x_nchw: (B, 64, H, W) f32 -> same shape."""
    C = x_nchw.shape[1]

    # Inference-mode BatchNorm folded into a per-channel scale/shift.
    scale = params["bn1_gamma"] * jax.lax.rsqrt(params["bn1_var"] + eps)
    shift = params["bn1_beta"] - params["bn1_mean"] * scale

    # OIHW -> HWIO -> (9*Cin, Cout) im2col layout, pre-cast to the MXU dtype.
    def prep_w(w_oihw):
        w_hwio = jnp.transpose(w_oihw, (2, 3, 1, 0))
        return w_hwio.reshape(9 * C, C).astype(MXU_DTYPE)

    x = jnp.transpose(x_nchw, (0, 2, 3, 1))              # NCHW -> NHWC
    y = fused_residual_block_nhwc(
        x,
        prep_w(params["conv1_w"]),
        scale.reshape(1, C).astype(jnp.float32),
        shift.reshape(1, C).astype(jnp.float32),
        prep_w(params["conv2_w"]),
        params["conv2_b"].reshape(1, C).astype(jnp.float32),
    )
    return jnp.transpose(y, (0, 3, 1, 2))                # NHWC -> NCHW


def init_params(key, C=64):
    ks = jax.random.split(key, 7)
    fan = 9.0 * C
    return dict(
        conv1_w=jax.random.normal(ks[0], (C, C, 3, 3), jnp.float32) / jnp.sqrt(fan),
        conv2_w=jax.random.normal(ks[1], (C, C, 3, 3), jnp.float32) / jnp.sqrt(fan),
        conv2_b=0.05 * jax.random.normal(ks[2], (C,), jnp.float32),
        bn1_gamma=1.0 + 0.1 * jax.random.normal(ks[3], (C,), jnp.float32),
        bn1_beta=0.1 * jax.random.normal(ks[4], (C,), jnp.float32),
        bn1_mean=0.1 * jax.random.normal(ks[5], (C,), jnp.float32),
        bn1_var=jax.random.uniform(ks[6], (C,), jnp.float32, 0.5, 1.5),
    )


if __name__ == "__main__":
    B, C, H, W = 2, 64, 16, 16
    key = jax.random.PRNGKey(0)
    kp, kx = jax.random.split(key)
    params = init_params(kp, C)
    x = jax.random.normal(kx, (B, C, H, W), jnp.float32)

    fwd = jax.jit(residual_block_forward)
    out = fwd(params, x)
    jax.block_until_ready(out)
    assert out.shape == (B, C, H, W), out.shape
    assert out.dtype == jnp.float32
    print("KERNEL_OK")
</pallas_src>

<mosaic_0001>
module attributes {stable_mosaic.version = 11 : i64} {
  func.func @kernel(%arg0: i32, %arg1: memref<1x16x16x64xf32, #tpu.memory_space<vmem>>, %arg2: memref<576x64xbf16, #tpu.memory_space<vmem>>, %arg3: memref<1x64xf32, #tpu.memory_space<vmem>>, %arg4: memref<1x64xf32, #tpu.memory_space<vmem>>, %arg5: memref<576x64xbf16, #tpu.memory_space<vmem>>, %arg6: memref<1x64xf32, #tpu.memory_space<vmem>>, %arg7: memref<1x16x16x64xf32, #tpu.memory_space<vmem>>, %arg8: memref<18x18x64xf32, #tpu.memory_space<vmem>>, %arg9: memref<18x18x64xf32, #tpu.memory_space<vmem>>) attributes {dimension_semantics = [#tpu.dimension_semantics<parallel>], iteration_bounds = array<i64: 2>, scalar_prefetch = 0 : i64, scratch_operands = 2 : i64, tpu.core_type = #tpu.core_type<tc>, window_params = [{transform_indices = @transform_0, window_bounds = array<i64: 1, 16, 16, 64>}, {pipeline_mode = #tpu.pipeline_mode<synchronous>, transform_indices = @transform_1, window_bounds = array<i64: 576, 64>}, {pipeline_mode = #tpu.pipeline_mode<synchronous>, transform_indices = @transform_2, window_bounds = array<i64: 1, 64>}, {pipeline_mode = #tpu.pipeline_mode<synchronous>, transform_indices = @transform_3, window_bounds = array<i64: 1, 64>}, {pipeline_mode = #tpu.pipeline_mode<synchronous>, transform_indices = @transform_4, window_bounds = array<i64: 576, 64>}, {pipeline_mode = #tpu.pipeline_mode<synchronous>, transform_indices = @transform_5, window_bounds = array<i64: 1, 64>}, {transform_indices = @transform_6, window_bounds = array<i64: 1, 16, 16, 64>}]} {
    %c0 = arith.constant 0 : index
    %c0_0 = arith.constant 0 : index
    %c0_1 = arith.constant 0 : index
    %c0_2 = arith.constant 0 : index
    %0 = vector.load %arg1[%c0, %c0_0, %c0_1, %c0_2] : memref<1x16x16x64xf32, #tpu.memory_space<vmem>>, vector<1x16x16x64xf32>
    %1 = vector.shape_cast %0 : vector<1x16x16x64xf32> to vector<16x16x64xf32>
    %cst = arith.constant 0.000000e+00 : f32
    %2 = vector.broadcast %cst : f32 to vector<18x18x64xf32>
    %c0_3 = arith.constant 0 : index
    %c0_4 = arith.constant 0 : index
    %c0_5 = arith.constant 0 : index
    %3 = vector.load %arg8[%c0_3, %c0_4, %c0_5] : memref<18x18x64xf32, #tpu.memory_space<vmem>>, vector<18x18x64xf32>
    tpu.vector_store %arg8[%c0_3, %c0_4, %c0_5], %2 {strides = array<i32>} : memref<18x18x64xf32, #tpu.memory_space<vmem>>, vector<18x18x64xf32>,
    %cst_6 = arith.constant 0.000000e+00 : f32
    %4 = vector.broadcast %cst_6 : f32 to vector<18x18x64xf32>
    %c0_7 = arith.constant 0 : index
    %c0_8 = arith.constant 0 : index
    %c0_9 = arith.constant 0 : index
    %5 = vector.load %arg9[%c0_7, %c0_8, %c0_9] : memref<18x18x64xf32, #tpu.memory_space<vmem>>, vector<18x18x64xf32>
    tpu.vector_store %arg9[%c0_7, %c0_8, %c0_9], %4 {strides = array<i32>} : memref<18x18x64xf32, #tpu.memory_space<vmem>>, vector<18x18x64xf32>,
    %c1 = arith.constant 1 : index
    %c1_10 = arith.constant 1 : index
    %c0_11 = arith.constant 0 : index
    %6 = vector.load %arg8[%c1, %c1_10, %c0_11] : memref<18x18x64xf32, #tpu.memory_space<vmem>>, vector<16x16x64xf32>
    tpu.vector_store %arg8[%c1, %c1_10, %c0_11], %1 {strides = array<i32>} : memref<18x18x64xf32, #tpu.memory_space<vmem>>, vector<16x16x64xf32>,
    %c0_12 = arith.constant 0 : index
    %c0_13 = arith.constant 0 : index
    %c0_14 = arith.constant 0 : index
    %7 = vector.load %arg8[%c0_12, %c0_13, %c0_14] : memref<18x18x64xf32, #tpu.memory_space<vmem>>, vector<18x18x64xf32>
    %8 = vector.extract_strided_slice %7 {offsets = [0, 0, 0], sizes = [16, 16, 64], strides = [1, 1, 1]} : vector<18x18x64xf32> to vector<16x16x64xf32>
    %9 = vector.extract_strided_slice %7 {offsets = [0, 1, 0], sizes = [16, 16, 64], strides = [1, 1, 1]} : vector<18x18x64xf32> to vector<16x16x64xf32>
    %10 = vector.extract_strided_slice %7 {offsets = [0, 2, 0], sizes = [16, 16, 64], strides = [1, 1, 1]} : vector<18x18x64xf32> to vector<16x16x64xf32>
    %11 = vector.extract_strided_slice %7 {offsets = [1, 0, 0], sizes = [16, 16, 64], strides = [1, 1, 1]} : vector<18x18x64xf32> to vector<16x16x64xf32>
    %12 = vector.extract_strided_slice %7 {offsets = [1, 1, 0], sizes = [16, 16, 64], strides = [1, 1, 1]} : vector<18x18x64xf32> to vector<16x16x64xf32>
    %13 = vector.extract_strided_slice %7 {offsets = [1, 2, 0], sizes = [16, 16, 64], strides = [1, 1, 1]} : vector<18x18x64xf32> to vector<16x16x64xf32>
    %14 = vector.extract_strided_slice %7 {offsets = [2, 0, 0], sizes = [16, 16, 64], strides = [1, 1, 1]} : vector<18x18x64xf32> to vector<16x16x64xf32>
    %15 = vector.extract_strided_slice %7 {offsets = [2, 1, 0], sizes = [16, 16, 64], strides = [1, 1, 1]} : vector<18x18x64xf32> to vector<16x16x64xf32>
    %16 = vector.extract_strided_slice %7 {offsets = [2, 2, 0], sizes = [16, 16, 64], strides = [1, 1, 1]} : vector<18x18x64xf32> to vector<16x16x64xf32>
    %17 = tpu.concatenate %8, %9, %10, %11, %12, %13, %14, %15, %16 in 2 : vector<16x16x64xf32>, vector<16x16x64xf32>, vector<16x16x64xf32>, vector<16x16x64xf32>, vector<16x16x64xf32>, vector<16x16x64xf32>, vector<16x16x64xf32>, vector<16x16x64xf32>, vector<16x16x64xf32> -> vector<16x16x576xf32>
    %18 = vector.shape_cast %17 : vector<16x16x576xf32> to vector<256x576xf32>
    %19 = arith.truncf %18 : vector<256x576xf32> to vector<256x576xbf16>
    %c0_15 = arith.constant 0 : index
    %c0_16 = arith.constant 0 : index
    %20 = vector.load %arg2[%c0_15, %c0_16] : memref<576x64xbf16, #tpu.memory_space<vmem>>, vector<576x64xbf16>
    %cst_17 = arith.constant dense<0.000000e+00> : vector<256x64xf32>
    %21 = tpu.matmul %19, %20, %cst_17 {dimension_numbers = #tpu.dot_dimension_numbers<[1], [0], [0], [1], [0, 0, 1, 1], [], []>} : vector<256x576xbf16>, vector<576x64xbf16>, vector<256x64xf32> -> vector<256x64xf32>
    %c0_18 = arith.constant 0 : index
    %c0_19 = arith.constant 0 : index
    %22 = vector.load %arg3[%c0_18, %c0_19] : memref<1x64xf32, #tpu.memory_space<vmem>>, vector<1x64xf32>
    %23 = vector.broadcast %22 : vector<1x64xf32> to vector<256x64xf32>
    %24 = arith.mulf %21, %23 : vector<256x64xf32>
    %c0_20 = arith.constant 0 : index
    %c0_21 = arith.constant 0 : index
    %25 = vector.load %arg4[%c0_20, %c0_21] : memref<1x64xf32, #tpu.memory_space<vmem>>, vector<1x64xf32>
    %26 = vector.broadcast %25 : vector<1x64xf32> to vector<256x64xf32>
    %27 = arith.addf %24, %26 : vector<256x64xf32>
    %cst_22 = arith.constant 0.000000e+00 : f32
    %28 = vector.broadcast %cst_22 : f32 to vector<256x64xf32>
    %29 = arith.maximumf %27, %28 : vector<256x64xf32>
    %30 = vector.shape_cast %29 : vector<256x64xf32> to vector<16x16x64xf32>
    %c1_23 = arith.constant 1 : index
    %c1_24 = arith.constant 1 : index
    %c0_25 = arith.constant 0 : index
    %31 = vector.load %arg9[%c1_23, %c1_24, %c0_25] : memref<18x18x64xf32, #tpu.memory_space<vmem>>, vector<16x16x64xf32>
    tpu.vector_store %arg9[%c1_23, %c1_24, %c0_25], %30 {strides = array<i32>} : memref<18x18x64xf32, #tpu.memory_space<vmem>>, vector<16x16x64xf32>,
    %c0_26 = arith.constant 0 : index
    %c0_27 = arith.constant 0 : index
    %c0_28 = arith.constant 0 : index
    %32 = vector.load %arg9[%c0_26, %c0_27, %c0_28] : memref<18x18x64xf32, #tpu.memory_space<vmem>>, vector<18x18x64xf32>
    %33 = vector.extract_strided_slice %32 {offsets = [0, 0, 0], sizes = [16, 16, 64], strides = [1, 1, 1]} : vector<18x18x64xf32> to vector<16x16x64xf32>
    %34 = vector.extract_strided_slice %32 {offsets = [0, 1, 0], sizes = [16, 16, 64], strides = [1, 1, 1]} : vector<18x18x64xf32> to vector<16x16x64xf32>
    %35 = vector.extract_strided_slice %32 {offsets = [0, 2, 0], sizes = [16, 16, 64], strides = [1, 1, 1]} : vector<18x18x64xf32> to vector<16x16x64xf32>
    %36 = vector.extract_strided_slice %32 {offsets = [1, 0, 0], sizes = [16, 16, 64], strides = [1, 1, 1]} : vector<18x18x64xf32> to vector<16x16x64xf32>
    %37 = vector.extract_strided_slice %32 {offsets = [1, 1, 0], sizes = [16, 16, 64], strides = [1, 1, 1]} : vector<18x18x64xf32> to vector<16x16x64xf32>
    %38 = vector.extract_strided_slice %32 {offsets = [1, 2, 0], sizes = [16, 16, 64], strides = [1, 1, 1]} : vector<18x18x64xf32> to vector<16x16x64xf32>
    %39 = vector.extract_strided_slice %32 {offsets = [2, 0, 0], sizes = [16, 16, 64], strides = [1, 1, 1]} : vector<18x18x64xf32> to vector<16x16x64xf32>
    %40 = vector.extract_strided_slice %32 {offsets = [2, 1, 0], sizes = [16, 16, 64], strides = [1, 1, 1]} : vector<18x18x64xf32> to vector<16x16x64xf32>
    %41 = vector.extract_strided_slice %32 {offsets = [2, 2, 0], sizes = [16, 16, 64], strides = [1, 1, 1]} : vector<18x18x64xf32> to vector<16x16x64xf32>
    %42 = tpu.concatenate %33, %34, %35, %36, %37, %38, %39, %40, %41 in 2 : vector<16x16x64xf32>, vector<16x16x64xf32>, vector<16x16x64xf32>, vector<16x16x64xf32>, vector<16x16x64xf32>, vector<16x16x64xf32>, vector<16x16x64xf32>, vector<16x16x64xf32>, vector<16x16x64xf32> -> vector<16x16x576xf32>
    %43 = vector.shape_cast %42 : vector<16x16x576xf32> to vector<256x576xf32>
    %44 = arith.truncf %43 : vector<256x576xf32> to vector<256x576xbf16>
    %c0_29 = arith.constant 0 : index
    %c0_30 = arith.constant 0 : index
    %45 = vector.load %arg5[%c0_29, %c0_30] : memref<576x64xbf16, #tpu.memory_space<vmem>>, vector<576x64xbf16>
    %cst_31 = arith.constant dense<0.000000e+00> : vector<256x64xf32>
    %46 = tpu.matmul %44, %45, %cst_31 {dimension_numbers = #tpu.dot_dimension_numbers<[1], [0], [0], [1], [0, 0, 1, 1], [], []>} : vector<256x576xbf16>, vector<576x64xbf16>, vector<256x64xf32> -> vector<256x64xf32>
    %c0_32 = arith.constant 0 : index
    %c0_33 = arith.constant 0 : index
    %47 = vector.load %arg6[%c0_32, %c0_33] : memref<1x64xf32, #tpu.memory_space<vmem>>, vector<1x64xf32>
    %48 = vector.broadcast %47 : vector<1x64xf32> to vector<256x64xf32>
    %49 = arith.addf %46, %48 : vector<256x64xf32>
    %50 = vector.shape_cast %1 : vector<16x16x64xf32> to vector<256x64xf32>
    %51 = arith.addf %49, %50 : vector<256x64xf32>
    %cst_34 = arith.constant 0.000000e+00 : f32
    %52 = vector.broadcast %cst_34 : f32 to vector<256x64xf32>
    %53 = arith.maximumf %51, %52 : vector<256x64xf32>
    %54 = vector.shape_cast %53 : vector<256x64xf32> to vector<16x16x64xf32>
    %c0_35 = arith.constant 0 : index
    %c0_36 = arith.constant 0 : index
    %c0_37 = arith.constant 0 : index
    %c0_38 = arith.constant 0 : index
    %55 = vector.load %arg7[%c0_35, %c0_36, %c0_37, %c0_38] : memref<1x16x16x64xf32, #tpu.memory_space<vmem>>, vector<1x16x16x64xf32>
    %56 = vector.shape_cast %55 : vector<1x16x16x64xf32> to vector<16x16x64xf32>
    %57 = vector.shape_cast %54 : vector<16x16x64xf32> to vector<1x16x16x64xf32>
    tpu.vector_store %arg7[%c0_35, %c0_36, %c0_37, %c0_38], %57 {strides = array<i32>} : memref<1x16x16x64xf32, #tpu.memory_space<vmem>>, vector<1x16x16x64xf32>,
    return
  }
  func.func @transform_0(%arg0: i32) -> (i32, i32, i32, i32) {
    %c0_i32 = arith.constant 0 : i32
    %c0_i32_0 = arith.constant 0 : i32
    %c0_i32_1 = arith.constant 0 : i32
    %c0_i32_2 = arith.constant 0 : i32
    return %arg0, %c0_i32, %c0_i32_0, %c0_i32_1 : i32, i32, i32, i32
  }
  func.func @transform_1(%arg0: i32) -> (i32, i32) {
    %c0_i32 = arith.constant 0 : i32
    %c0_i32_0 = arith.constant 0 : i32
    %c0_i32_1 = arith.constant 0 : i32
    return %c0_i32, %c0_i32_0 : i32, i32
  }
  func.func @transform_2(%arg0: i32) -> (i32, i32) {
    %c0_i32 = arith.constant 0 : i32
    %c0_i32_0 = arith.constant 0 : i32
    %c0_i32_1 = arith.constant 0 : i32
    return %c0_i32, %c0_i32_0 : i32, i32
  }
  func.func @transform_3(%arg0: i32) -> (i32, i32) {
    %c0_i32 = arith.constant 0 : i32
    %c0_i32_0 = arith.constant 0 : i32
    %c0_i32_1 = arith.constant 0 : i32
    return %c0_i32, %c0_i32_0 : i32, i32
  }
  func.func @transform_4(%arg0: i32) -> (i32, i32) {
    %c0_i32 = arith.constant 0 : i32
    %c0_i32_0 = arith.constant 0 : i32
    %c0_i32_1 = arith.constant 0 : i32
    return %c0_i32, %c0_i32_0 : i32, i32
  }
  func.func @transform_5(%arg0: i32) -> (i32, i32) {
    %c0_i32 = arith.constant 0 : i32
    %c0_i32_0 = arith.constant 0 : i32
    %c0_i32_1 = arith.constant 0 : i32
    return %c0_i32, %c0_i32_0 : i32, i32
  }
  func.func @transform_6(%arg0: i32) -> (i32, i32, i32, i32) {
    %c0_i32 = arith.constant 0 : i32
    %c0_i32_0 = arith.constant 0 : i32
    %c0_i32_1 = arith.constant 0 : i32
    %c0_i32_2 = arith.constant 0 : i32
    return %arg0, %c0_i32, %c0_i32_0, %c0_i32_1 : i32, i32, i32, i32
  }
}

</mosaic_0001>

<bundles_post_ra>
// kernel: residual_block_forward.1
= control target key start
LH: loop header
LB: loop body
LE: loop exit
PB: predicated region body
PF: predicated region fallthrough
CT: control target
= control target key end

     0   :  { %11 = vsyncpa [#allocation5], 0  ;;  %s8685_s0 = inlined_call_operand.vmem [shape: f32[2,16,16,64], index: 0, kind: input, shape index: {}]   ;;  %s8686_s1 = inlined_call_operand.vmem [shape: bf16[576,64], index: 1, kind: input, shape index: {}]   ;;  %s8687_s2 = inlined_call_operand.vmem [shape: f32[1,64], index: 2, kind: input, shape index: {}]   ;;  %s8688_s3 = inlined_call_operand.vmem [shape: f32[1,64], index: 3, kind: input, shape index: {}]   ;;  %s8689_s4 = inlined_call_operand.vmem [shape: bf16[576,64], index: 4, kind: input, shape index: {}]   ;;  %s8690_s5 = inlined_call_operand.vmem [shape: f32[1,64], index: 5, kind: input, shape index: {}]   ;;  %s8691_s6 = inlined_call_operand.hbm [shape: f32[2,16,16,64], index: 6, kind: output, shape index: {}]  }
   0x1   :  { %13 = vsyncpa [#allocation5 + $0x1], 0  ;;  %s5490_s21 = smov 0   ;;  %s5492_s22 = smov 0  }
   0x2   :  { %s5494_s23 = smov 0   ;;  %s5496_s24 = smov 0  }
   0x3 LB: > { %s5511_s25 = sadd.s32 4294967295, %s5448_s24   ;;  %s4032_s26 = sadd.s32 4294967294, %s5448_s24   ;;  %s5448_s24 = sphi %s5496_s24, %s9146_s24   ;;  %s5444_s23 = sphi %s5494_s23, %s9145_s23   ;;  %s5440_s22 = sphi %s5492_s22, %s9144_s22   ;;  %s5436_s21 = sphi %s5490_s21, %s9143_s21  }
   0x4   : > { %s5515_s27 = sadd.s32 1, %s5448_s24   ;;  %s157_s28 = sadd.s32 1, %s5444_s23 }
   0x5   : > { %s154_s29 = ssub.s32 %s5448_s24, %s5515_s27  ;;  %p167_p0 = scmp.ne.s32.totalorder %s5444_s23, %s5440_s22 }
   0x6   : > { %p155_p1 = scmp.eq.s32.totalorder %s154_s29, 0  ;;  %p168_p2 = scmp.eq.s32.totalorder %s5511_s25, 1 }
   0x7   : > { %p173_p3 = scmp.ne.s32.totalorder %s5440_s22, %s5436_s21  ;;  %p174_p4 = scmp.eq.s32.totalorder %s4032_s26, 1 }
   0x8   : > { %s5526_s30 = scalar_select %p155_p1, %s5444_s23, %s157_s28  }
   0x9   : > { %p5528_p5 = por %p168_p2, %p167_p0  ;;  %p5532_p6 = por %p174_p4, %p173_p3 }
   0xa   : > { %p4035_p7 = scmp.ge.s32.totalorder %s5448_s24, 1  ;;  %p215_p8 = scmp.lt.s32.totalorder %s5448_s24, 3 }
   0xc   : > { %p216_p9 = pnand %p4035_p7, %p215_p8 }
   0xe   : > { %219 = sbr.rel (%p216_p9) target bundleno = 1114 (0x45a), region = 44 }
  0x15   : > { %p245_p10 = scmp.lt.s32.totalorder %s5511_s25, 1  ;;  %vm283_vm0 = vcmask 523264   ;;  %vm286_vm1 = vcmask 517120   ;;  %v5450_v0 = vmov 0.0   ;;  %v5264_v1 = vld [vmem:[%s8686_s1 + $0x40] sm:$0xff]   ;;  %v5266_v3 = vld [vmem:[%s8686_s1 + $0x48] sm:$0xff]  }
  0x16   : > { %288 = vst.msk [vmem:[#allocation2 + $0x18] sm:$0xff] %vm283_vm0, %v5450_v0  ;;  %289 = vst.msk [vmem:[#allocation2 + $0x20] sm:$0xff] %vm283_vm0, %v5450_v0  ;;  %v5265_v2 = vld [vmem:[%s8686_s1] sm:$0xff]   ;;  %4153 = vmatprep.subr.bf16.mxu0 %v5264_v1  ;;  %v5267_v4 = vld [vmem:[%s8686_s1 + $0x8] sm:$0xff]   ;;  %vm528_vm2 = vcmask 1046528   ;;  %s5451_s9 = smov 64  }
  0x17   : > { %290 = vst.msk [vmem:[#allocation2 + $0x28] sm:$0x3] %vm286_vm1, %v5450_v0  ;;  %287 = vst.msk [vmem:[#allocation2 + $0x10] sm:$0x3] %vm286_vm1, %v5450_v0  ;;  %s246_s11 = scalar_select %p245_p10, %s5511_s25, 1  ;;  %4154 = vmatpush3.bf16.msra.mxu0 %v5265_v2  ;;  %v5268_v5 = vld [vmem:[%s8686_s1 + $0x50] sm:$0xff]  }
  0x18   : > { %284 = vst.msk [vmem:[#allocation2] sm:$0xff] %vm283_vm0, %v5450_v0  ;;  %285 = vst.msk [vmem:[#allocation2 + $0x8] sm:$0xff] %vm283_vm0, %v5450_v0  ;;  %4155 = vmatprep.subr.bf16.mxu0 %v5266_v3  ;;  %vm705_vm3 = vcmask 1045504   ;;  %s4152_s14 = sshll.u32 %s5511_s25, 12  ;;  %s5452_s19 = smov [#allocation4]  }
  0x19   : > { %291 = vst.msk [vmem:[#allocation2 + $0x30] sm:$0xff] %vm283_vm0, %v5450_v0  ;;  %292 = vst.msk [vmem:[#allocation2 + $0x38] sm:$0xff] %vm283_vm0, %v5450_v0  ;;  %s4151_s16 = sshll.u32 %s246_s11, 8  ;;  %s242_s11 = sand.u32 1, %s5440_s22  }
  0x1a   : > { %293 = vst.msk [vmem:[#allocation2 + $0x40] sm:$0x3] %vm286_vm1, %v5450_v0  ;;  %296 = vst.msk [vmem:[#allocation2 + $0x58] sm:$0x3] %vm286_vm1, %v5450_v0  ;;  %s5773_s26 = scalar_lea.vmem %s8685_s0, %s4151_s16  ;;  %s4036_s12 = sshll.u32 %s242_s11, 8 }
  0x1b   : > { %294 = vst.msk [vmem:[#allocation2 + $0x48] sm:$0xff] %vm283_vm0, %v5450_v0  ;;  %295 = vst.msk [vmem:[#allocation2 + $0x50] sm:$0xff] %vm283_vm0, %v5450_v0  ;;  %v5779_v6 = vld [vmem:[%s5773_s26] sm:$0xff]  ;;  %v5782_v7 = vld [vmem:[%s5773_s26 + $0x8] sm:$0xff]  ;;  %4156 = vmatpush3.bf16.msra.mxu0 %v5267_v4  ;;  %s8485_s13 = scalar_lea.vmem [#allocation4], %s4036_s12  ;;  %s8632_s17 = scalar_lea.hbm %s8691_s6, %s4152_s14 }
  0x1c   : > { %297 = vst.msk [vmem:[#allocation2 + $0x60] sm:$0xff] %vm283_vm0, %v5450_v0  ;;  %298 = vst.msk [vmem:[#allocation2 + $0x68] sm:$0xff] %vm283_vm0, %v5450_v0  ;;  %v5785_v8 = vld [vmem:[%s5773_s26 + $0x10] sm:$0xff]  ;;  %v5792_v9 = vld [vmem:[%s5773_s26 + $0x18] sm:$0xff]  ;;  %4157 = vmatprep.subr.bf16.mxu0 %v5268_v5  ;;  %s3970_s15 = sshll.u32 %s8485_s13, 4  ;;  %s8644_s25 = scalar_lea.sflag [#allocation5], %s242_s11  ;;  %s8634_s15 = int_to_ptr.vmem [resolvable:$true] %s3970_s15 }
  0x1d   : > { %299 = vst.msk [vmem:[#allocation2 + $0x70] sm:$0x3] %vm286_vm1, %v5450_v0  ;;  %302 = vst.msk [vmem:[#allocation2 + $0x88] sm:$0x3] %vm286_vm1, %v5450_v0  ;;  %v5797_v10 = vld [vmem:[%s5773_s26 + $0x20] sm:$0xff]  ;;  %v5800_v11 = vld [vmem:[%s5773_s26 + $0x28] sm:$0xff] }
  0x1e   : > { %300 = vst.msk [vmem:[#allocation2 + $0x78] sm:$0xff] %vm283_vm0, %v5450_v0  ;;  %301 = vst.msk [vmem:[#allocation2 + $0x80] sm:$0xff] %vm283_vm0, %v5450_v0  ;;  %v428_v14 = vld [vmem:[#allocation2 + $0x10] sm:$0x3]  ;;  %v5812_v19 = vld [vmem:[%s5773_s26 + $0x38] sm:$0xff]  ;;  %s5386_s18 = scalar_lea.vmem %s8634_s15, 4096 }
  0x1f   : > { %303 = vst.msk [vmem:[#allocation2 + $0x90] sm:$0xff] %vm283_vm0, %v5450_v0  ;;  %304 = vst.msk [vmem:[#allocation2 + $0x98] sm:$0xff] %vm283_vm0, %v5450_v0  ;;  %v426_v12 = vld [vmem:[#allocation2] sm:$0xff]  ;;  %v427_v13 = vld [vmem:[#allocation2 + $0x8] sm:$0xff]  ;;  %v532_v17 = vrot.slane %v428_v14, 1  ;;  %p5387_p11 = scmp.ne.s32.totalorder %s8634_s15, %s5386_s18  ;;  %s5390_s20 = sshll.u32 %s5452_s19, 4  ;;  %s5391_s20 = int_to_ptr.vmem [resolvable:$false] %s5390_s20 }
  0x20   : > { %305 = vst.msk [vmem:[#allocation2 + $0xa0] sm:$0x3] %vm286_vm1, %v5450_v0  ;;  %308 = vst.msk [vmem:[#allocation2 + $0xb8] sm:$0x3] %vm286_vm1, %v5450_v0  ;;  %v529_v15 = vrot.slane %v426_v12, 1  ;;  %v530_v16 = vrot.slane %v427_v13, 1  ;;  %p5393_p0 = scmp.lt.s32.totalorder %s8634_s15, %s5391_s20 }
  0x21   : > { %306 = vst.msk [vmem:[#allocation2 + $0xa8] sm:$0xff] %vm283_vm0, %v5450_v0  ;;  %307 = vst.msk [vmem:[#allocation2 + $0xb0] sm:$0xff] %vm283_vm0, %v5450_v0  ;;  %v5809_v18 = vld [vmem:[%s5773_s26 + $0x30] sm:$0xff]  ;;  %v5815_v20 = vld [vmem:[%s5773_s26 + $0x40] sm:$0xff]  ;;  %p5388_p12 = pnand %p5387_p11, %p5528_p5 }
  0x22   : > { %309 = vst.msk [vmem:[#allocation2 + $0xc0] sm:$0xff] %vm283_vm0, %v5450_v0  ;;  %310 = vst.msk [vmem:[#allocation2 + $0xc8] sm:$0xff] %vm283_vm0, %v5450_v0  ;;  %v5822_v21 = vld [vmem:[%s5773_s26 + $0x48] sm:$0xff]  ;;  %v5827_v22 = vld [vmem:[%s5773_s26 + $0x50] sm:$0xff]  ;;  %v531_v30 = vsel %vm528_vm2, %v529_v15, %v530_v16  ;;  %v533_v31 = vsel %vm528_vm2, %v530_v16, %v532_v17 }
  0x23   : > { %311 = vst.msk [vmem:[#allocation2 + $0xd0] sm:$0x3] %vm286_vm1, %v5450_v0  ;;  %314 = vst.msk [vmem:[#allocation2 + $0xe8] sm:$0x3] %vm286_vm1, %v5450_v0  ;;  %v5830_v23 = vld [vmem:[%s5773_s26 + $0x58] sm:$0xff]  ;;  %v5839_v24 = vld [vmem:[%s5773_s26 + $0x60] sm:$0xff]  ;;  %v4769_v42 = vpack.i.bf16 %v533_v31, %v531_v30  ;;  %p5389_p13 = pneg %p5388_p12 }
  0x24   : > { %312 = vst.msk [vmem:[#allocation2 + $0xd8] sm:$0xff] %vm283_vm0, %v5450_v0  ;;  %313 = vst.msk [vmem:[#allocation2 + $0xe0] sm:$0xff] %vm283_vm0, %v5450_v0  ;;  %v5842_v25 = vld [vmem:[%s5773_s26 + $0x68] sm:$0xff]  ;;  %v5845_v26 = vld [vmem:[%s5773_s26 + $0x70] sm:$0xff] }
  0x25   : > { %315 = vst.msk [vmem:[#allocation2 + $0xf0] sm:$0xff] %vm283_vm0, %v5450_v0  ;;  %316 = vst.msk [vmem:[#allocation2 + $0xf8] sm:$0xff] %vm283_vm0, %v5450_v0  ;;  %v5852_v27 = vld [vmem:[%s5773_s26 + $0x78] sm:$0xff]  ;;  %v5857_v28 = vld [vmem:[%s5773_s26 + $0x80] sm:$0xff] }
  0x26   : > { %317 = vst.msk [vmem:[#allocation2 + $0x100] sm:$0x3] %vm286_vm1, %v5450_v0  ;;  %320 = vst.msk [vmem:[#allocation2 + $0x118] sm:$0x3] %vm286_vm1, %v5450_v0  ;;  %v5860_v29 = vld [vmem:[%s5773_s26 + $0x88] sm:$0xff]  ;;  %v5871_v32 = vld [vmem:[%s5773_s26 + $0x90] sm:$0xff] }
  0x27   : > { %318 = vst.msk [vmem:[#allocation2 + $0x108] sm:$0xff] %vm283_vm0, %v5450_v0  ;;  %319 = vst.msk [vmem:[#allocation2 + $0x110] sm:$0xff] %vm283_vm0, %v5450_v0  ;;  %v5874_v33 = vld [vmem:[%s5773_s26 + $0x98] sm:$0xff]  ;;  %v5877_v34 = vld [vmem:[%s5773_s26 + $0xa0] sm:$0xff] }
  0x28   : > { %321 = vst.msk [vmem:[#allocation2 + $0x120] sm:$0xff] %vm283_vm0, %v5450_v0  ;;  %322 = vst.msk [vmem:[#allocation2 + $0x128] sm:$0xff] %vm283_vm0, %v5450_v0  ;;  %v5960_v16 = vld [vmem:[%s5773_s26 + $0xa8] sm:$0xff] }
  0x29   : > { %323 = vst.msk [vmem:[#allocation2 + $0x130] sm:$0x3] %vm286_vm1, %v5450_v0  ;;  %326 = vst.msk [vmem:[#allocation2 + $0x148] sm:$0x3] %vm286_vm1, %v5450_v0 }
  0x2a   : > { %324 = vst.msk [vmem:[#allocation2 + $0x138] sm:$0xff] %vm283_vm0, %v5450_v0  ;;  %325 = vst.msk [vmem:[#allocation2 + $0x140] sm:$0xff] %vm283_vm0, %v5450_v0 }
  0x2b   : > { %327 = vst.msk [vmem:[#allocation2 + $0x150] sm:$0xff] %vm283_vm0, %v5450_v0  ;;  %328 = vst.msk [vmem:[#allocation2 + $0x158] sm:$0xff] %vm283_vm0, %v5450_v0 }
  0x2c   : > { %329 = vst.msk [vmem:[#allocation2 + $0x160] sm:$0x3] %vm286_vm1, %v5450_v0  ;;  %332 = vst.msk [vmem:[#allocation2 + $0x178] sm:$0x3] %vm286_vm1, %v5450_v0 }
  0x2d   : > { %330 = vst.msk [vmem:[#allocation2 + $0x168] sm:$0xff] %vm283_vm0, %v5450_v0  ;;  %331 = vst.msk [vmem:[#allocation2 + $0x170] sm:$0xff] %vm283_vm0, %v5450_v0 }
  0x2e   : > { %333 = vst.msk [vmem:[#allocation2 + $0x180] sm:$0xff] %vm283_vm0, %v5450_v0  ;;  %334 = vst.msk [vmem:[#allocation2 + $0x188] sm:$0xff] %vm283_vm0, %v5450_v0 }
  0x2f   : > { %335 = vst.msk [vmem:[#allocation2 + $0x190] sm:$0x3] %vm286_vm1, %v5450_v0  ;;  %338 = vst.msk [vmem:[#allocation2 + $0x1a8] sm:$0x3] %vm286_vm1, %v5450_v0 }
  0x30   : > { %336 = vst.msk [vmem:[#allocation2 + $0x198] sm:$0xff] %vm283_vm0, %v5450_v0  ;;  %337 = vst.msk [vmem:[#allocation2 + $0x1a0] sm:$0xff] %vm283_vm0, %v5450_v0 }
  0x31   : > { %339 = vst.msk [vmem:[#allocation3] sm:$0xff] %vm283_vm0, %v5450_v0  ;;  %340 = vst.msk [vmem:[#allocation3 + $0x8] sm:$0xff] %vm283_vm0, %v5450_v0 }
  0x32   : > { %341 = vst.msk [vmem:[#allocation3 + $0x10] sm:$0x3] %vm286_vm1, %v5450_v0  ;;  %344 = vst.msk [vmem:[#allocation3 + $0x28] sm:$0x3] %vm286_vm1, %v5450_v0 }
  0x33   : > { %342 = vst.msk [vmem:[#allocation3 + $0x18] sm:$0xff] %vm283_vm0, %v5450_v0  ;;  %343 = vst.msk [vmem:[#allocation3 + $0x20] sm:$0xff] %vm283_vm0, %v5450_v0 }
  0x34   : > { %345 = vst.msk [vmem:[#allocation3 + $0x30] sm:$0xff] %vm283_vm0, %v5450_v0  ;;  %346 = vst.msk [vmem:[#allocation3 + $0x38] sm:$0xff] %vm283_vm0, %v5450_v0 }
  0x35   : > { %347 = vst.msk [vmem:[#allocation3 + $0x40] sm:$0x3] %vm286_vm1, %v5450_v0  ;;  %350 = vst.msk [vmem:[#allocation3 + $0x58] sm:$0x3] %vm286_vm1, %v5450_v0 }
  0x36   : > { %348 = vst.msk [vmem:[#allocation3 + $0x48] sm:$0xff] %vm283_vm0, %v5450_v0  ;;  %349 = vst.msk [vmem:[#allocation3 + $0x50] sm:$0xff] %vm283_vm0, %v5450_v0 }
  0x37   : > { %351 = vst.msk [vmem:[#allocation3 + $0x60] sm:$0xff] %vm283_vm0, %v5450_v0  ;;  %352 = vst.msk [vmem:[#allocation3 + $0x68] sm:$0xff] %vm283_vm0, %v5450_v0 }
  0x38   : > { %353 = vst.msk [vmem:[#allocation3 + $0x70] sm:$0x3] %vm286_vm1, %v5450_v0  ;;  %356 = vst.msk [vmem:[#allocation3 + $0x88] sm:$0x3] %vm286_vm1, %v5450_v0 }
  0x39   : > { %354 = vst.msk [vmem:[#allocation3 + $0x78] sm:$0xff] %vm283_vm0, %v5450_v0  ;;  %355 = vst.msk [vmem:[#allocation3 + $0x80] sm:$0xff] %vm283_vm0, %v5450_v0 }
  0x3a   : > { %357 = vst.msk [vmem:[#allocation3 + $0x90] sm:$0xff] %vm283_vm0, %v5450_v0  ;;  %358 = vst.msk [vmem:[#allocation3 + $0x98] sm:$0xff] %vm283_vm0, %v5450_v0 }
  0x3b   : > { %359 = vst.msk [vmem:[#allocation3 + $0xa0] sm:$0x3] %vm286_vm1, %v5450_v0  ;;  %362 = vst.msk [vmem:[#allocation3 + $0xb8] sm:$0x3] %vm286_vm1, %v5450_v0 }
  0x3c   : > { %360 = vst.msk [vmem:[#allocation3 + $0xa8] sm:$0xff] %vm283_vm0, %v5450_v0  ;;  %361 = vst.msk [vmem:[#allocation3 + $0xb0] sm:$0xff] %vm283_vm0, %v5450_v0 }
  0x3d   : > { %363 = vst.msk [vmem:[#allocation3 + $0xc0] sm:$0xff] %vm283_vm0, %v5450_v0  ;;  %364 = vst.msk [vmem:[#allocation3 + $0xc8] sm:$0xff] %vm283_vm0, %v5450_v0 }
  0x3e   : > { %365 = vst.msk [vmem:[#allocation3 + $0xd0] sm:$0x3] %vm286_vm1, %v5450_v0  ;;  %368 = vst.msk [vmem:[#allocation3 + $0xe8] sm:$0x3] %vm286_vm1, %v5450_v0 }
  0x3f   : > { %366 = vst.msk [vmem:[#allocation3 + $0xd8] sm:$0xff] %vm283_vm0, %v5450_v0  ;;  %367 = vst.msk [vmem:[#allocation3 + $0xe0] sm:$0xff] %vm283_vm0, %v5450_v0 }
  0x40   : > { %369 = vst.msk [vmem:[#allocation3 + $0xf0] sm:$0xff] %vm283_vm0, %v5450_v0  ;;  %370 = vst.msk [vmem:[#allocation3 + $0xf8] sm:$0xff] %vm283_vm0, %v5450_v0 }
  0x41   : > { %371 = vst.msk [vmem:[#allocation3 + $0x100] sm:$0x3] %vm286_vm1, %v5450_v0  ;;  %374 = vst.msk [vmem:[#allocation3 + $0x118] sm:$0x3] %vm286_vm1, %v5450_v0 }
  0x42   : > { %372 = vst.msk [vmem:[#allocation3 + $0x108] sm:$0xff] %vm283_vm0, %v5450_v0  ;;  %373 = vst.msk [vmem:[#allocation3 + $0x110] sm:$0xff] %vm283_vm0, %v5450_v0 }
  0x43   : > { %375 = vst.msk [vmem:[#allocation3 + $0x120] sm:$0xff] %vm283_vm0, %v5450_v0  ;;  %376 = vst.msk [vmem:[#allocation3 + $0x128] sm:$0xff] %vm283_vm0, %v5450_v0 }
  0x44   : > { %377 = vst.msk [vmem:[#allocation3 + $0x130] sm:$0x3] %vm286_vm1, %v5450_v0  ;;  %380 = vst.msk [vmem:[#allocation3 + $0x148] sm:$0x3] %vm286_vm1, %v5450_v0 }
  0x45   : > { %378 = vst.msk [vmem:[#allocation3 + $0x138] sm:$0xff] %vm283_vm0, %v5450_v0  ;;  %379 = vst.msk [vmem:[#allocation3 + $0x140] sm:$0xff] %vm283_vm0, %v5450_v0 }
  0x46   : > { %381 = vst.msk [vmem:[#allocation3 + $0x150] sm:$0xff] %vm283_vm0, %v5450_v0  ;;  %382 = vst.msk [vmem:[#allocation3 + $0x158] sm:$0xff] %vm283_vm0, %v5450_v0 }
  0x47   : > { %383 = vst.msk [vmem:[#allocation3 + $0x160] sm:$0x3] %vm286_vm1, %v5450_v0  ;;  %386 = vst.msk [vmem:[#allocation3 + $0x178] sm:$0x3] %vm286_vm1, %v5450_v0 }
  0x48   : > { %384 = vst.msk [vmem:[#allocation3 + $0x168] sm:$0xff] %vm283_vm0, %v5450_v0  ;;  %385 = vst.msk [vmem:[#allocation3 + $0x170] sm:$0xff] %vm283_vm0, %v5450_v0 }
  0x49   : > { %387 = vst.msk [vmem:[#allocation3 + $0x180] sm:$0xff] %vm283_vm0, %v5450_v0  ;;  %388 = vst.msk [vmem:[#allocation3 + $0x188] sm:$0xff] %vm283_vm0, %v5450_v0 }
  0x4a   : > { %389 = vst.msk [vmem:[#allocation3 + $0x190] sm:$0x3] %vm286_vm1, %v5450_v0  ;;  %392 = vst.msk [vmem:[#allocation3 + $0x1a8] sm:$0x3] %vm286_vm1, %v5450_v0 }
  0x4b   : > { %390 = vst.msk [vmem:[#allocation3 + $0x198] sm:$0xff] %vm283_vm0, %v5450_v0  ;;  %391 = vst.msk [vmem:[#allocation3 + $0x1a0] sm:$0xff] %vm283_vm0, %v5450_v0 }
  0x4c   : > { %8821 = vst [vmem:[#allocation7_spill] sm:$0xff] %v5779_v6  ;;  %8822 = vst [vmem:[#allocation8_spill] sm:$0xff] %v5782_v7 }
  0x4d   : > { %8823 = vst [vmem:[#allocation9_spill] sm:$0xff] %v5785_v8  ;;  %394 = vst.msk [vmem:[#allocation2 + $0x19] sm:$0xff] %vm283_vm0, %v5779_v6 }
  0x4e   : > { %395 = vst.msk [vmem:[#allocation2 + $0x21] sm:$0xff] %vm283_vm0, %v5782_v7  ;;  %8824 = vst [vmem:[#allocation10_spill] sm:$0xff] %v5792_v9 }
  0x4f   : > { %396 = vst.msk [vmem:[#allocation2 + $0x31] sm:$0xff] %vm283_vm0, %v5785_v8  ;;  %8825 = vst [vmem:[#allocation11_spill] sm:$0xff] %v5797_v10 }
  0x50   : > { %8826 = vst [vmem:[#allocation12_spill] sm:$0xff] %v5800_v11  ;;  %397 = vst.msk [vmem:[#allocation2 + $0x39] sm:$0xff] %vm283_vm0, %v5792_v9 }
  0x51   : > { %398 = vst.msk [vmem:[#allocation2 + $0x49] sm:$0xff] %vm283_vm0, %v5797_v10  ;;  %399 = vst.msk [vmem:[#allocation2 + $0x51] sm:$0xff] %vm283_vm0, %v5800_v11 }
  0x52   : > { %8827 = vst [vmem:[#allocation13_spill] sm:$0xff] %v5809_v18  ;;  %8828 = vst [vmem:[#allocation14_spill] sm:$0xff] %v5812_v19 }
  0x53   : > { %8829 = vst [vmem:[#allocation15_spill] sm:$0xff] %v5815_v20  ;;  %400 = vst.msk [vmem:[#allocation2 + $0x61] sm:$0xff] %vm283_vm0, %v5809_v18 }
  0x54   : > { %401 = vst.msk [vmem:[#allocation2 + $0x69] sm:$0xff] %vm283_vm0, %v5812_v19  ;;  %8830 = vst [vmem:[#allocation16_spill] sm:$0xff] %v5822_v21  ;;  %v5879_v35 = vld [vmem:[#allocation2 + $0x18] sm:$0xff] }
  0x55   : > { %402 = vst.msk [vmem:[#allocation2 + $0x79] sm:$0xff] %vm283_vm0, %v5815_v20  ;;  %8831 = vst [vmem:[#allocation17_spill] sm:$0xff] %v5827_v22  ;;  %v5881_v36 = vld [vmem:[#allocation2 + $0x20] sm:$0xff]  ;;  %v534_v40 = vrot.slane %v5879_v35, 1  ;;  %v5899_v44 = vld [vmem:[#allocation2 + $0x28] sm:$0x3] }
  0x56   : > { %8832 = vst [vmem:[#allocation18_spill] sm:$0xff] %v5830_v23  ;;  %403 = vst.msk [vmem:[#allocation2 + $0x81] sm:$0xff] %vm283_vm0, %v5822_v21  ;;  %v5883_v37 = vld [vmem:[#allocation2 + $0x30] sm:$0xff]  ;;  %v4764_v38 = vpack.i.bf16 %v5881_v36, %v5879_v35  ;;  %v535_v41 = vrot.slane %v5881_v36, 1  ;;  %v537_v49 = vrot.slane %v5899_v44, 1 }
  0x57   : > { %404 = vst.msk [vmem:[#allocation2 + $0x91] sm:$0xff] %vm283_vm0, %v5827_v22  ;;  %405 = vst.msk [vmem:[#allocation2 + $0x99] sm:$0xff] %vm283_vm0, %v5830_v23  ;;  %v5893_v39 = vld [vmem:[#allocation2 + $0x38] sm:$0xff]  ;;  %v5901_v45 = vld [vmem:[#allocation2 + $0x40] sm:$0x3]  ;;  %v539_v46 = vrot.slane %v5883_v37, 1 }
  0x58   : > { %8833 = vst [vmem:[#allocation19_spill] sm:$0xff] %v5839_v24  ;;  %8834 = vst [vmem:[#allocation20_spill] sm:$0xff] %v5842_v25  ;;  %v4774_v43 = vpack.i.bf16 %v5893_v39, %v5883_v37  ;;  %4765 = vrot.lane.b32.xlu0 %v4764_v38, %s5451_s9  ;;  %v5905_v47 = vld [vmem:[#allocation2 + $0x48] sm:$0xff]  ;;  %v5908_v48 = vsel %vm528_vm2, %v534_v40, %v535_v41  ;;  %v540_v50 = vrot.slane %v5893_v39, 1  ;;  %v542_v51 = vrot.slane %v5901_v45, 1  ;;  %v5914_v52 = vld [vmem:[#allocation2 + $0x50] sm:$0xff] }
  0x59   : > { %8835 = vst [vmem:[#allocation21_spill] sm:$0xff] %v5845_v26  ;;  %406 = vst.msk [vmem:[#allocation2 + $0xa9] sm:$0xff] %vm283_vm0, %v5839_v24  ;;  %v544_v53 = vrot.slane %v5905_v47, 1  ;;  %v5918_v54 = vsel %vm528_vm2, %v535_v41, %v537_v49  ;;  %v5926_v57 = vld [vmem:[#allocation2 + $0x58] sm:$0x3]  ;;  %v545_v58 = vrot.slane %v5914_v52, 1  ;;  %v4784_v61 = vpack.i.bf16 %v5914_v52, %v5905_v47 }
  0x5a   : > { %407 = vst.msk [vmem:[#allocation2 + $0xb1] sm:$0xff] %vm283_vm0, %v5842_v25  ;;  %8836 = vst [vmem:[#allocation22_spill] sm:$0xff] %v5852_v27  ;;  %4775 = vrot.lane.b32.xlu1 %v4774_v43, %s5451_s9  ;;  %v5921_v55 = vsel %vm528_vm2, %v539_v46, %v540_v50  ;;  %v5924_v56 = vsel %vm528_vm2, %v540_v50, %v542_v51  ;;  %v4779_v59 = vpack.i.bf16 %v5918_v54, %v5908_v48  ;;  %v5936_v62 = vld [vmem:[#allocation2 + $0x60] sm:$0xff]  ;;  %v5970_v38 = vld [vmem:[%s5773_s26 + $0xb0] sm:$0xff] }
  0x5b   : > { %408 = vst.msk [vmem:[#allocation2 + $0xc1] sm:$0xff] %vm283_vm0, %v5845_v26  ;;  %8837 = vst [vmem:[#allocation23_spill] sm:$0xff] %v5857_v28  ;;  %v5931_v60 = vld [vmem:[#allocation2 + $0x70] sm:$0x3]  ;;  %v5938_v63 = vld [vmem:[#allocation2 + $0x68] sm:$0xff]  ;;  %v547_v0 = vrot.slane %v5926_v57, 1  ;;  %v4789_v1 = vpack.i.bf16 %v5924_v56, %v5921_v55  ;;  %v5948_v5 = vsel %vm528_vm2, %v544_v53, %v545_v58 }
  0x5c   : > { %8838 = vst [vmem:[#allocation24_spill] sm:$0xff] %v5860_v29  ;;  %409 = vst.msk [vmem:[#allocation2 + $0xc9] sm:$0xff] %vm283_vm0, %v5852_v27  ;;  %4770 = vrot.lane.b32.xlu0 %v4769_v42, %s5451_s9  ;;  %v549_v2 = vrot.slane %v5936_v62, 1  ;;  %v550_v3 = vrot.slane %v5938_v63, 1  ;;  %v552_v4 = vrot.slane %v5931_v60, 1  ;;  %v5955_v14 = vld [vmem:[#allocation2 + $0x78] sm:$0xff]  ;;  %v4794_v17 = vpack.i.bf16 %v5938_v63, %v5936_v62 }
  0x5d   : > { %410 = vst.msk [vmem:[#allocation2 + $0xd9] sm:$0xff] %vm283_vm0, %v5857_v28  ;;  %411 = vst.msk [vmem:[#allocation2 + $0xe1] sm:$0xff] %vm283_vm0, %v5860_v29  ;;  %v5951_v12 = vsel %vm528_vm2, %v545_v58, %v547_v0  ;;  %v5953_v13 = vld [vmem:[#allocation2 + $0x88] sm:$0x3]  ;;  %v5957_v15 = vld [vmem:[#allocation2 + $0x80] sm:$0xff]  ;;  %v554_v30 = vrot.slane %v5955_v14, 1 }
  0x5e   : > { %8839 = vst [vmem:[#allocation25_spill] sm:$0xff] %v5871_v32  ;;  %8840 = vst [vmem:[#allocation26_spill] sm:$0xff] %v5874_v33  ;;  %4780 = vrot.lane.b32.xlu1 %v4779_v59, %s5451_s9  ;;  %v555_v31 = vrot.slane %v5957_v15, 1  ;;  %v5973_v40 = vld [vmem:[%s5773_s26 + $0xb8] sm:$0xff]  ;;  %v5976_v41 = vld [vmem:[%s5773_s26 + $0xc0] sm:$0xff]  ;;  %v4799_v42 = vpack.i.bf16 %v5951_v12, %v5948_v5  ;;  %v5982_v43 = vsel %vm528_vm2, %v549_v2, %v550_v3  ;;  %v557_v49 = vrot.slane %v5953_v13, 1 }
  0x5f   : > { %8841 = vst [vmem:[#allocation27_spill] sm:$0xff] %v5877_v34  ;;  %412 = vst.msk [vmem:[#allocation2 + $0xf1] sm:$0xff] %vm283_vm0, %v5871_v32  ;;  %v5985_v46 = vsel %vm528_vm2, %v550_v3, %v552_v4  ;;  %v5993_v50 = vld [vmem:[%s5773_s26 + $0xc8] sm:$0xff]  ;;  %v5997_v51 = vld [vmem:[#allocation2 + $0x90] sm:$0xff]  ;;  %v4804_v4 = vpack.i.bf16 %v5957_v15, %v5955_v14 }
  0x60   : > { %413 = vst.msk [vmem:[#allocation2 + $0xf9] sm:$0xff] %vm283_vm0, %v5874_v33  ;;  %414 = vst.msk [vmem:[#allocation2 + $0x109] sm:$0xff] %vm283_vm0, %v5877_v34  ;;  %4785 = vrot.lane.b32.xlu0 %v4784_v61, %s5451_s9  ;;  %v5999_v53 = vld [vmem:[#allocation2 + $0x98] sm:$0xff]  ;;  %v6001_v58 = vld [vmem:[#allocation2 + $0xa0] sm:$0x3] }
  0x61   : > { %8842 = vst [vmem:[#allocation28_spill] sm:$0xff] %v5908_v48  ;;  %8843 = vst [vmem:[#allocation29_spill] sm:$0xff] %v5918_v54  ;;  %v6006_v59 = vld [vmem:[%s5773_s26 + $0xd0] sm:$0xff]  ;;  %v6009_v61 = vld [vmem:[%s5773_s26 + $0xd8] sm:$0xff] }
  0x62   : > { %8844 = vst [vmem:[#allocation30_spill] sm:$0xff] %v5921_v55  ;;  %8845 = vst [vmem:[#allocation31_spill] sm:$0xff] %v5924_v56  ;;  %4790 = vrot.lane.b32.xlu1 %v4789_v1, %s5451_s9  ;;  %v6011_v0 = vld [vmem:[#allocation2 + $0xa8] sm:$0xff]  ;;  %v6018_v1 = vld [vmem:[%s5773_s26 + $0xe0] sm:$0xff] }
  0x63   : > { %8846 = vst [vmem:[#allocation32_spill] sm:$0xff] %v5948_v5  ;;  %8847 = vst [vmem:[#allocation33_spill] sm:$0xff] %v5951_v12  ;;  %v6021_v2 = vld [vmem:[%s5773_s26 + $0xe8] sm:$0xff]  ;;  %v6024_v3 = vld [vmem:[%s5773_s26 + $0xf0] sm:$0xff] }
  0x64   : > { %8848 = vst [vmem:[#allocation34_spill] sm:$0xff] %v5960_v16  ;;  %415 = vst.msk [vmem:[#allocation2 + $0x111] sm:$0xff] %vm283_vm0, %v5960_v16  ;;  %4795 = vrot.lane.b32.xlu0 %v4794_v17, %s5451_s9  ;;  %v5269_v17 = vld [vmem:[%s8686_s1 + $0x10] sm:$0xff]   ;;  %v6049_v16 = vsel %vm528_vm2, %v554_v30, %v555_v31  ;;  %v6063_v34 = vld [vmem:[#allocation2 + $0xc0] sm:$0xff] }
  0x65   : > { %8849 = vst [vmem:[#allocation35_spill] sm:$0xff] %v5970_v38  ;;  %8850 = vst [vmem:[#allocation36_spill] sm:$0xff] %v5973_v40  ;;  %4158 = vmatpush3.bf16.msra.mxu0 %v5269_v17  ;;  %v4814_v17 = vpack.i.bf16 %v5999_v53, %v5997_v51  ;;  %v6080_v33 = vld [vmem:[#allocation2 + $0xd8] sm:$0xff]  ;;  %v6084_v28 = vld [vmem:[#allocation2 + $0xe8] sm:$0x3]  ;;  %v569_v23 = vrot.slane %v6063_v34, 1 }
  0x66   : > { %8851 = vst [vmem:[#allocation37_spill] sm:$0xff] %v5976_v41  ;;  %8852 = vst [vmem:[#allocation38_spill] sm:$0xff] %v5982_v43  ;;  %4800 = vrot.lane.b32.xlu1 %v4799_v42, %s5451_s9  ;;  %v562_v42 = vrot.slane %v6001_v58, 1  ;;  %v5272_v24 = vld [vmem:[%s8686_s1 + $0x60] sm:$0xff]   ;;  %v6101_v21 = vld [vmem:[#allocation2 + $0xf0] sm:$0xff]  ;;  %v574_v11 = vrot.slane %v6080_v33, 1 }
  0x67   : > { %8853 = vst [vmem:[#allocation39_spill] sm:$0xff] %v5985_v46  ;;  %416 = vst.msk [vmem:[#allocation2 + $0x121] sm:$0xff] %vm283_vm0, %v5970_v38  ;;  %v6093_v27 = vld [vmem:[#allocation2 + $0x100] sm:$0x3]  ;;  %v5294_v48 = vld [vmem:[%s8686_s1 + $0xf0] sm:$0xff]  }
  0x68   : > { %417 = vst.msk [vmem:[#allocation2 + $0x129] sm:$0xff] %vm283_vm0, %v5973_v40  ;;  %8854 = vst [vmem:[#allocation40_spill] sm:$0xff] %v5993_v50  ;;  %v560_v40 = vrot.slane %v5999_v53, 1  ;;  %4805 = vrot.lane.b32.xlu0 %v4804_v4, %s5451_s9  ;;  %v564_v4 = vrot.slane %v6011_v0, 1 }
  0x69   : > { %418 = vst.msk [vmem:[#allocation2 + $0x139] sm:$0xff] %vm283_vm0, %v5976_v41  ;;  %419 = vst.msk [vmem:[#allocation2 + $0x141] sm:$0xff] %vm283_vm0, %v5993_v50  ;;  %v4809_v50 = vpack.i.bf16 %v5985_v46, %v5982_v43  ;;  %v6031_v41 = vld [vmem:[#allocation2 + $0xb8] sm:$0x3] }
  0x6a   : > { %8855 = vst [vmem:[#allocation41_spill] sm:$0xff] %v6006_v59  ;;  %8856 = vst [vmem:[#allocation42_spill] sm:$0xff] %v6009_v61  ;;  %v567_v25 = vrot.slane %v6031_v41, 1  ;;  %v6099_v26 = vsel %vm528_vm2, %v560_v40, %v562_v42  ;;  %v579_v42 = vrot.slane %v6101_v21, 1 }
  0x6b   : > { %420 = vst.msk [vmem:[#allocation2 + $0x151] sm:$0xff] %vm283_vm0, %v6006_v59  ;;  %421 = vst.msk [vmem:[#allocation2 + $0x159] sm:$0xff] %vm283_vm0, %v6009_v61  ;;  %v6038_v61 = vld [vmem:[%s5773_s26 + $0xf8] sm:$0xff]  ;;  %v6046_v59 = vld [vmem:[#allocation2 + $0xb0] sm:$0xff]  ;;  %4810 = vrot.lane.b32.xlu1 %v4809_v50, %s5451_s9  ;;  %s5392_s26 = scalar_lea.vmem %s5391_s20, 8192 }
  0x6c   : > { %8857 = vst [vmem:[#allocation43_spill] sm:$0xff] %v6018_v1  ;;  %8858 = vst [vmem:[#allocation44_spill] sm:$0xff] %v6021_v2  ;;  %v4824_v30 = vpack.i.bf16 %v6046_v59, %v6011_v0  ;;  %v565_v32 = vrot.slane %v6046_v59, 1  ;;  %v6103_v50 = vld [vmem:[#allocation2 + $0xf8] sm:$0xff]  ;;  %4815 = vrot.lane.b32.xlu0 %v4814_v17, %s5451_s9  ;;  %v6117_v18 = vld [vmem:[#allocation2 + $0x110] sm:$0xff]  ;;  %p5394_p1 = scmp.lt.s32.totalorder %s5392_s26, %s5386_s18 }
  0x6d   : > { %8859 = vst [vmem:[#allocation45_spill] sm:$0xff] %v6024_v3  ;;  %422 = vst.msk [vmem:[#allocation2 + $0x169] sm:$0xff] %vm283_vm0, %v6018_v1  ;;  %v6052_v1 = vsel %vm528_vm2, %v555_v31, %v557_v49  ;;  %v6065_v31 = vld [vmem:[#allocation2 + $0xc8] sm:$0xff]  ;;  %v6067_v49 = vld [vmem:[#allocation2 + $0xd0] sm:$0x3]  ;;  %v580_v9 = vrot.slane %v6103_v50, 1 }
  0x6e   : > { %423 = vst.msk [vmem:[#allocation2 + $0x171] sm:$0xff] %vm283_vm0, %v6021_v2  ;;  %8860 = vst [vmem:[#allocation46_spill] sm:$0xff] %v6038_v61  ;;  %v559_v2 = vrot.slane %v5997_v51, 1  ;;  %v4819_v29 = vpack.i.bf16 %v6052_v1, %v6049_v16  ;;  %v570_v20 = vrot.slane %v6065_v31, 1  ;;  %v572_v22 = vrot.slane %v6067_v49, 1  ;;  %v6119_v7 = vld [vmem:[#allocation2 + $0x120] sm:$0xff]  ;;  %p5395_p2 = por %p5394_p1, %p5393_p0 }
  0x6f   : > { %424 = vst.msk [vmem:[#allocation2 + $0x181] sm:$0xff] %vm283_vm0, %v6024_v3  ;;  %8861 = vst [vmem:[#allocation47_spill] sm:$0xff] %v6049_v16  ;;  %v5270_v3 = vld [vmem:[%s8686_s1 + $0x58] sm:$0xff]   ;;  %v5273_v17 = vld [vmem:[%s8686_s1 + $0x20] sm:$0xff]   ;;  %v6133_v16 = vsel %vm528_vm2, %v564_v4, %v565_v32  ;;  %v6136_v46 = vsel %vm528_vm2, %v565_v32, %v567_v25  ;;  %v4834_v32 = vpack.i.bf16 %v6065_v31, %v6063_v34 }
  0x70   : > { %8862 = vst [vmem:[#allocation48_spill] sm:$0xff] %v6052_v1  ;;  %425 = vst.msk [vmem:[#allocation2 + $0x189] sm:$0xff] %vm283_vm0, %v6038_v61  ;;  %4159 = vmatprep.subr.bf16.mxu0 %v5270_v3  ;;  %v5271_v61 = vld [vmem:[%s8686_s1 + $0x18] sm:$0xff]   ;;  %v6082_v3 = vld [vmem:[#allocation2 + $0xe0] sm:$0xff]  ;;  %v6088_v38 = vsel %vm528_vm2, %v559_v2, %v560_v40  ;;  %v577_v40 = vrot.slane %v6084_v28, 1  ;;  %4820 = vrot.lane.b32.xlu1 %v4819_v29, %s5451_s9  ;;  %v6164_v8 = vsel %vm528_vm2, %v569_v23, %v570_v20  ;;  %p5396_p3 = pnand %p5395_p2, %p5389_p13 }
  0x71   : > { %8863 = vst [vmem:[#allocation49_spill] sm:$0xff] %v6088_v38  ;;  %8864 = vst [vmem:[#allocation50_spill] sm:$0xff] %v6099_v26  ;;  %v6105_v2 = vld [vmem:[#allocation2 + $0x108] sm:$0xff]  ;;  %4160 = vmatpush3.bf16.msra.mxu0 %v5271_v61  ;;  %v575_v19 = vrot.slane %v6082_v3, 1  ;;  %v6114_v10 = vld [vmem:[#allocation2 + $0x118] sm:$0x3]  ;;  %v4829_v1 = vpack.i.bf16 %v6099_v26, %v6088_v38  ;;  %4825 = vrot.lane.b32.xlu0 %v4824_v30, %s5451_s9  ;;  %v6167_v30 = vsel %vm528_vm2, %v570_v20, %v572_v22 }
  0x72   : > { %4161 = vmatprep.subr.bf16.mxu0 %v5272_v24  ;;  %v582_v61 = vrot.slane %v6093_v27, 1  ;;  %8865 = vst [vmem:[#allocation51_spill] sm:$0xff] %v6133_v16  ;;  %8866 = vst [vmem:[#allocation52_spill] sm:$0xff] %v6136_v46  ;;  %v6138_v6 = vld [vmem:[#allocation2 + $0x128] sm:$0xff]  ;;  %v6145_v26 = vld [vmem:[#allocation2 + $0x130] sm:$0x3]  ;;  %v4844_v23 = vpack.i.bf16 %v6082_v3, %v6080_v33  ;;  %v4864_v5 = vpack.i.bf16 %v6117_v18, %v6105_v2 }
  0x73   : > { %v5274_v24 = vld [vmem:[%s8686_s1 + $0x68] sm:$0xff]   ;;  %v5276_v29 = vld [vmem:[%s8686_s1 + $0x70] sm:$0xff]   ;;  %v6161_v38 = vld [vmem:[#allocation2 + $0x138] sm:$0xff]  ;;  %8867 = vst [vmem:[#allocation53_spill] sm:$0xff] %v6164_v8  ;;  %v6203_v56 = vsel %vm528_vm2, %v575_v19, %v577_v40  ;;  %v8876_v20 = vrot.slane %v6105_v2, 1 }
  0x74   : > { %v5275_v25 = vld [vmem:[%s8686_s1 + $0x28] sm:$0xff]   ;;  %4830 = vrot.lane.b32.xlu1 %v4829_v1, %s5451_s9  ;;  %8868 = vst [vmem:[#allocation54_spill] sm:$0xff] %v6167_v30  ;;  %v6169_v43 = vld [vmem:[#allocation2 + $0x140] sm:$0xff]  ;;  %v5277_v1 = vld [vmem:[%s8686_s1 + $0x30] sm:$0xff]   ;;  %v6213_v55 = vsel %vm528_vm2, %v580_v9, %v582_v61 }
  0x75   : > { %4162 = vmatpush3.bf16.msra.mxu0 %v5273_v17  ;;  %v4839_v17 = vpack.i.bf16 %v6136_v46, %v6133_v16  ;;  %v6174_v12 = vld [vmem:[#allocation2 + $0x160] sm:$0x3]  ;;  %4835 = vrot.lane.b32.xlu0 %v4834_v32, %s5451_s9  ;;  %v6183_v22 = vld [vmem:[#allocation2 + $0x178] sm:$0x3]  ;;  %v6191_v46 = vld [vmem:[#allocation2 + $0x150] sm:$0xff]  ;;  %8871 = vst [vmem:[#allocation57_spill] sm:$0xff] %v6203_v56 }
  0x76   : > { %4163 = vmatprep.subr.bf16.mxu0 %v5274_v24  ;;  %v6171_v24 = vld [vmem:[#allocation2 + $0x148] sm:$0x3]  ;;  %v5278_v4 = vld [vmem:[%s8686_s1 + $0x78] sm:$0xff]   ;;  %8873 = vst [vmem:[#allocation59_spill] sm:$0xff] %v6213_v55  ;;  %v5281_v61 = vld [vmem:[%s8686_s1 + $0xc0] sm:$0xff]  }
  0x77   : > { %v6193_v32 = vld [vmem:[#allocation2 + $0x158] sm:$0xff]  ;;  %v6195_v16 = vld [vmem:[#allocation2 + $0x168] sm:$0xff]  ;;  %4265 = vmatprep.subr.bf16.mxu1 %v5281_v61 }
  0x78   : > { %4840 = vrot.lane.b32.xlu1 %v4839_v17, %s5451_s9  ;;  %8869 = vst [vmem:[#allocation55_spill] sm:$0xff] %v6195_v16  ;;  %v6205_v17 = vld [vmem:[#allocation2 + $0x170] sm:$0xff]  ;;  %v5289_v40 = vld [vmem:[%s8686_s1 + $0x98] sm:$0xff]  }
  0x79   : > { %4164 = vmatpush3.bf16.msra.mxu0 %v5275_v25  ;;  %v4849_v25 = vpack.i.bf16 %v6167_v30, %v6164_v8  ;;  %v4854_v30 = vpack.i.bf16 %v6103_v50, %v6101_v21  ;;  %v6210_v8 = vsel %vm528_vm2, %v579_v42, %v580_v9  ;;  %4845 = vrot.lane.b32.xlu0 %v4844_v23, %s5451_s9  ;;  %v6227_v9 = vld [vmem:[%s8686_s1 + $0x100] sm:$0xff]   ;;  %v5285_v23 = vld [vmem:[%s8686_s1 + $0x88] sm:$0xff]  }
  0x7a   : > { %4165 = vmatprep.subr.bf16.mxu0 %v5276_v29  ;;  %v6200_v29 = vsel %vm528_vm2, %v574_v11, %v575_v19  ;;  %8872 = vst [vmem:[#allocation58_spill] sm:$0xff] %v6210_v8  ;;  %v5279_v11 = vld [vmem:[%s8686_s1 + $0x38] sm:$0xff]   ;;  %8874 = vst [vmem:[#allocation60_spill] sm:$0xff] %v6227_v9  ;;  %v5282_v42 = vld [vmem:[%s8686_s1 + $0x80] sm:$0xff]  }
  0x7b   : > { %8870 = vst [vmem:[#allocation56_spill] sm:$0xff] %v6200_v29  ;;  %4266 = vmatpush3.bf16.msra.mxu1 %v5282_v42 }
  0x7c   : > { %4850 = vrot.lane.b32.xlu1 %v4849_v25, %s5451_s9  ;;  %v4869_v25 = vpack.i.bf16 %v6213_v55, %v6210_v8  ;;  %v8882_v55 = vrot.slane %v6119_v7, 1 }
  0x7d   : > { %4166 = vmatpush3.bf16.msra.mxu0 %v5277_v1  ;;  %v4859_v1 = vpack.i.bf16 %v6203_v56, %v6200_v29  ;;  %4855 = vrot.lane.b32.xlu0 %v4854_v30, %s5451_s9  ;;  %v8878_v30 = vrot.slane %v6114_v10, 1  ;;  %v5287_v56 = vld [vmem:[%s8686_s1 + $0x90] sm:$0xff]  }
  0x7e   : > { %4167 = vmatprep.subr.bf16.mxu0 %v5278_v4  ;;  %v8875_v4 = vrot.slane %v6117_v18, 1 }
  0x80   : > { %v6253_v61 = vsel %vm528_vm2, %v8876_v20, %v8875_v4  ;;  %4860 = vrot.lane.b32.xlu1 %v4859_v1, %s5451_s9  ;;  %v8879_v42 = vmov %v8875_v4  ;;  %v5286_v1 = vld [vmem:[%s8686_s1 + $0xd0] sm:$0xff]   ;;  %v8884_v4 = vrot.slane %v6145_v26, 1 }
  0x81   : > { %4168 = vmatpush3.bf16.msra.mxu0 %v5279_v11  ;;  %8877 = vst [vmem:[#allocation61_spill] sm:$0xff] %v6253_v61  ;;  %v5284_v11 = vld [vmem:[%s8686_s1 + $0xc8] sm:$0xff]   ;;  %v6268_v20 = vsel %vm528_vm2, %v8879_v42, %v8878_v30  ;;  %v4874_v30 = vpack.i.bf16 %v6138_v6, %v6119_v7  ;;  %4865 = vrot.lane.b32.xlu0 %v4864_v5, %s5451_s9  ;;  %v8887_v5 = vrot.slane %v6169_v43, 1 }
  0x82   : > { %4641 = vmatprep.subr.bf16.mxu0 %v6227_v9  ;;  %8880 = vst [vmem:[#allocation62_spill] sm:$0xff] %v6268_v20  ;;  %4267 = vmatprep.subr.bf16.mxu1 %v5284_v11  ;;  %v4879_v19 = vpack.i.bf16 %v6268_v20, %v6253_v61  ;;  %v8881_v11 = vrot.slane %v6138_v6, 1  ;;  %v8888_v20 = vrot.slane %v6161_v38, 1  ;;  %v8903_v9 = vrot.slane %v6183_v22, 1 }
  0x83   : > { %4268 = vmatpush3.bf16.msra.mxu1 %v5285_v23  ;;  %v5288_v23 = vld [vmem:[%s8686_s1 + $0xd8] sm:$0xff]   ;;  %v8891_v42 = vmov %v8887_v5 }
  0x84   : > { %4269 = vmatprep.subr.bf16.mxu1 %v5286_v1  ;;  %4870 = vrot.lane.b32.xlu1 %v4869_v25, %s5451_s9  ;;  %v6305_v1 = vsel %vm528_vm2, %v8882_v55, %v8881_v11  ;;  %v8885_v61 = vmov %v8881_v11  ;;  %v4884_v55 = vpack.i.bf16 %v6169_v43, %v6161_v38  ;;  %v8890_v11 = vrot.slane %v6171_v24, 1 }
  0x85   : > { %8883 = vst [vmem:[#allocation63_spill] sm:$0xff] %v6305_v1  ;;  %v6312_v25 = vsel %vm528_vm2, %v8885_v61, %v8884_v4  ;;  %4875 = vrot.lane.b32.xlu0 %v4874_v30, %s5451_s9  ;;  %v5290_v61 = vld [vmem:[%s8686_s1 + $0xe0] sm:$0xff]   ;;  %v8900_v30 = vrot.slane %v6205_v17, 1 }
  0x86   : > { %8886 = vst [vmem:[#allocation64_spill] sm:$0xff] %v6312_v25  ;;  %v4889_v4 = vpack.i.bf16 %v6312_v25, %v6305_v1  ;;  %v5292_v1 = vld [vmem:[%s8686_s1 + $0xe8] sm:$0xff]   ;;  %v6368_v25 = vld [vmem:[#allocation2 + $0x190] sm:$0x3] }
  0x87   : > { %4270 = vmatpush3.bf16.msra.mxu1 %v5287_v56  ;;  %8893 = vst [vmem:[#allocation67_spill] sm:$0xff] %v6368_v25 }
  0x88   : > { %4271 = vmatprep.subr.bf16.mxu1 %v5288_v23  ;;  %4880 = vrot.lane.b32.xlu1 %v4879_v19, %s5451_s9  ;;  %v6335_v23 = vsel %vm528_vm2, %v8888_v20, %v8887_v5  ;;  %v6342_v19 = vsel %vm528_vm2, %v8891_v42, %v8890_v11  ;;  %v5291_v20 = vld [vmem:[%s8686_s1 + $0xa0] sm:$0xff]   ;;  %v4894_v42 = vpack.i.bf16 %v6193_v32, %v6191_v46  ;;  %v8894_v11 = vrot.slane %v6193_v32, 1 }
  0x89   : > { %8889 = vst [vmem:[#allocation65_spill] sm:$0xff] %v6335_v23  ;;  %8892 = vst [vmem:[#allocation66_spill] sm:$0xff] %v6342_v19  ;;  %4885 = vrot.lane.b32.xlu0 %v4884_v55, %s5451_s9  ;;  %v6355_v5 = vld [vmem:[#allocation2 + $0x180] sm:$0xff]  ;;  %v4899_v8 = vpack.i.bf16 %v6342_v19, %v6335_v23  ;;  %v4904_v55 = vpack.i.bf16 %v6205_v17, %v6195_v16  ;;  %v8901_v19 = vrot.slane %v6195_v16, 1  ;;  %v8904_v16 = vrot.slane %v6205_v17, 1 }
  0x8a   : > { %v8898_v29 = vmov %v8894_v11 }
  0x8b   : > { %4272 = vmatpush3.bf16.msra.mxu1 %v5289_v40  ;;  %v6362_v40 = vld [vmem:[#allocation2 + $0x188] sm:$0xff]  ;;  %v6391_v23 = vsel %vm528_vm2, %v8901_v19, %v8900_v30  ;;  %v957_v19 = vrot.slane %v6368_v25, 2  ;;  %v6419_v25 = vsel %vm528_vm2, %v8904_v16, %v8903_v9  ;;  %v8908_v9 = vrot.slane %v5881_v36, 2 }
  0x8c   : > { %4273 = vmatprep.subr.bf16.mxu1 %v5290_v61  ;;  %4890 = vrot.lane.b32.xlu1 %v4889_v4, %s5451_s9  ;;  %v8895_v61 = vrot.slane %v6191_v46, 1  ;;  %v8897_v4 = vrot.slane %v6174_v12, 1  ;;  %8902 = vst [vmem:[#allocation70_spill] sm:$0xff] %v6391_v23  ;;  %v955_v30 = vrot.slane %v6362_v40, 2  ;;  %8905 = vst [vmem:[#allocation71_spill] sm:$0xff] %v6419_v25  ;;  %v4914_v16 = vpack.i.bf16 %v6362_v40, %v6355_v5 }
  0x8d   : > { %4895 = vrot.lane.b32.xlu0 %v4894_v42, %s5451_s9  ;;  %v5296_v42 = vld [vmem:[%s8686_s1 + $0xf8] sm:$0xff]  }
  0x8e   : > { %v6375_v56 = vsel %vm528_vm2, %v8895_v61, %v8894_v11  ;;  %v6382_v54 = vsel %vm528_vm2, %v8898_v29, %v8897_v4  ;;  %v5293_v11 = vld [vmem:[%s8686_s1 + $0xa8] sm:$0xff]   ;;  %v954_v61 = vrot.slane %v6355_v5, 2  ;;  %v6429_v4 = vsel %vm705_vm3, %v955_v30, %v957_v19 }
  0x8f   : > { %8896 = vst [vmem:[#allocation68_spill] sm:$0xff] %v6375_v56  ;;  %8899 = vst [vmem:[#allocation69_spill] sm:$0xff] %v6382_v54  ;;  %4274 = vmatpush3.bf16.msra.mxu1 %v5291_v20  ;;  %v4909_v20 = vpack.i.bf16 %v6382_v54, %v6375_v56  ;;  %v5354_v56 = vld [vmem:[#allocation2 + $0xc8] sm:$0xff] }
  0x90   : > { %4275 = vmatprep.subr.bf16.mxu1 %v5292_v1  ;;  %4900 = vrot.lane.b32.xlu1 %v4899_v8, %s5451_s9  ;;  %v5295_v1 = vld [vmem:[%s8686_s1 + $0xb0] sm:$0xff]   ;;  %v6426_v29 = vsel %vm705_vm3, %v954_v61, %v955_v30  ;;  %8907 = vst [vmem:[#allocation73_spill] sm:$0xff] %v6429_v4  ;;  %v8909_v8 = vrot.slane %v5879_v35, 2  ;;  %v8910_v30 = vrot.slane %v5899_v44, 2  ;;  %v5297_v35 = vld [vmem:[%s8686_s1 + $0xb8] sm:$0xff]   ;;  %v8913_v44 = vrot.slane %v5883_v37, 2 }
  0x91   : > { %8906 = vst [vmem:[#allocation72_spill] sm:$0xff] %v6426_v29  ;;  %4905 = vrot.lane.b32.xlu0 %v4904_v55, %s5451_s9  ;;  %v4919_v55 = vpack.i.bf16 %v6419_v25, %v6391_v23 }
  0x92   : > { %v6441_v61 = vsel %vm705_vm3, %v8909_v8, %v8908_v9  ;;  %v8912_v8 = vrot.slane %v5893_v39, 2 }
  0x93   : > { %4276 = vmatpush3.bf16.msra.mxu1 %v5293_v11  ;;  %v8911_v11 = vmov %v8908_v9  ;;  %v8914_v9 = vrot.slane %v5901_v45, 2  ;;  %v8917_v45 = vrot.slane %v5905_v47, 2 }
  0x94   : > { %4277 = vmatprep.subr.bf16.mxu1 %v5294_v48  ;;  %v6448_v19 = vsel %vm705_vm3, %v8911_v11, %v8910_v30  ;;  %4910 = vrot.lane.b32.xlu1 %v4909_v20, %s5451_s9  ;;  %v779_v48 = vrot.slane %v6174_v12, 2  ;;  %v6462_v36 = vsel %vm705_vm3, %v8913_v44, %v8912_v8  ;;  %v8915_v20 = vmov %v8912_v8 }
  0x95   : > { %v6469_v30 = vsel %vm705_vm3, %v8915_v20, %v8914_v9  ;;  %4915 = vrot.lane.b32.xlu0 %v4914_v16, %s5451_s9  ;;  %v4924_v12 = vpack.i.bf16 %v6448_v19, %v6441_v61  ;;  %v8916_v11 = vrot.slane %v5914_v52, 2  ;;  %v8922_v9 = vrot.slane %v5931_v60, 2 }
  0x96   : > { %v4929_v37 = vpack.i.bf16 %v6469_v30, %v6462_v36  ;;  %v8925_v60 = vrot.slane %v5955_v14, 2 }
  0x97   : > { %4278 = vmatpush3.bf16.msra.mxu1 %v5295_v1  ;;  %v6482_v39 = vsel %vm705_vm3, %v8917_v45, %v8916_v11  ;;  %v8918_v1 = vrot.slane %v5926_v57, 2  ;;  %v8919_v16 = vmov %v8916_v11  ;;  %v8926_v11 = vrot.slane %v5953_v13, 2 }
  0x98   : > { %4279 = vmatprep.subr.bf16.mxu1 %v5296_v42  ;;  %4920 = vrot.lane.b32.xlu1 %v4919_v55, %s5451_s9  ;;  %v8920_v42 = vrot.slane %v5938_v63, 2  ;;  %v8921_v55 = vrot.slane %v5936_v62, 2  ;;  %v8924_v62 = vrot.slane %v5957_v15, 2  ;;  %v8928_v45 = vrot.slane %v5999_v53, 2 }
  0x99   : > { %v6489_v8 = vsel %vm705_vm3, %v8919_v16, %v8918_v1  ;;  %4925 = vrot.lane.b32.xlu0 %v4924_v12, %s5451_s9  ;;  %v8930_v16 = vrot.slane %v6001_v58, 2  ;;  %v8934_v53 = vrot.slane %v6031_v41, 2 }
  0x9a   : > { %v6496_v44 = vsel %vm705_vm3, %v8921_v55, %v8920_v42  ;;  %v8923_v47 = vmov %v8920_v42  ;;  %v4934_v52 = vpack.i.bf16 %v6489_v8, %v6482_v39  ;;  %v6516_v63 = vsel %vm705_vm3, %v8925_v60, %v8924_v62 }
  0x9b   : > { %v6503_v20 = vsel %vm705_vm3, %v8923_v47, %v8922_v9  ;;  %4280 = vmatpush3.bf16.msra.mxu1 %v5297_v35  ;;  %v8927_v35 = vmov %v8924_v62  ;;  %v8931_v14 = vmov %v8928_v45  ;;  %v8933_v55 = vrot.slane %v6011_v0, 2 }
  0x9c   : > { %4930 = vrot.lane.b32.xlu1 %v4929_v37, %s5451_s9  ;;  %v4939_v57 = vpack.i.bf16 %v6503_v20, %v6496_v44  ;;  %v6523_v12 = vsel %vm705_vm3, %v8927_v35, %v8926_v11  ;;  %v8929_v37 = vrot.slane %v5997_v51, 2  ;;  %v6537_v42 = vsel %vm705_vm3, %v8931_v14, %v8930_v16 }
  0x9d   : > { %4935 = vrot.lane.b32.xlu0 %v4934_v52, %s5451_s9  ;;  %v4944_v13 = vpack.i.bf16 %v6523_v12, %v6516_v63  ;;  %v8932_v51 = vrot.slane %v6046_v59, 2  ;;  %v8937_v52 = vrot.slane %v6065_v31, 2  ;;  %v8940_v60 = vrot.slane %v6067_v49, 2 }
  0x9e   : > { %v6530_v1 = vsel %vm705_vm3, %v8929_v37, %v8928_v45  ;;  %v8943_v59 = vrot.slane %v6082_v3, 2  ;;  %v8944_v35 = vrot.slane %v6080_v33, 2  ;;  %v8945_v31 = vrot.slane %v6084_v28, 2 }
  0x9f   : > { %v4949_v15 = vpack.i.bf16 %v6537_v42, %v6530_v1  ;;  %v6550_v58 = vsel %vm705_vm3, %v8933_v55, %v8932_v51  ;;  %v8935_v9 = vmov %v8932_v51  ;;  %v8941_v0 = vmov %v8937_v52 }
  0xa0   : > { %4940 = vrot.lane.b32.xlu1 %v4939_v57, %s5451_s9  ;;  %v6557_v47 = vsel %vm705_vm3, %v8935_v9, %v8934_v53  ;;  %v8938_v57 = vrot.slane %v6063_v34, 2  ;;  %v6571_v11 = vsel %vm705_vm3, %v8941_v0, %v8940_v60  ;;  %v6584_v49 = vsel %vm705_vm3, %v8944_v35, %v8943_v59 }
  0xa1   : > { %8936 = vst [vmem:[#allocation74_spill] sm:$0xff] %v6557_v47  ;;  %8942 = vst [vmem:[#allocation76_spill] sm:$0xff] %v6571_v11  ;;  %4945 = vrot.lane.b32.xlu0 %v4944_v13, %s5451_s9  ;;  %v4954_v41 = vpack.i.bf16 %v6557_v47, %v6550_v58  ;;  %v8946_v45 = vmov %v8943_v59  ;;  %v8947_v16 = vrot.slane %v6103_v50, 2  ;;  %v8948_v14 = vrot.slane %v6101_v21, 2 }
  0xa2   : > { %v6564_v62 = vsel %vm705_vm3, %v8938_v57, %v8937_v52  ;;  %v6591_v37 = vsel %vm705_vm3, %v8946_v45, %v8945_v31  ;;  %v8951_v3 = vrot.slane %v6117_v18, 2  ;;  %v8952_v55 = vrot.slane %v6105_v2, 2 }
  0xa3   : > { %8939 = vst [vmem:[#allocation75_spill] sm:$0xff] %v6564_v62  ;;  %v4959_v34 = vpack.i.bf16 %v6571_v11, %v6564_v62  ;;  %v6598_v13 = vsel %vm705_vm3, %v8948_v14, %v8947_v16  ;;  %v8950_v33 = vmov %v8947_v16  ;;  %v4964_v28 = vpack.i.bf16 %v6591_v37, %v6584_v49 }
  0xa4   : > { %4950 = vrot.lane.b32.xlu1 %v4949_v15, %s5451_s9  ;;  %v8949_v15 = vrot.slane %v6093_v27, 2  ;;  %v6615_v21 = vsel %vm705_vm3, %v8952_v55, %v8951_v3  ;;  %v8953_v53 = vrot.slane %v6114_v10, 2  ;;  %v8954_v27 = vmov %v8951_v3  ;;  %v6679_v55 = vld [vmem:[#allocation2 + $0x198] sm:$0xff] }
  0xa5   : > { %4955 = vrot.lane.b32.xlu0 %v4954_v41, %s5451_s9  ;;  %v8955_v52 = vrot.slane %v6138_v6, 2  ;;  %v8956_v57 = vrot.slane %v6119_v7, 2  ;;  %v8957_v60 = vrot.slane %v6145_v26, 2  ;;  %v8959_v41 = vrot.slane %v6169_v43, 2 }
  0xa6   : > { %v6605_v51 = vsel %vm705_vm3, %v8950_v33, %v8949_v15  ;;  %v6622_v50 = vsel %vm705_vm3, %v8954_v27, %v8953_v53  ;;  %v8961_v6 = vrot.slane %v6171_v24, 2  ;;  %v917_v31 = vrot.slane %v6355_v5, 1  ;;  %v8966_v15 = vld [vmem:[#allocation67_spill] sm:$0xff] }
  0xa7   : > { %v4969_v9 = vpack.i.bf16 %v6605_v51, %v6598_v13  ;;  %v6632_v2 = vsel %vm705_vm3, %v8956_v57, %v8955_v52  ;;  %v8958_v10 = vmov %v8955_v52  ;;  %v4974_v0 = vpack.i.bf16 %v6622_v50, %v6615_v21  ;;  %8968 = vst [vmem:[#allocation67_spill] sm:$0xff] %v6679_v55  ;;  %v6681_v53 = vld [vmem:[#allocation2 + $0x1a0] sm:$0xff] }
  0xa8   : > { %4960 = vrot.lane.b32.xlu1 %v4959_v34, %s5451_s9  ;;  %v6639_v18 = vsel %vm705_vm3, %v8958_v10, %v8957_v60  ;;  %v8960_v34 = vrot.slane %v6161_v38, 2  ;;  %v8962_v26 = vmov %v8959_v41  ;;  %v918_v45 = vrot.slane %v6362_v40, 1 }
  0xa9   : > { %4965 = vrot.lane.b32.xlu0 %v4964_v28, %s5451_s9  ;;  %v4979_v7 = vpack.i.bf16 %v6639_v18, %v6632_v2  ;;  %v6658_v35 = vsel %vm705_vm3, %v8962_v26, %v8961_v6  ;;  %v8963_v38 = vrot.slane %v6193_v32, 2  ;;  %v8964_v16 = vrot.slane %v6191_v46, 2  ;;  %v8967_v28 = vld [vmem:[#allocation55_spill] sm:$0xff]  ;;  %v6683_v46 = vld [vmem:[#allocation2 + $0x1a8] sm:$0x3] }
  0xaa   : > { %v6648_v59 = vsel %vm705_vm3, %v8960_v34, %v8959_v41  ;;  %v920_v33 = vrot.slane %v8966_v15, 1  ;;  %v781_v5 = vrot.slane %v8967_v28, 2  ;;  %v782_v40 = vrot.slane %v6205_v17, 2  ;;  %8969 = vst [vmem:[#allocation55_spill] sm:$0xff] %v6681_v53  ;;  %8970 = vst [vmem:[#allocation77_spill] sm:$0xff] %v6683_v46  ;;  %v5336_v26 = vld [vmem:[#allocation2] sm:$0xff] }
  0xab   : > { %v6668_v14 = vsel %vm705_vm3, %v8964_v16, %v8963_v38  ;;  %v8965_v24 = vmov %v8963_v38  ;;  %v784_v3 = vrot.slane %v6183_v22, 2  ;;  %v4984_v32 = vpack.i.bf16 %v6658_v35, %v6648_v59  ;;  %v5338_v16 = vld [vmem:[#allocation2 + $0x10] sm:$0x3] }
  0xac   : > { %4970 = vrot.lane.b32.xlu1 %v4969_v9, %s5451_s9  ;;  %v6673_v43 = vsel %vm705_vm3, %v8965_v24, %v779_v48  ;;  %v6691_v27 = vsel %vm528_vm2, %v917_v31, %v918_v45  ;;  %v6695_v22 = vsel %vm528_vm2, %v918_v45, %v920_v33  ;;  %v1058_v17 = vrot.slane %v6679_v55, 1  ;;  %v5337_v45 = vld [vmem:[#allocation2 + $0x8] sm:$0xff] }
  0xad   : > { %4975 = vrot.lane.b32.xlu0 %v4974_v0, %s5451_s9  ;;  %v4989_v48 = vpack.i.bf16 %v6673_v43, %v6668_v14  ;;  %8971 = vst [vmem:[#allocation78_spill] sm:$0xff] %v6691_v27  ;;  %8972 = vst [vmem:[#allocation79_spill] sm:$0xff] %v6695_v22  ;;  %v1059_v9 = vrot.slane %v6681_v53, 1  ;;  %v1061_v52 = vrot.slane %v6683_v46, 1  ;;  %v6701_v57 = vsel %vm705_vm3, %v781_v5, %v782_v40 }
  0xae   : > { %v6704_v60 = vsel %vm705_vm3, %v782_v40, %v784_v3  ;;  %v4994_v10 = vpack.i.bf16 %v6695_v22, %v6691_v27  ;;  %v5009_v6 = vpack.i.bf16 %v6429_v4, %v6426_v29  ;;  %v706_v31 = vrot.slane %v5336_v26, 2 }
  0xaf   : > { %v4999_v0 = vpack.i.bf16 %v6704_v60, %v6701_v57  ;;  %v1060_v41 = vsel %vm528_vm2, %v1058_v17, %v1059_v9  ;;  %v1062_v34 = vsel %vm528_vm2, %v1059_v9, %v1061_v52  ;;  %v707_v38 = vrot.slane %v5337_v45, 2 }
  0xb0   : > { %4980 = vrot.lane.b32.xlu1 %v4979_v7, %s5451_s9  ;;  %v5004_v7 = vpack.i.bf16 %v1062_v34, %v1060_v41  ;;  %v709_v24 = vrot.slane %v5338_v16, 2 }
  0xb1   : > { %4985 = vrot.lane.b32.xlu0 %v4984_v32, %s5451_s9  ;;  %v708_v33 = vsel %vm705_vm3, %v706_v31, %v707_v38 }
  0xb2   : > { %v710_v28 = vsel %vm705_vm3, %v707_v38, %v709_v24 }
  0xb4   : > { %4990 = vrot.lane.b32.xlu1 %v4989_v48, %s5451_s9 }
  0xb5   : > { %4995 = vrot.lane.b32.xlu0 %v4994_v10, %s5451_s9 }
  0xb8   : > { %5000 = vrot.lane.b32.xlu1 %v4999_v0, %s5451_s9 }
  0xb9   : > { %5005 = vrot.lane.b32.xlu0 %v5004_v7, %s5451_s9 }
  0xbc   : > { %5010 = vrot.lane.b32.xlu1 %v5009_v6, %s5451_s9 }
  0xca   : > { %v4766_v15 = vpop.permute.xlu0 %4765 }
  0xcb   : > { %v4768_v5 = vunpack.i.h.bf16 %v4766_v15  ;;  %v4767_v40 = vunpack.i.l.bf16 %v4766_v15 }
  0xcc   : > { %v4776_v3 = vpop.permute.xlu1 %4775 }
  0xcd   : > { %v4778_v32 = vunpack.i.h.bf16 %v4776_v3  ;;  %v4777_v48 = vunpack.i.l.bf16 %v4776_v3  ;;  %v1116_v17 = vsel %vm283_vm0, %v708_v33, %v4767_v40  ;;  %v1117_v9 = vsel %vm283_vm0, %v710_v28, %v4768_v5 }
  0xce   : > { %v4771_v52 = vpop.permute.xlu0 %4770  ;;  %v1185_v10 = vpack.c.bf16 %v1117_v9, %v1116_v17  ;;  %v5340_v17 = vld [vmem:[#allocation2 + $0x20] sm:$0xff] }
  0xcf   : > { %v1118_v0 = vsel %vm283_vm0, %v6441_v61, %v4777_v48  ;;  %v1119_v41 = vsel %vm283_vm0, %v6448_v19, %v4778_v32  ;;  %v4773_v34 = vunpack.i.h.bf16 %v4771_v52  ;;  %v4772_v7 = vunpack.i.l.bf16 %v4771_v52  ;;  %v5283_v61 = vld [vmem:[%s8686_s1 + $0x108] sm:$0xff]  }
  0xd0   : > { %v4781_v6 = vpop.permute.xlu1 %4780  ;;  %1618 = vmatprep.mubr.bf16.mxu0 %v1185_v10  ;;  %v1190_v31 = vpack.c.bf16 %v1119_v41, %v1118_v0  ;;  %v8973_v48 = vld [vmem:[#allocation60_spill] sm:$0xff]  ;;  %v5341_v41 = vld [vmem:[#allocation2 + $0x30] sm:$0xff] }
  0xd1   : > { %v1084_v38 = vsel %vm283_vm0, %v5336_v26, %v4772_v7  ;;  %v1085_v16 = vsel %vm283_vm0, %v5337_v45, %v4773_v34  ;;  %v4783_v24 = vunpack.i.h.bf16 %v4781_v6  ;;  %v4782_v15 = vunpack.i.l.bf16 %v4781_v6  ;;  %v5339_v26 = vld [vmem:[#allocation2 + $0x18] sm:$0xff] }
  0xd2   : > { %v4786_v33 = vpop.permute.xlu0 %4785  ;;  %v1184_v28 = vpack.c.bf16 %v1085_v16, %v1084_v38  ;;  %v5342_v7 = vld [vmem:[#allocation2 + $0x38] sm:$0xff] }
  0xd3   : > { %v4788_v5 = vunpack.i.h.bf16 %v4786_v33  ;;  %v4787_v40 = vunpack.i.l.bf16 %v4786_v33  ;;  %v1086_v45 = vsel %vm283_vm0, %v5339_v26, %v4782_v15  ;;  %v1087_v9 = vsel %vm283_vm0, %v5340_v17, %v4783_v24 }
  0xd4   : > { %v4791_v19 = vpop.permute.xlu1 %4790  ;;  %1619 = vmatmul.mubr.bf16.vlgmr.msra.gmra.mrb[0].mxu0 %v1184_v28  ;;  %v1189_v24 = vpack.c.bf16 %v1087_v9, %v1086_v45 }
  0xd5   : > { %v4793_v3 = vunpack.i.h.bf16 %v4791_v19  ;;  %v4792_v32 = vunpack.i.l.bf16 %v4791_v19  ;;  %4642 = vmatpush3.bf16.msra.mxu0 %v8973_v48  ;;  %1626 = vmatprep.mubr.bf16.mxu0 %v1190_v31  ;;  %v1120_v10 = vsel %vm283_vm0, %v6462_v36, %v4787_v40  ;;  %v1121_v0 = vsel %vm283_vm0, %v6469_v30, %v4788_v5  ;;  %v5298_v31 = vld [vmem:[%s8686_s1 + $0x110] sm:$0xff]   ;;  %v5299_v40 = vld [vmem:[%s8686_s1 + $0x118] sm:$0xff]  }
  0xd6   : > { %v4796_v52 = vpop.permute.xlu0 %4795  ;;  %4643 = vmatprep.subr.bf16.mxu0 %v5283_v61  ;;  %v1194_v15 = vpack.c.bf16 %v1121_v0, %v1120_v10 }
  0xd7   : > { %v1088_v34 = vsel %vm283_vm0, %v5341_v41, %v4792_v32  ;;  %v1089_v6 = vsel %vm283_vm0, %v5342_v7, %v4793_v3  ;;  %v4798_v33 = vunpack.i.h.bf16 %v4796_v52  ;;  %v4797_v28 = vunpack.i.l.bf16 %v4796_v52  ;;  %v5343_v41 = vld [vmem:[#allocation2 + $0x48] sm:$0xff]  ;;  %v5344_v7 = vld [vmem:[#allocation2 + $0x50] sm:$0xff] }
  0xd8   : > { %v4801_v38 = vpop.permute.xlu1 %4800  ;;  %v1187_v16 = vpack.c.bf16 %v1089_v6, %v1088_v34 }
  0xd9   : > { %4644 = vmatpush3.bf16.msra.mxu0 %v5283_v61  ;;  %v1122_v32 = vsel %vm283_vm0, %v6482_v39, %v4797_v28  ;;  %v1123_v48 = vsel %vm283_vm0, %v6489_v8, %v4798_v33  ;;  %v4803_v26 = vunpack.i.h.bf16 %v4801_v38  ;;  %v4802_v45 = vunpack.i.l.bf16 %v4801_v38 }
  0xda   : > { %1779 = vmatprep.mubr.bf16.mxu1 %v1187_v16  ;;  %v4806_v5 = vpop.permute.xlu0 %4805  ;;  %4645 = vmatprep.subr.bf16.mxu0 %v5298_v31  ;;  %v1198_v17 = vpack.c.bf16 %v1123_v48, %v1122_v32 }
  0xdb   : > { %v4808_v9 = vunpack.i.h.bf16 %v4806_v5  ;;  %v4807_v52 = vunpack.i.l.bf16 %v4806_v5  ;;  %v1090_v34 = vsel %vm283_vm0, %v5343_v41, %v4802_v45  ;;  %v1091_v6 = vsel %vm283_vm0, %v5344_v7, %v4803_v26  ;;  %v5345_v26 = vld [vmem:[#allocation2 + $0x60] sm:$0xff] }
  0xdc   : > { %1627 = vmatmul.mubr.bf16.gmra.mrb[4].mxu0 %v1189_v24  ;;  %v6760_v33 = vpack.c.bf16 %v1091_v6, %v1090_v34 }
  0xdd   : > { %v4811_v19 = vpop.permute.xlu1 %4810  ;;  %1634 = vmatprep.mubr.bf16.mxu0 %v1194_v15  ;;  %4646 = vmatpush3.bf16.msra.mxu0 %v5298_v31  ;;  %v1124_v24 = vsel %vm283_vm0, %v6496_v44, %v4807_v52  ;;  %v1125_v38 = vsel %vm283_vm0, %v6503_v20, %v4808_v9  ;;  %v5346_v9 = vld [vmem:[#allocation2 + $0x68] sm:$0xff] }
  0xde   : > { %v4816_v3 = vpop.permute.xlu0 %4815  ;;  %4647 = vmatprep.subr.bf16.mxu0 %v5299_v40  ;;  %v4813_v28 = vunpack.i.h.bf16 %v4811_v19  ;;  %v1202_v5 = vpack.c.bf16 %v1125_v38, %v1124_v24 }
  0xdf   : > { %v4817_v32 = vunpack.i.l.bf16 %v4816_v3 }
  0xe0   : > { %v1093_v52 = vsel %vm283_vm0, %v5346_v9, %v4813_v28 }
  0xe1   : > { %4648 = vmatpush3.bf16.msra.mxu0 %v5299_v40  ;;  %v4818_v40 = vunpack.i.h.bf16 %v4816_v3 }
  0xe2   : > { %v4821_v61 = vpop.permute.xlu1 %4820 }
  0xe3   : > { %v4826_v10 = vpop.permute.xlu0 %4825  ;;  %v1127_v3 = vsel %vm283_vm0, %v6523_v12, %v4818_v40  ;;  %v4823_v6 = vunpack.i.h.bf16 %v4821_v61  ;;  %v4822_v24 = vunpack.i.l.bf16 %v4821_v61  ;;  %v5348_v40 = vld [vmem:[#allocation2 + $0x80] sm:$0xff] }
  0xe4   : > { %1635 = vmatmul.mubr.bf16.gmra.mrb[8].mxu0 %v1187_v16  ;;  %v4812_v16 = vunpack.i.l.bf16 %v4811_v19  ;;  %v1126_v19 = vsel %vm283_vm0, %v6516_v63, %v4817_v32  ;;  %v5347_v32 = vld [vmem:[#allocation2 + $0x78] sm:$0xff] }
  0xe5   : > { %1642 = vmatprep.mubr.bf16.mxu0 %v1198_v17  ;;  %v1206_v38 = vpack.c.bf16 %v1127_v3, %v1126_v19  ;;  %v1094_v9 = vsel %vm283_vm0, %v5347_v32, %v4822_v24  ;;  %v1095_v54 = vsel %vm283_vm0, %v5348_v40, %v4823_v6 }
  0xe6   : > { %v4831_v0 = vpop.permute.xlu1 %4830  ;;  %v1092_v17 = vsel %vm283_vm0, %v5345_v26, %v4812_v16  ;;  %v4827_v16 = vunpack.i.l.bf16 %v4826_v10  ;;  %v6794_v19 = vpack.c.bf16 %v1095_v54, %v1094_v9 }
  0xe7   : > { %v4836_v31 = vpop.permute.xlu0 %4835  ;;  %v6777_v7 = vpack.c.bf16 %v1093_v52, %v1092_v17  ;;  %v4833_v3 = vunpack.i.h.bf16 %v4831_v0 }
  0xe8   : > { %v1128_v61 = vsel %vm283_vm0, %v6530_v1, %v4827_v16  ;;  %v4838_v4 = vunpack.i.h.bf16 %v4836_v31  ;;  %v4837_v24 = vunpack.i.l.bf16 %v4836_v31  ;;  %v5349_v16 = vld [vmem:[#allocation2 + $0x90] sm:$0xff] }
  0xea   : > { %v6758_v15 = vpop.permute.xlu1 %4840  ;;  %v1131_v31 = vsel %vm283_vm0, %v6557_v47, %v4838_v4  ;;  %v5351_v4 = vld [vmem:[#allocation2 + $0xa8] sm:$0xff] }
  0xeb   : > { %v6762_v48 = vpop.permute.xlu0 %4845 }
  0xec   : > { %1643 = vmatmul.mubr.bf16.gmra.mrb[12].mxu0 %v6760_v33 }
  0xed   : > { %1650 = vmatprep.mubr.bf16.mxu0 %v1202_v5  ;;  %v4828_v5 = vunpack.i.h.bf16 %v4826_v10 }
  0xee   : > { %v6764_v45 = vpop.permute.xlu1 %4850 }
  0xef   : > { %v6769_v41 = vpop.permute.xlu0 %4855  ;;  %v1129_v10 = vsel %vm283_vm0, %v6537_v42, %v4828_v5  ;;  %v5350_v5 = vld [vmem:[#allocation2 + $0x98] sm:$0xff] }
  0xf0   : > { %v1210_v29 = vpack.c.bf16 %v1129_v10, %v1128_v61  ;;  %v1097_v22 = vsel %vm283_vm0, %v5350_v5, %v4833_v3  ;;  %v4842_v10 = vunpack.i.l.bf16 %v6758_v15  ;;  %v4847_v3 = vunpack.i.l.bf16 %v6762_v48 }
  0xf2   : > { %v6775_v34 = vpop.permute.xlu1 %4860 }
  0xf3   : > { %v6779_v26 = vpop.permute.xlu0 %4865 }
  0xf4   : > { %1651 = vmatmul.mubr.bf16.gmra.mrb[16].mxu0 %v6777_v7 }
  0xf5   : > { %1658 = vmatprep.mubr.bf16.mxu0 %v1206_v38  ;;  %v4832_v38 = vunpack.i.l.bf16 %v4831_v0  ;;  %v1130_v0 = vsel %vm283_vm0, %v6550_v58, %v4837_v24  ;;  %v5352_v24 = vld [vmem:[#allocation2 + $0xb0] sm:$0xff] }
  0xf6   : > { %v6781_v28 = vpop.permute.xlu1 %4870 }
  0xf7   : > { %v6786_v17 = vpop.permute.xlu0 %4875  ;;  %v1096_v40 = vsel %vm283_vm0, %v5349_v16, %v4832_v38  ;;  %v1214_v38 = vpack.c.bf16 %v1131_v31, %v1130_v0  ;;  %v4848_v16 = vunpack.i.h.bf16 %v6762_v48  ;;  %v4853_v31 = vunpack.i.h.bf16 %v6764_v45 }
  0xf8   : > { %v6811_v61 = vpack.c.bf16 %v1097_v22, %v1096_v40  ;;  %v1098_v22 = vsel %vm283_vm0, %v5351_v4, %v4842_v10  ;;  %v4858_v4 = vunpack.i.h.bf16 %v6769_v41 }
  0xf9   : > { %v1133_v48 = vsel %vm283_vm0, %v6571_v11, %v4848_v16  ;;  %v5353_v16 = vld [vmem:[#allocation2 + $0xc0] sm:$0xff]  ;;  %v1101_v11 = vsel %vm283_vm0, %v5354_v56, %v4853_v31 }
  0xfa   : > { %v6792_v52 = vpop.permute.xlu1 %4880  ;;  %v1135_v47 = vsel %vm283_vm0, %v6591_v37, %v4858_v4  ;;  %v4867_v4 = vunpack.i.l.bf16 %v6779_v26 }
  0xfb   : > { %v6796_v32 = vpop.permute.xlu0 %4885 }
  0xfc   : > { %1659 = vmatmul.mubr.bf16.gmra.mrb[20].mxu0 %v6794_v19 }
  0xfd   : > { %1666 = vmatprep.mubr.bf16.mxu0 %v1210_v29  ;;  %v4843_v29 = vunpack.i.h.bf16 %v6758_v15  ;;  %v1132_v15 = vsel %vm283_vm0, %v6564_v62, %v4847_v3 }
  0xfe   : > { %v6798_v6 = vpop.permute.xlu1 %4890  ;;  %v1218_v10 = vpack.c.bf16 %v1133_v48, %v1132_v15 }
  0xff   : > { %v6803_v54 = vpop.permute.xlu0 %4895  ;;  %v1099_v40 = vsel %vm283_vm0, %v5352_v24, %v4843_v29  ;;  %v4857_v29 = vunpack.i.l.bf16 %v6769_v41 }
 0x100   : > { %v6834_v53 = vpack.c.bf16 %v1099_v40, %v1098_v22  ;;  %v8975_v40 = vld [vmem:[#allocation29_spill] sm:$0xff] }
 0x102   : > { %v6809_v9 = vpop.permute.xlu1 %4900 }
 0x103   : > { %v6817_v5 = vpop.permute.xlu0 %4905 }
 0x104   : > { %1667 = vmatmul.mubr.bf16.gmra.mrb[24].mxu0 %v6811_v61 }
 0x105   : > { %1674 = vmatprep.mubr.bf16.mxu0 %v1214_v38  ;;  %v4852_v38 = vunpack.i.l.bf16 %v6764_v45  ;;  %v8974_v45 = vld [vmem:[#allocation28_spill] sm:$0xff] }
 0x106   : > { %v6819_v27 = vpop.permute.xlu1 %4910 }
 0x107   : > { %v6824_v46 = vpop.permute.xlu0 %4915  ;;  %v1100_v23 = vsel %vm283_vm0, %v5353_v16, %v4852_v38  ;;  %v4863_v38 = vunpack.i.h.bf16 %v6775_v34 }
 0x108   : > { %v6850_v56 = vpack.c.bf16 %v1101_v11, %v1100_v23 }
 0x10a   : > { %v6830_v0 = vpop.permute.xlu1 %4920 }
 0x10b   : > { %v4926_v24 = vpop.permute.xlu0 %4925 }
 0x10c   : > { %v4928_v55 = vunpack.i.h.bf16 %v4926_v24  ;;  %v4927_v25 = vunpack.i.l.bf16 %v4926_v24  ;;  %1675 = vmatmul.mubr.bf16.gmra.mrb[28].mxu0 %v6834_v53  ;;  %v1134_v24 = vsel %vm283_vm0, %v6584_v49, %v4857_v29  ;;  %v4868_v29 = vunpack.i.h.bf16 %v6779_v26 }
 0x10d   : > { %1682 = vmatprep.mubr.bf16.mxu0 %v1218_v10  ;;  %v8977_v10 = vld [vmem:[#allocation31_spill] sm:$0xff]  ;;  %v1222_v16 = vpack.c.bf16 %v1135_v47, %v1134_v24  ;;  %v1136_v47 = vsel %vm283_vm0, %v6598_v13, %v4867_v4  ;;  %v4873_v26 = vunpack.i.h.bf16 %v6781_v28  ;;  %v8978_v24 = vld [vmem:[#allocation32_spill] sm:$0xff] }
 0x10e   : > { %v4931_v3 = vpop.permute.xlu1 %4930  ;;  %v1148_v22 = vsel %vm283_vm0, %v8974_v45, %v4927_v25  ;;  %v1149_v15 = vsel %vm283_vm0, %v8975_v40, %v4928_v55  ;;  %v4862_v25 = vunpack.i.l.bf16 %v6775_v34  ;;  %v8976_v55 = vld [vmem:[#allocation30_spill] sm:$0xff] }
 0x10f   : > { %v4933_v48 = vunpack.i.h.bf16 %v4931_v3  ;;  %v4932_v41 = vunpack.i.l.bf16 %v4931_v3  ;;  %v1186_v62 = vpack.c.bf16 %v1149_v15, %v1148_v22  ;;  %v4936_v45 = vpop.permute.xlu0 %4935  ;;  %v5355_v34 = vld [vmem:[#allocation2 + $0xd8] sm:$0xff]  ;;  %v5356_v22 = vld [vmem:[#allocation2 + $0xe0] sm:$0xff]  ;;  %v1137_v15 = vsel %vm283_vm0, %v6605_v51, %v4868_v29 }
 0x110   : > { %v4937_v11 = vunpack.i.l.bf16 %v4936_v45  ;;  %v1103_v40 = vsel %vm283_vm0, %v5356_v22, %v4863_v38  ;;  %v4882_v22 = vunpack.i.l.bf16 %v6792_v52 }
 0x111   : > { %1780 = vmatmul.mubr.bf16.vlgmr.msra.gmra.mrb[0].mxu1 %v1186_v62  ;;  %v1150_v31 = vsel %vm283_vm0, %v8976_v55, %v4932_v41  ;;  %v1151_v3 = vsel %vm283_vm0, %v8977_v10, %v4933_v48  ;;  %v4938_v62 = vunpack.i.h.bf16 %v4936_v45  ;;  %v4872_v41 = vunpack.i.l.bf16 %v6781_v28  ;;  %v8979_v55 = vld [vmem:[#allocation33_spill] sm:$0xff] }
 0x112   : > { %1787 = vmatprep.mubr.bf16.mxu1 %v6760_v33  ;;  %v1191_v23 = vpack.c.bf16 %v1151_v3, %v1150_v31  ;;  %v1102_v33 = vsel %vm283_vm0, %v5355_v34, %v4862_v25  ;;  %v1152_v25 = vsel %vm283_vm0, %v8978_v24, %v4937_v11  ;;  %v1226_v31 = vpack.c.bf16 %v1137_v15, %v1136_v47  ;;  %v5357_v28 = vld [vmem:[#allocation2 + $0xf0] sm:$0xff]  ;;  %v8981_v15 = vld [vmem:[#allocation39_spill] sm:$0xff] }
 0x113   : > { %v6868_v48 = vpack.c.bf16 %v1103_v40, %v1102_v33  ;;  %v1153_v38 = vsel %vm283_vm0, %v8979_v55, %v4938_v62  ;;  %v4878_v10 = vunpack.i.h.bf16 %v6786_v17  ;;  %v4877_v3 = vunpack.i.l.bf16 %v6786_v17  ;;  %v8980_v40 = vld [vmem:[#allocation38_spill] sm:$0xff]  ;;  %v4946_v55 = vpop.permute.xlu0 %4945 }
 0x114   : > { %1683 = vmatmul.mubr.bf16.gmra.mrb[32].mxu0 %v6850_v56  ;;  %v1195_v29 = vpack.c.bf16 %v1153_v38, %v1152_v25  ;;  %v4883_v17 = vunpack.i.h.bf16 %v6792_v52  ;;  %v4888_v24 = vunpack.i.h.bf16 %v6796_v32  ;;  %v4887_v25 = vunpack.i.l.bf16 %v6796_v32  ;;  %v5359_v52 = vld [vmem:[#allocation2 + $0x108] sm:$0xff] }
 0x115   : > { %1690 = vmatprep.mubr.bf16.mxu0 %v1222_v16  ;;  %v4941_v16 = vpop.permute.xlu1 %4940  ;;  %v1138_v62 = vsel %vm283_vm0, %v6615_v21, %v4877_v3  ;;  %v1139_v34 = vsel %vm283_vm0, %v6622_v50, %v4878_v10  ;;  %v4947_v10 = vunpack.i.l.bf16 %v4946_v55  ;;  %v5360_v3 = vld [vmem:[#allocation2 + $0x110] sm:$0xff]  ;;  %v4893_v32 = vunpack.i.h.bf16 %v6798_v6 }
 0x116   : > { %v4943_v4 = vunpack.i.h.bf16 %v4941_v16  ;;  %v4942_v45 = vunpack.i.l.bf16 %v4941_v16  ;;  %v1107_v16 = vsel %vm283_vm0, %v5360_v3, %v4883_v17  ;;  %v4898_v17 = vunpack.i.h.bf16 %v6803_v54 }
 0x118   : > { %v1154_v47 = vsel %vm283_vm0, %v8980_v40, %v4942_v45 }
 0x119   : > { %1788 = vmatmul.mubr.bf16.gmra.mrb[4].mxu1 %v1191_v23  ;;  %v5358_v23 = vld [vmem:[#allocation2 + $0xf8] sm:$0xff]  ;;  %v4951_v40 = vpop.permute.xlu1 %4950 }
 0x11a   : > { %1795 = vmatprep.mubr.bf16.mxu1 %v6777_v7  ;;  %v1104_v7 = vsel %vm283_vm0, %v5357_v28, %v4872_v41  ;;  %v1105_v11 = vsel %vm283_vm0, %v5358_v23, %v4873_v26  ;;  %v1155_v26 = vsel %vm283_vm0, %v8981_v15, %v4943_v4  ;;  %v1230_v41 = vpack.c.bf16 %v1139_v34, %v1138_v62 }
 0x11b   : > { %v6886_v33 = vpack.c.bf16 %v1105_v11, %v1104_v7  ;;  %v1199_v38 = vpack.c.bf16 %v1155_v26, %v1154_v47  ;;  %v1141_v4 = vsel %vm283_vm0, %v6639_v18, %v4888_v24  ;;  %v4892_v28 = vunpack.i.l.bf16 %v6798_v6  ;;  %v8982_v7 = vld [vmem:[#allocation47_spill] sm:$0xff]  ;;  %v8983_v11 = vld [vmem:[#allocation48_spill] sm:$0xff] }
 0x11c   : > { %1691 = vmatmul.mubr.bf16.gmra.mrb[36].mxu0 %v6868_v48  ;;  %v1156_v23 = vsel %vm283_vm0, %v8982_v7, %v4947_v10  ;;  %v4953_v15 = vunpack.i.h.bf16 %v4951_v40  ;;  %v4952_v26 = vunpack.i.l.bf16 %v4951_v40  ;;  %v5361_v6 = vld [vmem:[#allocation2 + $0x120] sm:$0xff]  ;;  %v8984_v10 = vld [vmem:[#allocation49_spill] sm:$0xff]  ;;  %v4912_v40 = vunpack.i.l.bf16 %v6819_v27 }
 0x11d   : > { %1698 = vmatprep.mubr.bf16.mxu0 %v1226_v31  ;;  %v4948_v31 = vunpack.i.h.bf16 %v4946_v55  ;;  %v1143_v55 = vsel %vm283_vm0, %v6658_v35, %v4898_v17 }
 0x11f   : > { %v1157_v62 = vsel %vm283_vm0, %v8983_v11, %v4948_v31  ;;  %v4902_v31 = vunpack.i.l.bf16 %v6809_v9  ;;  %v5364_v11 = vld [vmem:[#allocation2 + $0x140] sm:$0xff] }
 0x120   : > { %v1203_v47 = vpack.c.bf16 %v1157_v62, %v1156_v23 }
 0x121   : > { %1796 = vmatmul.mubr.bf16.gmra.mrb[8].mxu1 %v1195_v29  ;;  %v1140_v29 = vsel %vm283_vm0, %v6632_v2, %v4887_v25 }
 0x122   : > { %1803 = vmatprep.mubr.bf16.mxu1 %v6794_v19  ;;  %v1106_v19 = vsel %vm283_vm0, %v5359_v52, %v4882_v22  ;;  %v1234_v34 = vpack.c.bf16 %v1141_v4, %v1140_v29  ;;  %v4897_v22 = vunpack.i.l.bf16 %v6803_v54  ;;  %v4903_v54 = vunpack.i.h.bf16 %v6809_v9  ;;  %v5363_v9 = vld [vmem:[#allocation2 + $0x138] sm:$0xff] }
 0x123   : > { %v6904_v45 = vpack.c.bf16 %v1107_v16, %v1106_v19  ;;  %v1158_v52 = vsel %vm283_vm0, %v8984_v10, %v4952_v26  ;;  %v8985_v19 = vld [vmem:[#allocation50_spill] sm:$0xff]  ;;  %v4908_v29 = vunpack.i.h.bf16 %v6817_v5  ;;  %v4907_v4 = vunpack.i.l.bf16 %v6817_v5  ;;  %v8987_v26 = vld [vmem:[#allocation52_spill] sm:$0xff] }
 0x124   : > { %1699 = vmatmul.mubr.bf16.gmra.mrb[40].mxu0 %v6886_v33  ;;  %v1142_v25 = vsel %vm283_vm0, %v6648_v59, %v4897_v22  ;;  %v1159_v3 = vsel %vm283_vm0, %v8985_v19, %v4953_v15  ;;  %v1111_v62 = vsel %vm283_vm0, %v5364_v11, %v4903_v54  ;;  %v4913_v5 = vunpack.i.h.bf16 %v6819_v27  ;;  %v5365_v27 = vld [vmem:[#allocation2 + $0x150] sm:$0xff]  ;;  %v5366_v10 = vld [vmem:[#allocation2 + $0x158] sm:$0xff] }
 0x125   : > { %1706 = vmatprep.mubr.bf16.mxu0 %v1230_v41  ;;  %v5362_v41 = vld [vmem:[#allocation2 + $0x128] sm:$0xff]  ;;  %v1238_v16 = vpack.c.bf16 %v1143_v55, %v1142_v25  ;;  %v1145_v17 = vsel %vm283_vm0, %v6673_v43, %v4908_v29  ;;  %v4961_v25 = vpop.permute.xlu1 %4960  ;;  %v4922_v29 = vunpack.i.l.bf16 %v6830_v0 }
 0x126   : > { %v1109_v24 = vsel %vm283_vm0, %v5362_v41, %v4893_v32  ;;  %v4956_v32 = vpop.permute.xlu0 %4955  ;;  %v4918_v41 = vunpack.i.h.bf16 %v6824_v46  ;;  %v4963_v54 = vunpack.i.h.bf16 %v4961_v25 }
 0x127   : > { %v4958_v7 = vunpack.i.h.bf16 %v4956_v32  ;;  %v4957_v23 = vunpack.i.l.bf16 %v4956_v32 }
 0x129   : > { %1804 = vmatmul.mubr.bf16.gmra.mrb[12].mxu1 %v1199_v38 }
 0x12a   : > { %1811 = vmatprep.mubr.bf16.mxu1 %v6811_v61  ;;  %v1108_v61 = vsel %vm283_vm0, %v5361_v6, %v4892_v28  ;;  %v1207_v28 = vpack.c.bf16 %v1159_v3, %v1158_v52  ;;  %v1161_v6 = vsel %vm283_vm0, %v8987_v26, %v4958_v7  ;;  %v1113_v52 = vsel %vm283_vm0, %v5366_v10, %v4913_v5 }
 0x12b   : > { %v6922_v38 = vpack.c.bf16 %v1109_v24, %v1108_v61  ;;  %v4917_v24 = vunpack.i.l.bf16 %v6824_v46  ;;  %v1147_v3 = vsel %vm283_vm0, %v6704_v60, %v4918_v41  ;;  %v4923_v46 = vunpack.i.h.bf16 %v6830_v0  ;;  %v5368_v0 = vld [vmem:[#allocation2 + $0x170] sm:$0xff] }
 0x12c   : > { %1707 = vmatmul.mubr.bf16.gmra.mrb[44].mxu0 %v6904_v45 }
 0x12d   : > { %1714 = vmatprep.mubr.bf16.mxu0 %v1234_v34  ;;  %v1144_v34 = vsel %vm283_vm0, %v6668_v14, %v4907_v4  ;;  %v1146_v19 = vsel %vm283_vm0, %v6701_v57, %v4917_v24  ;;  %v8988_v4 = vld [vmem:[#allocation53_spill] sm:$0xff] }
 0x12e   : > { %v1242_v61 = vpack.c.bf16 %v1145_v17, %v1144_v34  ;;  %v5367_v34 = vld [vmem:[#allocation2 + $0x168] sm:$0xff] }
 0x12f   : > { %v1114_v17 = vsel %vm283_vm0, %v5367_v34, %v4922_v29 }
 0x131   : > { %1812 = vmatmul.mubr.bf16.gmra.mrb[16].mxu1 %v1203_v47  ;;  %v8986_v47 = vld [vmem:[#allocation51_spill] sm:$0xff] }
 0x132   : > { %1819 = vmatprep.mubr.bf16.mxu1 %v6834_v53  ;;  %v1110_v53 = vsel %vm283_vm0, %v5363_v9, %v4902_v31  ;;  %v1160_v15 = vsel %vm283_vm0, %v8986_v47, %v4957_v23  ;;  %v4962_v31 = vunpack.i.l.bf16 %v4961_v25  ;;  %v1246_v23 = vpack.c.bf16 %v1147_v3, %v1146_v19  ;;  %v4966_v9 = vpop.permute.xlu0 %4965  ;;  %v8995_v19 = vld [vmem:[#allocation62_spill] sm:$0xff] }
 0x133   : > { %v6940_v22 = vpack.c.bf16 %v1111_v62, %v1110_v53  ;;  %v1211_v55 = vpack.c.bf16 %v1161_v6, %v1160_v15  ;;  %v4968_v11 = vunpack.i.h.bf16 %v4966_v9  ;;  %v4967_v62 = vunpack.i.l.bf16 %v4966_v9  ;;  %v8991_v15 = vld [vmem:[#allocation57_spill] sm:$0xff] }
 0x134   : > { %1715 = vmatmul.mubr.bf16.gmra.mrb[48].mxu0 %v6922_v38  ;;  %v1162_v32 = vsel %vm283_vm0, %v8988_v4, %v4962_v31  ;;  %v1188_v6 = vpack.c.bf16 %v6469_v30, %v6462_v36  ;;  %v8993_v31 = vld [vmem:[#allocation59_spill] sm:$0xff]  ;;  %v1197_v30 = vpack.c.bf16 %v6503_v20, %v6496_v44  ;;  %v1205_v20 = vpack.c.bf16 %v6537_v42, %v6530_v1 }
 0x135   : > { %1722 = vmatprep.mubr.bf16.mxu0 %v1238_v16  ;;  %v1165_v26 = vsel %vm283_vm0, %v8991_v15, %v4968_v11  ;;  %v8999_v42 = vld [vmem:[#allocation75_spill] sm:$0xff] }
 0x139   : > { %1820 = vmatmul.mubr.bf16.gmra.mrb[20].mxu1 %v1207_v28  ;;  %v8989_v28 = vld [vmem:[#allocation54_spill] sm:$0xff] }
 0x13a   : > { %1827 = vmatprep.mubr.bf16.mxu1 %v6850_v56  ;;  %v1112_v56 = vsel %vm283_vm0, %v5365_v27, %v4912_v40  ;;  %v1163_v7 = vsel %vm283_vm0, %v8989_v28, %v4963_v54  ;;  %v8990_v40 = vld [vmem:[#allocation56_spill] sm:$0xff]  ;;  %v4976_v27 = vpop.permute.xlu0 %4975 }
 0x13b   : > { %v6958_v16 = vpack.c.bf16 %v1113_v52, %v1112_v56  ;;  %v1215_v53 = vpack.c.bf16 %v1163_v7, %v1162_v32  ;;  %v1164_v47 = vsel %vm283_vm0, %v8990_v40, %v4967_v62  ;;  %v4978_v10 = vunpack.i.h.bf16 %v4976_v27  ;;  %v8998_v28 = vld [vmem:[#allocation64_spill] sm:$0xff] }
 0x13c   : > { %1723 = vmatmul.mubr.bf16.gmra.mrb[52].mxu0 %v6940_v22  ;;  %v1219_v41 = vpack.c.bf16 %v1165_v26, %v1164_v47  ;;  %v4977_v52 = vunpack.i.l.bf16 %v4976_v27  ;;  %v9000_v7 = vld [vmem:[#allocation76_spill] sm:$0xff] }
 0x13d   : > { %1730 = vmatprep.mubr.bf16.mxu0 %v1242_v61  ;;  %v4971_v61 = vpop.permute.xlu1 %4970  ;;  %v1169_v44 = vsel %vm283_vm0, %v8995_v19, %v4978_v10  ;;  %v9007_v19 = vld [vmem:[#allocation67_spill] sm:$0xff] }
 0x13e   : > { %v4973_v24 = vunpack.i.h.bf16 %v4971_v61  ;;  %v4972_v25 = vunpack.i.l.bf16 %v4971_v61  ;;  %v4986_v9 = vpop.permute.xlu0 %4985  ;;  %v9003_v61 = vld [vmem:[#allocation68_spill] sm:$0xff] }
 0x13f   : > { %v4988_v11 = vunpack.i.h.bf16 %v4986_v9  ;;  %v4987_v62 = vunpack.i.l.bf16 %v4986_v9 }
 0x140   : > { %v1167_v36 = vsel %vm283_vm0, %v8993_v31, %v4973_v24  ;;  %v1229_v24 = vpack.c.bf16 %v6639_v18, %v6632_v2  ;;  %v1233_v2 = vpack.c.bf16 %v6658_v35, %v6648_v59  ;;  %v9005_v18 = vld [vmem:[#allocation70_spill] sm:$0xff] }
 0x141   : > { %1828 = vmatmul.mubr.bf16.gmra.mrb[24].mxu1 %v1211_v55  ;;  %v8992_v55 = vld [vmem:[#allocation58_spill] sm:$0xff]  ;;  %v4981_v3 = vpop.permute.xlu1 %4980 }
 0x142   : > { %1835 = vmatprep.mubr.bf16.mxu1 %v6868_v48  ;;  %v1115_v48 = vsel %vm283_vm0, %v5368_v0, %v4923_v46  ;;  %v1166_v54 = vsel %vm283_vm0, %v8992_v55, %v4972_v25  ;;  %v4983_v29 = vunpack.i.h.bf16 %v4981_v3  ;;  %v4982_v4 = vunpack.i.l.bf16 %v4981_v3  ;;  %v4996_v47 = vpop.permute.xlu0 %4995 }
 0x143   : > { %v6969_v5 = vpack.c.bf16 %v1115_v48, %v1114_v17  ;;  %v1223_v56 = vpack.c.bf16 %v1167_v36, %v1166_v54  ;;  %v9002_v17 = vld [vmem:[#allocation66_spill] sm:$0xff]  ;;  %v1221_v48 = vpack.c.bf16 %v6605_v51, %v6598_v13  ;;  %v9004_v51 = vld [vmem:[#allocation69_spill] sm:$0xff]  ;;  %v5370_v54 = vld [vmem:[#allocation2 + $0x188] sm:$0xff] }
 0x144   : > { %1731 = vmatmul.mubr.bf16.gmra.mrb[56].mxu0 %v6958_v16  ;;  %v1171_v1 = vsel %vm283_vm0, %v8998_v28, %v4983_v29  ;;  %v1173_v0 = vsel %vm283_vm0, %v9002_v17, %v4988_v11  ;;  %v1075_v28 = vrot.slane %v9007_v19, 2 }
 0x145   : > { %1738 = vmatprep.mubr.bf16.mxu0 %v1246_v23  ;;  %v1213_v23 = vpack.c.bf16 %v9000_v7, %v8999_v42  ;;  %v4991_v40 = vpop.permute.xlu1 %4990  ;;  %v9012_v7 = vld [vmem:[#allocation73_spill] sm:$0xff] }
 0x146   : > { %v4993_v26 = vunpack.i.h.bf16 %v4991_v40  ;;  %v5006_v36 = vpop.permute.xlu0 %5005 }
 0x147   : > { %v5008_v27 = vunpack.i.h.bf16 %v5006_v36 }
 0x149   : > { %1836 = vmatmul.mubr.bf16.gmra.mrb[28].mxu1 %v1215_v53  ;;  %v5001_v25 = vpop.permute.xlu1 %5000 }
 0x14a   : > { %1843 = vmatprep.mubr.bf16.mxu1 %v6886_v33  ;;  %v1193_v33 = vpack.c.bf16 %v6489_v8, %v6482_v39  ;;  %v1201_v39 = vpack.c.bf16 %v6523_v12, %v6516_v63  ;;  %v8994_v8 = vld [vmem:[#allocation61_spill] sm:$0xff]  ;;  %v8996_v63 = vld [vmem:[#allocation74_spill] sm:$0xff] }
 0x14b   : > { %v1209_v12 = vpack.c.bf16 %v8996_v63, %v6550_v58  ;;  %v1217_v58 = vpack.c.bf16 %v6591_v37, %v6584_v49  ;;  %v4998_v49 = vunpack.i.h.bf16 %v4996_v47  ;;  %v4997_v37 = vunpack.i.l.bf16 %v4996_v47 }
 0x14c   : > { %1739 = vmatmul.mubr.bf16.gmra.mrb[60].mxu0 %v6969_v5 }
 0x14d   : > { %4649 = vmatprep.mubr.msk.bf16.mxu0 %vm283_vm0, %v1188_v6  ;;  %v4992_v6 = vunpack.i.l.bf16 %v4991_v40  ;;  %v1181_v31 = vsel %vm283_vm0, %v5370_v54, %v4998_v49  ;;  %v2213_v49 = vld [vmem:[#allocation3 + $0x8] sm:$0xff] }
 0x14f   : > { %v1174_v13 = vsel %vm283_vm0, %v9003_v61, %v4992_v6  ;;  %v2212_v6 = vld [vmem:[#allocation3] sm:$0xff] }
 0x150   : > { %v2314_v61 = vrot.slane %v2212_v6, 1 }
 0x151   : > { %1844 = vmatmul.mubr.bf16.gmra.mrb[32].mxu1 %v1219_v41  ;;  %v1175_v41 = vsel %vm283_vm0, %v9004_v51, %v4993_v26 }
 0x152   : > { %1851 = vmatprep.mubr.bf16.mxu1 %v6904_v45  ;;  %v1168_v45 = vsel %vm283_vm0, %v8994_v8, %v4977_v52  ;;  %v9006_v52 = vld [vmem:[#allocation71_spill] sm:$0xff]  ;;  %v1237_v8 = vpack.c.bf16 %v6673_v43, %v6668_v14  ;;  %v1241_v14 = vpack.c.bf16 %v6704_v60, %v6701_v57  ;;  %v9010_v43 = vld [vmem:[#allocation78_spill] sm:$0xff] }
 0x153   : > { %v1227_v46 = vpack.c.bf16 %v1169_v44, %v1168_v45  ;;  %v5011_v45 = vpop.permute.xlu1 %5010 }
 0x154   : > { %4650 = vmatmul.mubr.msk.bf16.vlgmr.msra.gmra.mrb[64].mxu0 %vm283_vm0, %v1193_v33  ;;  %v5369_v33 = vld [vmem:[#allocation2 + $0x180] sm:$0xff]  ;;  %v5013_v35 = vunpack.i.h.bf16 %v5011_v45 }
 0x155   : > { %4653 = vmatprep.mubr.msk.bf16.mxu0 %vm283_vm0, %v1197_v30  ;;  %v1180_v55 = vsel %vm283_vm0, %v5369_v33, %v4997_v37  ;;  %v2214_v37 = vld [vmem:[#allocation3 + $0x10] sm:$0x3] }
 0x156   : > { %v1244_v30 = vpack.c.bf16 %v1181_v31, %v1180_v55  ;;  %v2317_v51 = vrot.slane %v2214_v37, 1 }
 0x159   : > { %1852 = vmatmul.mubr.bf16.gmra.mrb[36].mxu1 %v1223_v56  ;;  %v5007_v56 = vunpack.i.l.bf16 %v5006_v36 }
 0x15a   : > { %1859 = vmatprep.mubr.bf16.mxu1 %v6922_v38  ;;  %v8997_v38 = vld [vmem:[#allocation63_spill] sm:$0xff] }
 0x15b   : > { %v1170_v32 = vsel %vm283_vm0, %v8997_v38, %v4982_v4  ;;  %v1182_v44 = vsel %vm283_vm0, %v9007_v19, %v5007_v56  ;;  %v9009_v4 = vld [vmem:[#allocation77_spill] sm:$0xff]  ;;  %v9011_v38 = vld [vmem:[#allocation79_spill] sm:$0xff] }
 0x15c   : > { %4654 = vmatmul.mubr.msk.bf16.gmra.mrb[68].mxu0 %vm283_vm0, %v1201_v39  ;;  %v1231_v53 = vpack.c.bf16 %v1171_v1, %v1170_v32  ;;  %v1078_v63 = vrot.slane %v9009_v4, 2  ;;  %v1179_v32 = vsel %vm283_vm0, %v9011_v38, %v5013_v35 }
 0x15d   : > { %4657 = vmatprep.mubr.msk.bf16.mxu0 %vm283_vm0, %v1205_v20  ;;  %v9008_v20 = vld [vmem:[#allocation55_spill] sm:$0xff] }
 0x15e   : > { %v1183_v3 = vsel %vm283_vm0, %v9008_v20, %v5008_v27  ;;  %v1076_v1 = vrot.slane %v9008_v20, 2  ;;  %v5303_v20 = vld [vmem:[%s8689_s4 + $0x8] sm:$0xff]  }
 0x15f   : > { %v1248_v29 = vpack.c.bf16 %v1183_v3, %v1182_v44  ;;  %v5302_v44 = vld [vmem:[%s8689_s4 + $0x48] sm:$0xff]  }
 0x160   : > { %v1077_v57 = vsel %vm705_vm3, %v1075_v28, %v1076_v1  ;;  %v1079_v60 = vsel %vm705_vm3, %v1076_v1, %v1078_v63  ;;  %v5304_v28 = vld [vmem:[%s8689_s4 + $0x50] sm:$0xff]  }
 0x161   : > { %1860 = vmatmul.mubr.bf16.gmra.mrb[40].mxu1 %v1227_v46  ;;  %v5012_v46 = vunpack.i.l.bf16 %v5011_v45  ;;  %v5305_v1 = vld [vmem:[%s8689_s4 + $0x10] sm:$0xff]  }
 0x162   : > { %1867 = vmatprep.mubr.bf16.mxu1 %v6940_v22  ;;  %v9001_v22 = vld [vmem:[#allocation65_spill] sm:$0xff] }
 0x163   : > { %v1172_v34 = vsel %vm283_vm0, %v9001_v22, %v4987_v62 }
 0x164   : > { %4658 = vmatmul.mubr.msk.bf16.gmra.mrb[72].mxu0 %vm283_vm0, %v1209_v12  ;;  %v1235_v15 = vpack.c.bf16 %v1173_v0, %v1172_v34  ;;  %v1178_v12 = vsel %vm283_vm0, %v9010_v43, %v5012_v46 }
 0x165   : > { %4661 = vmatprep.mubr.msk.bf16.mxu0 %vm283_vm0, %v1213_v23  ;;  %v1247_v42 = vpack.c.bf16 %v1179_v32, %v1178_v12  ;;  %v9013_v23 = vld [vmem:[#allocation72_spill] sm:$0xff] }
 0x166   : > { %v9014_v9 = vpack.c.bf16 %v9012_v7, %v9013_v23 }
 0x169   : > { %1868 = vmatmul.mubr.bf16.gmra.mrb[44].mxu1 %v1231_v53  ;;  %v1249_v53 = vpack.c.bf16 %v1079_v60, %v1077_v57 }
 0x16a   : > { %1875 = vmatprep.mubr.bf16.mxu1 %v6958_v16  ;;  %v1225_v16 = vpack.c.bf16 %v6622_v50, %v6615_v21  ;;  %v1239_v21 = vpack.c.bf16 %v1175_v41, %v1174_v13  ;;  %v5003_v50 = vunpack.i.h.bf16 %v5001_v25  ;;  %v2315_v13 = vrot.slane %v2213_v49, 1 }
 0x16c   : > { %4662 = vmatmul.mubr.msk.bf16.gmra.mrb[76].mxu0 %vm283_vm0, %v1217_v58  ;;  %v1177_v39 = vsel %vm283_vm0, %v9006_v52, %v5003_v50  ;;  %v2316_v33 = vsel %vm528_vm2, %v2314_v61, %v2315_v13  ;;  %v2318_v55 = vsel %vm528_vm2, %v2315_v13, %v2317_v51  ;;  %v5301_v50 = vld [vmem:[%s8689_s4] sm:$0xff]  }
 0x16d   : > { %4665 = vmatprep.mubr.msk.bf16.mxu0 %vm283_vm0, %v1221_v48  ;;  %v5019_v31 = vpack.i.bf16 %v2318_v55, %v2316_v33 }
 0x16f   : > { %5020 = vrot.lane.b32.xlu1 %v5019_v31, %s5451_s9 }
 0x171   : > { %1876 = vmatmul.mubr.bf16.gmra.mrb[48].mxu1 %v1235_v15 }
 0x172   : > { %1883 = vmatprep.mubr.bf16.mxu1 %v6969_v5  ;;  %v5002_v5 = vunpack.i.l.bf16 %v5001_v25 }
 0x174   : > { %4666 = vmatmul.mubr.msk.bf16.gmra.mrb[80].mxu0 %vm283_vm0, %v1225_v16  ;;  %v1176_v10 = vsel %vm283_vm0, %v9005_v18, %v5002_v5 }
 0x175   : > { %4669 = vmatprep.mubr.msk.bf16.mxu0 %vm283_vm0, %v1229_v24  ;;  %v1243_v59 = vpack.c.bf16 %v1177_v39, %v1176_v10 }
 0x179   : > { %1884 = vmatmul.mubr.bf16.gmra.mrb[52].mxu1 %v1239_v21  ;;  %v5300_v21 = vld [vmem:[%s8689_s4 + $0x40] sm:$0xff]  }
 0x17a   : > { %1891 = vmatprep.mubr.bf16.mxu1 %v1244_v30  ;;  %4397 = vmatprep.subr.bf16.mxu1 %v5300_v21 }
 0x17b   : > { %4398 = vmatpush3.bf16.msra.mxu1 %v5301_v50 }
 0x17c   : > { %4670 = vmatmul.mubr.msk.bf16.gmra.mrb[84].mxu0 %vm283_vm0, %v1233_v2  ;;  %4399 = vmatprep.subr.bf16.mxu1 %v5302_v44 }
 0x17d   : > { %4673 = vmatprep.mubr.msk.bf16.mxu0 %vm283_vm0, %v1237_v8 }
 0x17f   : > { %4400 = vmatpush3.bf16.msra.mxu1 %v5303_v20 }
 0x180   : > { %4401 = vmatprep.subr.bf16.mxu1 %v5304_v28 }
 0x181   : > { %1892 = vmatmul.mubr.bf16.gmra.mrb[56].mxu1 %v1243_v59 }
 0x182   : > { %1899 = vmatprep.mubr.bf16.mxu1 %v1248_v29 }
 0x183   : > { %4402 = vmatpush3.bf16.msra.mxu1 %v5305_v1 }
 0x184   : > { %4674 = vmatmul.mubr.msk.bf16.gmra.mrb[88].mxu0 %vm283_vm0, %v1241_v14 }
 0x185   : > { %4677 = vmatprep.mubr.msk.bf16.mxu0 %vm283_vm0, %v9014_v9 }
 0x189   : > { %1900 = vmatmul.mubr.bf16.gmra.mrb[60].mxu1 %v1247_v42 }
 0x18c   : > { %4678 = vmatmul.mubr.msk.bf16.gmra.mrb[92].mxu0 %vm283_vm0, %v1249_v53 }
 0x1a7   : > { %v4169_v11 = vpop.f32.mrb[0].mxu0 }
 0x1a8   : > { %v4170_v62 = vpop.f32.mrb[1].mxu0 }
 0x1a9   : > { %v7068_v58 = vadd.f32 %v4170_v62, %v4169_v11  ;;  %v4172_v22 = vpop.f32.mrb[2].mxu0 }
 0x1aa   : > { %v4173_v34 = vpop.f32.mrb[3].mxu0 }
 0x1ab   : > { %v7070_v17 = vadd.f32 %v4173_v34, %v4172_v22 }
 0x1af   : > { %v4175_v0 = vpop.f32.mrb[4].mxu0 }
 0x1b0   : > { %v4176_v48 = vpop.f32.mrb[5].mxu0 }
 0x1b1   : > { %v7072_v40 = vadd.f32 %v4176_v48, %v4175_v0  ;;  %v4178_v47 = vpop.f32.mrb[6].mxu0 }
 0x1b2   : > { %v4179_v15 = vpop.f32.mrb[7].mxu0 }
 0x1b3   : > { %v7074_v26 = vadd.f32 %v4179_v15, %v4178_v47 }
 0x1b7   : > { %v4181_v16 = vpop.f32.mrb[8].mxu0 }
 0x1b8   : > { %v4182_v41 = vpop.f32.mrb[9].mxu0 }
 0x1b9   : > { %v7076_v24 = vadd.f32 %v4182_v41, %v4181_v16  ;;  %v4184_v25 = vpop.f32.mrb[10].mxu0  ;;  %v5306_v41 = vld [vmem:[%s8689_s4 + $0x58] sm:$0xff]  }
 0x1ba   : > { %v4185_v54 = vpop.f32.mrb[11].mxu0  ;;  %4403 = vmatprep.subr.bf16.mxu1 %v5306_v41 }
 0x1bb   : > { %v7080_v36 = vadd.f32 %v4185_v54, %v4184_v25 }
 0x1bf   : > { %v4187_v5 = vpop.f32.mrb[12].mxu0 }
 0x1c0   : > { %v4188_v30 = vpop.f32.mrb[13].mxu0 }
 0x1c1   : > { %v7089_v27 = vadd.f32 %v4188_v30, %v4187_v5  ;;  %v4190_v56 = vpop.f32.mrb[14].mxu0 }
 0x1c2   : > { %v4191_v2 = vpop.f32.mrb[15].mxu0 }
 0x1c3   : > { %v7091_v18 = vadd.f32 %v4191_v2, %v4190_v56 }
 0x1c7   : > { %v4193_v10 = vpop.f32.mrb[16].mxu0 }
 0x1c8   : > { %v4194_v52 = vpop.f32.mrb[17].mxu0 }
 0x1c9   : > { %v7093_v39 = vadd.f32 %v4194_v52, %v4193_v10  ;;  %v4196_v8 = vpop.f32.mrb[18].mxu0 }
 0x1ca   : > { %v4197_v45 = vpop.f32.mrb[19].mxu0 }
 0x1cb   : > { %v7095_v19 = vadd.f32 %v4197_v45, %v4196_v8 }
 0x1cf   : > { %v4199_v3 = vpop.f32.mrb[20].mxu0 }
 0x1d0   : > { %v4200_v59 = vpop.f32.mrb[21].mxu0 }
 0x1d1   : > { %v7103_v35 = vadd.f32 %v4200_v59, %v4199_v3  ;;  %v4202_v46 = vpop.f32.mrb[22].mxu0  ;;  %v5308_v59 = vld [vmem:[%s8689_s4 + $0x60] sm:$0xff]  }
 0x1d2   : > { %v4203_v29 = vpop.f32.mrb[23].mxu0 }
 0x1d3   : > { %v7105_v4 = vadd.f32 %v4203_v29, %v4202_v46 }
 0x1d7   : > { %v4205_v63 = vpop.f32.mrb[24].mxu0 }
 0x1d8   : > { %v4206_v14 = vpop.f32.mrb[25].mxu0 }
 0x1d9   : > { %v7107_v43 = vadd.f32 %v4206_v14, %v4205_v63  ;;  %v4208_v12 = vpop.f32.mrb[26].mxu0 }
 0x1da   : > { %v4209_v38 = vpop.f32.mrb[27].mxu0 }
 0x1db   : > { %v7109_v32 = vadd.f32 %v4209_v38, %v4208_v12 }
 0x1df   : > { %v4211_v42 = vpop.f32.mrb[28].mxu0 }
 0x1e0   : > { %v4212_v7 = vpop.f32.mrb[29].mxu0 }
 0x1e1   : > { %v7117_v23 = vadd.f32 %v4212_v7, %v4211_v42  ;;  %v4214_v9 = vpop.f32.mrb[30].mxu0 }
 0x1e2   : > { %v4215_v57 = vpop.f32.mrb[31].mxu0 }
 0x1e3   : > { %v7119_v60 = vadd.f32 %v4215_v57, %v4214_v9 }
 0x1e4   : > { %v4281_v53 = vpop.f32.mrb[0].mxu1 }
 0x1e5   : > { %v4282_v11 = vpop.f32.mrb[1].mxu1 }
 0x1e6   : > { %v4283_v62 = vadd.f32 %v4282_v11, %v4281_v53  ;;  %v4284_v22 = vpop.f32.mrb[2].mxu1 }
 0x1e7   : > { %v4285_v34 = vpop.f32.mrb[3].mxu1  ;;  %v4217_v48 = vpop.f32.mrb[32].mxu0 }
 0x1e8   : > { %v4286_v0 = vadd.f32 %v4285_v34, %v4284_v22  ;;  %v7122_v47 = vadd.f32 %v4283_v62, %v7068_v58  ;;  %v4218_v15 = vpop.f32.mrb[33].mxu0  ;;  %v5307_v58 = vld [vmem:[%s8689_s4 + $0x18] sm:$0xff]  }
 0x1e9   : > { %v7124_v6 = vadd.f32 %v4218_v15, %v4217_v48  ;;  %v4220_v49 = vpop.f32.mrb[34].mxu0  ;;  %4404 = vmatpush3.bf16.msra.mxu1 %v5307_v58  ;;  %v5310_v58 = vld [vmem:[%s8689_s4 + $0x68] sm:$0xff]  }
 0x1ea   : > { %v7127_v37 = vadd.f32 %v4286_v0, %v7070_v17  ;;  %v4221_v16 = vpop.f32.mrb[35].mxu0  ;;  %4405 = vmatprep.subr.bf16.mxu1 %v5308_v59 }
 0x1eb   : > { %v7129_v61 = vadd.f32 %v4221_v16, %v4220_v49 }
 0x1ec   : > { %v4287_v13 = vpop.f32.mrb[4].mxu1 }
 0x1ed   : > { %v4288_v51 = vpop.f32.mrb[5].mxu1 }
 0x1ee   : > { %v4289_v25 = vadd.f32 %v4288_v51, %v4287_v13  ;;  %v4290_v33 = vpop.f32.mrb[6].mxu1 }
 0x1ef   : > { %v4291_v55 = vpop.f32.mrb[7].mxu1  ;;  %v4223_v17 = vpop.f32.mrb[36].mxu0 }
 0x1f0   : > { %v4292_v54 = vadd.f32 %v4291_v55, %v4290_v33  ;;  %v7138_v31 = vadd.f32 %v4289_v25, %v7072_v40  ;;  %v4224_v21 = vpop.f32.mrb[37].mxu0 }
 0x1f1   : > { %v7140_v50 = vadd.f32 %v4224_v21, %v4223_v17  ;;  %v4226_v5 = vpop.f32.mrb[38].mxu0 }
 0x1f2   : > { %v7143_v30 = vadd.f32 %v4292_v54, %v7074_v26  ;;  %v4227_v56 = vpop.f32.mrb[39].mxu0 }
 0x1f3   : > { %v7145_v2 = vadd.f32 %v4227_v56, %v4226_v5 }
 0x1f4   : > { %v4293_v10 = vpop.f32.mrb[8].mxu1 }
 0x1f5   : > { %v4294_v52 = vpop.f32.mrb[9].mxu1 }
 0x1f6   : > { %v4295_v8 = vadd.f32 %v4294_v52, %v4293_v10  ;;  %v4296_v45 = vpop.f32.mrb[10].mxu1 }
 0x1f7   : > { %v4297_v44 = vpop.f32.mrb[11].mxu1  ;;  %v4229_v3 = vpop.f32.mrb[40].mxu0 }
 0x1f8   : > { %v4298_v20 = vadd.f32 %v4297_v44, %v4296_v45  ;;  %v7148_v40 = vadd.f32 %v4295_v8, %v7076_v24  ;;  %v4230_v46 = vpop.f32.mrb[41].mxu0  ;;  %v5309_v24 = vld [vmem:[%s8689_s4 + $0x20] sm:$0xff]  }
 0x1f9   : > { %v7153_v26 = vadd.f32 %v4230_v46, %v4229_v3  ;;  %v4232_v29 = vpop.f32.mrb[42].mxu0  ;;  %4406 = vmatpush3.bf16.msra.mxu1 %v5309_v24 }
 0x1fa   : > { %v7156_v63 = vadd.f32 %v4298_v20, %v7080_v36  ;;  %v4233_v14 = vpop.f32.mrb[43].mxu0  ;;  %4407 = vmatprep.subr.bf16.mxu1 %v5310_v58 }
 0x1fb   : > { %v7158_v12 = vadd.f32 %v4233_v14, %v4232_v29 }
 0x1fc   : > { %v4299_v38 = vpop.f32.mrb[12].mxu1 }
 0x1fd   : > { %v4300_v28 = vpop.f32.mrb[13].mxu1 }
 0x1fe   : > { %v4301_v1 = vadd.f32 %v4300_v28, %v4299_v38  ;;  %v4302_v42 = vpop.f32.mrb[14].mxu1 }
 0x1ff   : > { %v4303_v7 = vpop.f32.mrb[15].mxu1  ;;  %v4235_v57 = vpop.f32.mrb[44].mxu0 }
 0x200   : > { %v4304_v9 = vadd.f32 %v4303_v7, %v4302_v42  ;;  %v7164_v53 = vadd.f32 %v4301_v1, %v7089_v27  ;;  %v4236_v36 = vpop.f32.mrb[45].mxu0 }
 0x201   : > { %v7166_v11 = vadd.f32 %v4236_v36, %v4235_v57  ;;  %v4238_v62 = vpop.f32.mrb[46].mxu0 }
 0x202   : > { %v7169_v22 = vadd.f32 %v4304_v9, %v7091_v18  ;;  %v4239_v34 = vpop.f32.mrb[47].mxu0  ;;  %v5312_v9 = vld [vmem:[%s8689_s4 + $0x70] sm:$0xff]  }
 0x203   : > { %v7171_v0 = vadd.f32 %v4239_v34, %v4238_v62 }
 0x204   : > { %v4305_v48 = vpop.f32.mrb[16].mxu1 }
 0x205   : > { %v4306_v15 = vpop.f32.mrb[17].mxu1 }
 0x206   : > { %v4307_v49 = vadd.f32 %v4306_v15, %v4305_v48  ;;  %v4308_v16 = vpop.f32.mrb[18].mxu1 }
 0x207   : > { %v4309_v13 = vpop.f32.mrb[19].mxu1  ;;  %v4241_v41 = vpop.f32.mrb[48].mxu0 }
 0x208   : > { %v4310_v51 = vadd.f32 %v4309_v13, %v4308_v16  ;;  %v7174_v27 = vadd.f32 %v4307_v49, %v7093_v39  ;;  %v4242_v25 = vpop.f32.mrb[49].mxu0  ;;  %v5311_v39 = vld [vmem:[%s8689_s4 + $0x28] sm:$0xff]  }
 0x209   : > { %v7179_v18 = vadd.f32 %v4242_v25, %v4241_v41  ;;  %v4244_v33 = vpop.f32.mrb[50].mxu0  ;;  %4408 = vmatpush3.bf16.msra.mxu1 %v5311_v39 }
 0x20a   : > { %v7182_v55 = vadd.f32 %v4310_v51, %v7095_v19  ;;  %v4245_v54 = vpop.f32.mrb[51].mxu0  ;;  %4409 = vmatprep.subr.bf16.mxu1 %v5312_v9 }
 0x20b   : > { %v7184_v17 = vadd.f32 %v4245_v54, %v4244_v33 }
 0x20c   : > { %v4311_v21 = vpop.f32.mrb[20].mxu1 }
 0x20d   : > { %v4312_v5 = vpop.f32.mrb[21].mxu1 }
 0x20e   : > { %v4313_v56 = vadd.f32 %v4312_v5, %v4311_v21  ;;  %v4314_v10 = vpop.f32.mrb[22].mxu1 }
 0x20f   : > { %v4315_v52 = vpop.f32.mrb[23].mxu1  ;;  %v4247_v45 = vpop.f32.mrb[52].mxu0 }
 0x210   : > { %v4316_v8 = vadd.f32 %v4315_v52, %v4314_v10  ;;  %v7190_v44 = vadd.f32 %v4313_v56, %v7103_v35  ;;  %v4248_v19 = vpop.f32.mrb[53].mxu0  ;;  %v5314_v10 = vld [vmem:[%s8689_s4 + $0x78] sm:$0xff]  }
 0x211   : > { %v7192_v20 = vadd.f32 %v4248_v19, %v4247_v45  ;;  %v4250_v3 = vpop.f32.mrb[54].mxu0 }
 0x212   : > { %v7195_v59 = vadd.f32 %v4316_v8, %v7105_v4  ;;  %v4251_v46 = vpop.f32.mrb[55].mxu0 }
 0x213   : > { %v7197_v29 = vadd.f32 %v4251_v46, %v4250_v3  ;;  %v7234_v46 = vld [vmem:[%s8687_s2] ss:$0 sm:$0xff] }
 0x214   : > { %v4317_v14 = vpop.f32.mrb[24].mxu1 }
 0x215   : > { %v4318_v38 = vpop.f32.mrb[25].mxu1 }
 0x216   : > { %v4319_v24 = vadd.f32 %v4318_v38, %v4317_v14  ;;  %v4320_v28 = vpop.f32.mrb[26].mxu1 }
 0x217   : > { %v4321_v1 = vpop.f32.mrb[27].mxu1  ;;  %v4253_v7 = vpop.f32.mrb[56].mxu0 }
 0x218   : > { %v4322_v42 = vadd.f32 %v4321_v1, %v4320_v28  ;;  %v7200_v35 = vadd.f32 %v4319_v24, %v7107_v43  ;;  %v4254_v57 = vpop.f32.mrb[57].mxu0  ;;  %v5313_v43 = vld [vmem:[%s8689_s4 + $0x30] sm:$0xff]   ;;  %v7243_v28 = vld [vmem:[%s8688_s3] ss:$0 sm:$0xff] }
 0x219   : > { %v7205_v4 = vadd.f32 %v4254_v57, %v4253_v7  ;;  %v4256_v36 = vpop.f32.mrb[58].mxu0  ;;  %4410 = vmatpush3.bf16.msra.mxu1 %v5313_v43 }
 0x21a   : > { %v7208_v62 = vadd.f32 %v4322_v42, %v7109_v32  ;;  %v4257_v34 = vpop.f32.mrb[59].mxu0  ;;  %4411 = vmatprep.subr.bf16.mxu1 %v5314_v10 }
 0x21b   : > { %v7210_v48 = vadd.f32 %v4257_v34, %v4256_v36 }
 0x21c   : > { %v4323_v15 = vpop.f32.mrb[28].mxu1 }
 0x21d   : > { %v4324_v49 = vpop.f32.mrb[29].mxu1 }
 0x21e   : > { %v4325_v16 = vadd.f32 %v4324_v49, %v4323_v15  ;;  %v4326_v13 = vpop.f32.mrb[30].mxu1 }
 0x21f   : > { %v4327_v51 = vpop.f32.mrb[31].mxu1  ;;  %v4259_v58 = vpop.f32.mrb[60].mxu0 }
 0x220   : > { %v4328_v41 = vadd.f32 %v4327_v51, %v4326_v13  ;;  %v7216_v25 = vadd.f32 %v4325_v16, %v7117_v23  ;;  %v4260_v32 = vpop.f32.mrb[61].mxu0  ;;  %v5315_v23 = vld [vmem:[%s8689_s4 + $0x38] sm:$0xff]  }
 0x221   : > { %v7218_v33 = vadd.f32 %v4260_v32, %v4259_v58  ;;  %v4262_v54 = vpop.f32.mrb[62].mxu0  ;;  %4412 = vmatpush3.bf16.msra.mxu1 %v5315_v23 }
 0x222   : > { %v7221_v21 = vadd.f32 %v4328_v41, %v7119_v60  ;;  %v4263_v39 = vpop.f32.mrb[63].mxu0 }
 0x223   : > { %v7223_v5 = vadd.f32 %v4263_v39, %v4262_v54 }
 0x224   : > { %v4329_v56 = vpop.f32.mrb[32].mxu1 }
 0x225   : > { %v4330_v52 = vpop.f32.mrb[33].mxu1 }
 0x226   : > { %v4331_v8 = vadd.f32 %v4330_v52, %v4329_v56  ;;  %v4332_v45 = vpop.f32.mrb[34].mxu1  ;;  %v5316_v52 = vld [vmem:[%s8689_s4 + $0xc0] sm:$0xff]  }
 0x227   : > { %v4333_v19 = vpop.f32.mrb[35].mxu1  ;;  %v4651_v3 = vpop.f32.mrb[64].mxu0  ;;  %4509 = vmatprep.subr.bf16.mxu0 %v5316_v52 }
 0x228   : > { %v4334_v60 = vadd.f32 %v4333_v19, %v4332_v45  ;;  %v7237_v14 = vadd.f32 %v4331_v8, %v7124_v6  ;;  %v1951_v38 = vadd.f32 %v4651_v3, %v7138_v31  ;;  %v1942_v24 = vpop.f32.mrb[65].mxu0  ;;  %v5317_v8 = vld [vmem:[%s8689_s4 + $0x80] sm:$0xff]  }
 0x229   : > { %v1943_v1 = vadd.f32 %v1942_v24, %v7122_v47  ;;  %v4652_v42 = vpop.f32.mrb[66].mxu0  ;;  %4510 = vmatpush3.bf16.msra.mxu0 %v5317_v8 }
 0x22a   : > { %v7247_v7 = vadd.f32 %v4334_v60, %v7129_v61  ;;  %v2078_v9 = vmul.f32 %v7234_v46, %v1951_v38  ;;  %v1954_v57 = vadd.f32 %v4652_v42, %v7143_v30  ;;  %v1945_v6 = vpop.f32.mrb[67].mxu0 }
 0x22b   : > { %v2076_v36 = vmul.f32 %v7234_v46, %v1943_v1  ;;  %v1946_v31 = vadd.f32 %v1945_v6, %v7127_v37 }
 0x22c   : > { %v4335_v34 = vpop.f32.mrb[36].mxu1  ;;  %v2117_v15 = vadd.f32 %v7243_v28, %v2078_v9  ;;  %v2079_v43 = vmul.f32 %v7234_v46, %v1954_v57 }
 0x22d   : > { %v4336_v49 = vpop.f32.mrb[37].mxu1  ;;  %v2115_v47 = vadd.f32 %v7243_v28, %v2076_v36  ;;  %v2077_v61 = vmul.f32 %v7234_v46, %v1946_v31  ;;  %v5318_v31 = vld [vmem:[%s8689_s4 + $0x100] sm:$0xff]  }
 0x22e   : > { %v4337_v16 = vadd.f32 %v4336_v49, %v4335_v34  ;;  %v4338_v13 = vpop.f32.mrb[38].mxu1  ;;  %v2149_v51 = vmax.f32 %v2117_v15, 0.0  ;;  %v2118_v30 = vadd.f32 %v7243_v28, %v2079_v43  ;;  %4681 = vmatprep.subr.bf16.mxu1 %v5318_v31 }
 0x22f   : > { %v4339_v41 = vpop.f32.mrb[39].mxu1  ;;  %v2147_v58 = vmax.f32 %v2115_v47, 0.0  ;;  %v2116_v32 = vadd.f32 %v7243_v28, %v2077_v61  ;;  %v4655_v54 = vpop.f32.mrb[68].mxu0 }
 0x230   : > { %v4340_v37 = vadd.f32 %v4339_v41, %v4338_v13  ;;  %v7260_v39 = vadd.f32 %v4337_v16, %v7140_v50  ;;  %2182 = vst.msk [vmem:[#allocation3 + $0x31] sm:$0xff] %vm283_vm0, %v2149_v51  ;;  %v2150_v56 = vmax.f32 %v2118_v30, 0.0  ;;  %v1967_v10 = vadd.f32 %v4655_v54, %v7164_v53  ;;  %v1958_v23 = vpop.f32.mrb[69].mxu0 }
 0x231   : > { %2180 = vst.msk [vmem:[#allocation3 + $0x19] sm:$0xff] %vm283_vm0, %v2147_v58  ;;  %v2148_v45 = vmax.f32 %v2116_v32, 0.0  ;;  %v1959_v50 = vadd.f32 %v1958_v23, %v7148_v40  ;;  %v4656_v19 = vpop.f32.mrb[70].mxu0 }
 0x232   : > { %v7273_v60 = vadd.f32 %v4340_v37, %v7145_v2  ;;  %2183 = vst.msk [vmem:[#allocation3 + $0x39] sm:$0xff] %vm283_vm0, %v2150_v56  ;;  %v2082_v53 = vmul.f32 %v7234_v46, %v1967_v10  ;;  %v1970_v3 = vadd.f32 %v4656_v19, %v7169_v22  ;;  %v1961_v38 = vpop.f32.mrb[71].mxu0 }
 0x233   : > { %2181 = vst.msk [vmem:[#allocation3 + $0x21] sm:$0xff] %vm283_vm0, %v2148_v45  ;;  %v2080_v24 = vmul.f32 %v7234_v46, %v1959_v50  ;;  %v1962_v1 = vadd.f32 %v1961_v38, %v7156_v63 }
 0x234   : > { %v4341_v42 = vpop.f32.mrb[40].mxu1  ;;  %v2121_v40 = vadd.f32 %v7243_v28, %v2082_v53  ;;  %v2083_v2 = vmul.f32 %v7234_v46, %v1970_v3 }
 0x235   : > { %v4342_v9 = vpop.f32.mrb[41].mxu1  ;;  %v2119_v57 = vadd.f32 %v7243_v28, %v2080_v24  ;;  %v2081_v6 = vmul.f32 %v7234_v46, %v1962_v1 }
 0x236   : > { %v4343_v22 = vadd.f32 %v4342_v9, %v4341_v42  ;;  %v4344_v36 = vpop.f32.mrb[42].mxu1  ;;  %v2153_v34 = vmax.f32 %v2121_v40, 0.0  ;;  %v2122_v63 = vadd.f32 %v7243_v28, %v2083_v2  ;;  %v5320_v40 = vld [vmem:[%s8689_s4 + $0x88] sm:$0xff]  }
 0x237   : > { %v4345_v15 = vpop.f32.mrb[43].mxu1  ;;  %v2151_v43 = vmax.f32 %v2119_v57, 0.0  ;;  %v2120_v49 = vadd.f32 %v7243_v28, %v2081_v6  ;;  %v4659_v61 = vpop.f32.mrb[72].mxu0  ;;  %v7290_v16 = vld [vmem:[#allocation3 + $0x30] sm:$0xff] }
 0x238   : > { %v4346_v47 = vadd.f32 %v4345_v15, %v4344_v36  ;;  %v7293_v13 = vadd.f32 %v4343_v22, %v7153_v26  ;;  %2186 = vst.msk [vmem:[#allocation3 + $0x61] sm:$0xff] %vm283_vm0, %v2153_v34  ;;  %v2154_v51 = vmax.f32 %v2122_v63, 0.0  ;;  %v1983_v30 = vadd.f32 %v4659_v61, %v7190_v44  ;;  %v1974_v41 = vpop.f32.mrb[73].mxu0  ;;  %v7297_v58 = vld [vmem:[#allocation3 + $0x18] sm:$0xff]  ;;  %v5321_v15 = vld [vmem:[%s8689_s4 + $0xd0] sm:$0xff]  }
 0x239   : > { %v2324_v32 = vrot.slane %v7290_v16, 1  ;;  %2184 = vst.msk [vmem:[#allocation3 + $0x49] sm:$0xff] %vm283_vm0, %v2151_v43  ;;  %v2152_v54 = vmax.f32 %v2120_v49, 0.0  ;;  %v1975_v56 = vadd.f32 %v1974_v41, %v7174_v27  ;;  %v4660_v26 = vpop.f32.mrb[74].mxu0  ;;  %v2319_v10 = vrot.slane %v7297_v58, 1  ;;  %v7304_v23 = vld [vmem:[#allocation3 + $0x38] sm:$0xff] }
 0x23a   : > { %v7307_v52 = vadd.f32 %v4346_v47, %v7158_v12  ;;  %2187 = vst.msk [vmem:[#allocation3 + $0x69] sm:$0xff] %vm283_vm0, %v2154_v51  ;;  %v2086_v44 = vmul.f32 %v7234_v46, %v1983_v30  ;;  %v1986_v8 = vadd.f32 %v4660_v26, %v7195_v59  ;;  %v1977_v45 = vpop.f32.mrb[75].mxu0  ;;  %v7312_v50 = vld [vmem:[#allocation3 + $0x20] sm:$0xff]  ;;  %v7314_v19 = vld [vmem:[#allocation3 + $0x28] sm:$0x3]  ;;  %v5024_v27 = vpack.i.bf16 %v7304_v23, %v7290_v16  ;;  %v5319_v12 = vld [vmem:[%s8689_s4 + $0xc8] sm:$0xff]  }
 0x23b   : > { %v2325_v53 = vrot.slane %v7304_v23, 1  ;;  %2185 = vst.msk [vmem:[#allocation3 + $0x51] sm:$0xff] %vm283_vm0, %v2152_v54  ;;  %v2084_v3 = vmul.f32 %v7234_v46, %v1975_v56  ;;  %v1978_v59 = vadd.f32 %v1977_v45, %v7182_v55  ;;  %v5014_v24 = vpack.i.bf16 %v7312_v50, %v7297_v58  ;;  %v7328_v42 = vld [vmem:[#allocation3 + $0x40] sm:$0x3]  ;;  %4511 = vmatprep.subr.bf16.mxu0 %v5319_v12 }
 0x23c   : > { %v4347_v38 = vpop.f32.mrb[44].mxu1  ;;  %v2320_v1 = vrot.slane %v7312_v50, 1  ;;  %v2125_v2 = vadd.f32 %v7243_v28, %v2086_v44  ;;  %v2087_v9 = vmul.f32 %v7234_v46, %v1986_v8  ;;  %v2322_v6 = vrot.slane %v7314_v19, 1  ;;  %4512 = vmatpush3.bf16.msra.mxu0 %v5320_v40  ;;  %v5322_v30 = vld [vmem:[%s8689_s4 + $0x90] sm:$0xff]  }
 0x23d   : > { %v4348_v57 = vpop.f32.mrb[45].mxu1  ;;  %v7337_v55 = vsel %vm528_vm2, %v2324_v32, %v2325_v53  ;;  %v2123_v22 = vadd.f32 %v7243_v28, %v2084_v3  ;;  %v2085_v36 = vmul.f32 %v7234_v46, %v1978_v59  ;;  %5015 = vrot.lane.b32.xlu0 %v5014_v24, %s5451_s9  ;;  %v2327_v51 = vrot.slane %v7328_v42, 1  ;;  %4513 = vmatprep.subr.bf16.mxu0 %v5321_v15  ;;  %v5324_v15 = vld [vmem:[%s8689_s4 + $0x98] sm:$0xff]  }
 0x23e   : > { %v7341_v31 = vadd.f32 %v4348_v57, %v4347_v38  ;;  %v4350_v34 = vpop.f32.mrb[46].mxu1  ;;  %v7345_v63 = vsel %vm528_vm2, %v2319_v10, %v2320_v1  ;;  %v2157_v43 = vmax.f32 %v2125_v2, 0.0  ;;  %v2126_v49 = vadd.f32 %v7243_v28, %v2087_v9  ;;  %v5323_v38 = vld [vmem:[%s8689_s4 + $0xd8] sm:$0xff]  }
 0x23f   : > { %v4351_v47 = vpop.f32.mrb[47].mxu1  ;;  %v7352_v61 = vsel %vm528_vm2, %v2320_v1, %v2322_v6  ;;  %v2155_v41 = vmax.f32 %v2123_v22, 0.0  ;;  %v2124_v32 = vadd.f32 %v7243_v28, %v2085_v36  ;;  %v4663_v56 = vpop.f32.mrb[76].mxu0  ;;  %v7363_v10 = vld [vmem:[#allocation3 + $0x60] sm:$0xff]  ;;  %v7368_v12 = vsel %vm528_vm2, %v2325_v53, %v2327_v51 }
 0x240   : > { %v7359_v54 = vadd.f32 %v4351_v47, %v4350_v34  ;;  %v5029_v26 = vpack.i.bf16 %v7352_v61, %v7345_v63  ;;  %2190 = vst.msk [vmem:[#allocation3 + $0x91] sm:$0xff] %vm283_vm0, %v2157_v43  ;;  %v2158_v44 = vmax.f32 %v2126_v49, 0.0  ;;  %v1999_v8 = vadd.f32 %v4663_v56, %v7216_v25  ;;  %v1990_v45 = vpop.f32.mrb[77].mxu0  ;;  %v7370_v3 = vld [vmem:[#allocation3 + $0x48] sm:$0xff]  ;;  %4514 = vmatpush3.bf16.msra.mxu0 %v5322_v30 }
 0x241   : > { %v2334_v59 = vrot.slane %v7363_v10, 1  ;;  %2188 = vst.msk [vmem:[#allocation3 + $0x79] sm:$0xff] %vm283_vm0, %v2155_v41  ;;  %v2156_v24 = vmax.f32 %v2124_v32, 0.0  ;;  %v1991_v1 = vadd.f32 %v1990_v45, %v7200_v35  ;;  %v4664_v25 = vpop.f32.mrb[78].mxu0  ;;  %5025 = vrot.lane.b32.xlu0 %v5024_v27, %s5451_s9  ;;  %v5039_v53 = vpack.i.bf16 %v7368_v12, %v7337_v55  ;;  %v7383_v2 = vld [vmem:[#allocation3 + $0x68] sm:$0xff]  ;;  %4515 = vmatprep.subr.bf16.mxu0 %v5323_v38 }
 0x242   : > { %5030 = vrot.lane.b32.xlu1 %v5029_v26, %s5451_s9  ;;  %v2329_v40 = vrot.slane %v7370_v3, 1  ;;  %v7385_v9 = vld [vmem:[#allocation3 + $0x70] sm:$0x3]  ;;  %2191 = vst.msk [vmem:[#allocation3 + $0x99] sm:$0xff] %vm283_vm0, %v2158_v44  ;;  %v2090_v57 = vmul.f32 %v7234_v46, %v1999_v8  ;;  %v2002_v35 = vadd.f32 %v4664_v25, %v7221_v21  ;;  %v1993_v6 = vpop.f32.mrb[79].mxu0  ;;  %v5044_v27 = vpack.i.bf16 %v7383_v2, %v7363_v10 }
 0x243   : > { %v7390_v22 = vld [vmem:[#allocation3 + $0x50] sm:$0xff]  ;;  %v7392_v36 = vld [vmem:[#allocation3 + $0x58] sm:$0x3]  ;;  %v2335_v34 = vrot.slane %v7383_v2, 1  ;;  %2189 = vst.msk [vmem:[#allocation3 + $0x81] sm:$0xff] %vm283_vm0, %v2156_v24  ;;  %v2088_v43 = vmul.f32 %v7234_v46, %v1991_v1  ;;  %v1994_v21 = vadd.f32 %v1993_v6, %v7208_v62  ;;  %v2337_v24 = vrot.slane %v7385_v9, 1 }
 0x244   : > { %v4353_v49 = vpop.f32.mrb[48].mxu1  ;;  %v5034_v47 = vpack.i.bf16 %v7390_v22, %v7370_v3  ;;  %v2330_v51 = vrot.slane %v7390_v22, 1  ;;  %v2129_v41 = vadd.f32 %v7243_v28, %v2090_v57  ;;  %v2091_v30 = vmul.f32 %v7234_v46, %v2002_v35  ;;  %v5325_v62 = vld [vmem:[%s8689_s4 + $0xe0] sm:$0xff]   ;;  %4516 = vmatpush3.bf16.msra.mxu0 %v5324_v15 }
 0x245   : > { %v4354_v32 = vpop.f32.mrb[49].mxu1  ;;  %v2332_v56 = vrot.slane %v7392_v36, 1  ;;  %v7410_v26 = vsel %vm528_vm2, %v2334_v59, %v2335_v34  ;;  %v2127_v44 = vadd.f32 %v7243_v28, %v2088_v43  ;;  %v2089_v8 = vmul.f32 %v7234_v46, %v1994_v21  ;;  %4517 = vmatprep.subr.bf16.mxu0 %v5325_v62 }
 0x246   : > { %9015 = vst [vmem:[#allocation60_spill] sm:$0xff] %v7410_v26  ;;  %v7417_v45 = vadd.f32 %v4354_v32, %v4353_v49  ;;  %5040 = vrot.lane.b32.xlu1 %v5039_v53, %s5451_s9  ;;  %v4356_v38 = vpop.f32.mrb[50].mxu1  ;;  %5035 = vrot.lane.b32.xlu0 %v5034_v47, %s5451_s9  ;;  %v2161_v1 = vmax.f32 %v2129_v41, 0.0  ;;  %v2130_v59 = vadd.f32 %v7243_v28, %v2091_v30  ;;  %v5326_v53 = vld [vmem:[%s8689_s4 + $0xa0] sm:$0xff]  }
 0x247   : > { %v4357_v25 = vpop.f32.mrb[51].mxu1  ;;  %v7424_v57 = vsel %vm528_vm2, %v2329_v40, %v2330_v51  ;;  %v7427_v35 = vsel %vm528_vm2, %v2330_v51, %v2332_v56  ;;  %v2159_v6 = vmax.f32 %v2127_v44, 0.0  ;;  %v2128_v43 = vadd.f32 %v7243_v28, %v2089_v8  ;;  %v4667_v49 = vpop.f32.mrb[80].mxu0  ;;  %v5327_v56 = vld [vmem:[%s8689_s4 + $0xe8] sm:$0xff]  }
 0x248   : > { %v7433_v21 = vadd.f32 %v4357_v25, %v4356_v38  ;;  %v5049_v47 = vpack.i.bf16 %v7427_v35, %v7424_v57  ;;  %2194 = vst.msk [vmem:[#allocation3 + $0xc1] sm:$0xff] %vm283_vm0, %v2161_v1  ;;  %v2162_v40 = vmax.f32 %v2130_v59, 0.0  ;;  %v2015_v51 = vadd.f32 %v4667_v49, %v7260_v39  ;;  %v2006_v15 = vpop.f32.mrb[81].mxu0  ;;  %v7442_v30 = vld [vmem:[#allocation3 + $0x78] sm:$0xff]  ;;  %4518 = vmatpush3.bf16.msra.mxu0 %v5326_v53 }
 0x249   : > { %v7440_v41 = vsel %vm528_vm2, %v2335_v34, %v2337_v24  ;;  %v1870_v32 = vadd.f32 %v7341_v31, %v7166_v11  ;;  %2192 = vst.msk [vmem:[#allocation3 + $0xa9] sm:$0xff] %vm283_vm0, %v2159_v6  ;;  %v2160_v62 = vmax.f32 %v2128_v43, 0.0  ;;  %v2007_v44 = vadd.f32 %v2006_v15, %v7237_v14  ;;  %v4668_v39 = vpop.f32.mrb[82].mxu0  ;;  %v7456_v11 = vld [vmem:[#allocation3 + $0x90] sm:$0xff]  ;;  %v7458_v31 = vld [vmem:[#allocation3 + $0x98] sm:$0xff]  ;;  %4519 = vmatprep.subr.bf16.mxu0 %v5327_v56 }
 0x24a   : > { %9016 = vst [vmem:[#allocation28_spill] sm:$0xff] %v7440_v41  ;;  %5050 = vrot.lane.b32.xlu1 %v5049_v47, %s5451_s9  ;;  %5045 = vrot.lane.b32.xlu0 %v5044_v27, %s5451_s9  ;;  %v5059_v34 = vpack.i.bf16 %v7440_v41, %v7410_v26  ;;  %v2339_v8 = vrot.slane %v7442_v30, 1  ;;  %2195 = vst.msk [vmem:[#allocation3 + $0xc9] sm:$0xff] %vm283_vm0, %v2162_v40  ;;  %v2094_v38 = vmul.f32 %v7234_v46, %v2015_v51  ;;  %v2009_v24 = vpop.f32.mrb[83].mxu0  ;;  %v7463_v1 = vld [vmem:[#allocation3 + $0x80] sm:$0xff]  ;;  %v5328_v6 = vld [vmem:[%s8689_s4 + $0xa8] sm:$0xff]  }
 0x24b   : > { %v2018_v14 = vadd.f32 %v4668_v39, %v7273_v60  ;;  %v7465_v59 = vld [vmem:[#allocation3 + $0x88] sm:$0x3]  ;;  %v1873_v27 = vadd.f32 %v7359_v54, %v7171_v0  ;;  %v5064_v25 = vpack.i.bf16 %v7458_v31, %v7456_v11  ;;  %2193 = vst.msk [vmem:[#allocation3 + $0xb1] sm:$0xff] %vm283_vm0, %v2160_v62  ;;  %v2092_v60 = vmul.f32 %v7234_v46, %v2007_v44  ;;  %v7488_v56 = vld [vmem:[#allocation3 + $0xa0] sm:$0x3] }
 0x24c   : > { %v2010_v43 = vadd.f32 %v2009_v24, %v7247_v7  ;;  %v4359_v49 = vpop.f32.mrb[52].mxu1  ;;  %v5054_v47 = vpack.i.bf16 %v7463_v1, %v7442_v30  ;;  %v2340_v0 = vrot.slane %v7463_v1, 1  ;;  %v2133_v54 = vadd.f32 %v7243_v28, %v2094_v38  ;;  %4520 = vmatpush3.bf16.msra.mxu0 %v5328_v6 }
 0x24d   : > { %v2095_v53 = vmul.f32 %v7234_v46, %v2018_v14  ;;  %v4360_v40 = vpop.f32.mrb[53].mxu1  ;;  %v2342_v51 = vrot.slane %v7465_v59, 1  ;;  %v2344_v15 = vrot.slane %v7456_v11, 1  ;;  %v2131_v62 = vadd.f32 %v7243_v28, %v2092_v60  ;;  %v5329_v14 = vld [vmem:[%s8689_s4 + $0xf0] sm:$0xff]  }
 0x24e   : > { %v2093_v7 = vmul.f32 %v7234_v46, %v2010_v43  ;;  %v4361_v44 = vadd.f32 %v4360_v40, %v4359_v49  ;;  %5060 = vrot.lane.b32.xlu1 %v5059_v34, %s5451_s9  ;;  %v4362_v39 = vpop.f32.mrb[54].mxu1  ;;  %5055 = vrot.lane.b32.xlu0 %v5054_v47, %s5451_s9  ;;  %v2345_v38 = vrot.slane %v7458_v31, 1  ;;  %v2165_v24 = vmax.f32 %v2133_v54, 0.0  ;;  %v5330_v49 = vld [vmem:[%s8689_s4 + $0xb0] sm:$0xff]  }
 0x24f   : > { %v2134_v37 = vadd.f32 %v7243_v28, %v2095_v53  ;;  %v4363_v60 = vpop.f32.mrb[55].mxu1  ;;  %v7496_v43 = vsel %vm528_vm2, %v2339_v8, %v2340_v0  ;;  %v7499_v34 = vsel %vm528_vm2, %v2340_v0, %v2342_v51  ;;  %v2163_v47 = vmax.f32 %v2131_v62, 0.0  ;;  %v4671_v54 = vpop.f32.mrb[84].mxu0  ;;  %4521 = vmatprep.subr.bf16.mxu0 %v5329_v14 }
 0x250   : > { %9017 = vst [vmem:[#allocation29_spill] sm:$0xff] %v7496_v43  ;;  %9018 = vst [vmem:[#allocation30_spill] sm:$0xff] %v7499_v34  ;;  %v2132_v40 = vadd.f32 %v7243_v28, %v2093_v7  ;;  %v7505_v41 = vadd.f32 %v4363_v60, %v4362_v39  ;;  %v5069_v53 = vpack.i.bf16 %v7499_v34, %v7496_v43  ;;  %v2022_v51 = vpop.f32.mrb[85].mxu0  ;;  %v2347_v26 = vrot.slane %v7488_v56, 1  ;;  %v7514_v62 = vld [vmem:[#allocation3 + $0xa8] sm:$0xff] }
 0x251   : > { %2198 = vst.msk [vmem:[#allocation3 + $0xf1] sm:$0xff] %vm283_vm0, %v2165_v24  ;;  %v2166_v8 = vmax.f32 %v2134_v37, 0.0  ;;  %v2031_v0 = vadd.f32 %v4671_v54, %v1870_v32  ;;  %v7511_v6 = vsel %vm528_vm2, %v2344_v15, %v2345_v38  ;;  %2196 = vst.msk [vmem:[#allocation3 + $0xd9] sm:$0xff] %vm283_vm0, %v2163_v47  ;;  %v2023_v39 = vadd.f32 %v2022_v51, %v7293_v13  ;;  %v4672_v14 = vpop.f32.mrb[86].mxu0 }
 0x252   : > { %9019 = vst [vmem:[#allocation31_spill] sm:$0xff] %v7511_v6  ;;  %v2164_v7 = vmax.f32 %v2132_v40, 0.0  ;;  %5070 = vrot.lane.b32.xlu1 %v5069_v53, %s5451_s9  ;;  %5065 = vrot.lane.b32.xlu0 %v5064_v25, %s5451_s9  ;;  %v1886_v37 = vadd.f32 %v4361_v44, %v7192_v20  ;;  %v1878_v32 = vadd.f32 %v7417_v45, %v7179_v18  ;;  %v2025_v60 = vpop.f32.mrb[87].mxu0  ;;  %v7528_v13 = vld [vmem:[#allocation3 + $0xb0] sm:$0xff]  ;;  %v7530_v40 = vld [vmem:[#allocation3 + $0xb8] sm:$0x3] }
 0x253   : > { %2199 = vst.msk [vmem:[#allocation3 + $0xf9] sm:$0xff] %vm283_vm0, %v2166_v8  ;;  %v2098_v15 = vmul.f32 %v7234_v46, %v2031_v0  ;;  %v2034_v24 = vadd.f32 %v4672_v14, %v1873_v27  ;;  %v7526_v47 = vsel %vm528_vm2, %v2345_v38, %v2347_v26  ;;  %v2349_v25 = vrot.slane %v7514_v62, 1  ;;  %4522 = vmatpush3.bf16.msra.mxu0 %v5330_v49  ;;  %v5331_v14 = vld [vmem:[%s8689_s4 + $0xf8] sm:$0xff]  }
 0x254   : > { %9020 = vst [vmem:[#allocation32_spill] sm:$0xff] %v7526_v47  ;;  %2197 = vst.msk [vmem:[#allocation3 + $0xe1] sm:$0xff] %vm283_vm0, %v2164_v7  ;;  %v2096_v18 = vmul.f32 %v7234_v46, %v2023_v39  ;;  %v2026_v20 = vadd.f32 %v2025_v60, %v7307_v52  ;;  %v4365_v45 = vpop.f32.mrb[56].mxu1  ;;  %v5079_v27 = vpack.i.bf16 %v7526_v47, %v7511_v6  ;;  %v2350_v49 = vrot.slane %v7528_v13, 1  ;;  %v7548_v7 = vld [vmem:[#allocation3 + $0xc8] sm:$0xff]  ;;  %v7569_v6 = vld [vmem:[#allocation3 + $0xc0] sm:$0xff] }
 0x255   : > { %v5074_v26 = vpack.i.bf16 %v7528_v13, %v7514_v62  ;;  %v2137_v44 = vadd.f32 %v7243_v28, %v2098_v15  ;;  %v2099_v38 = vmul.f32 %v7234_v46, %v2034_v24  ;;  %v4366_v54 = vpop.f32.mrb[57].mxu1  ;;  %v2352_v53 = vrot.slane %v7530_v40, 1  ;;  %9021 = vst [vmem:[#allocation33_spill] sm:$0xff] %v7548_v7  ;;  %v5332_v15 = vld [vmem:[%s8689_s4 + $0xb8] sm:$0xff]   ;;  %9024 = vst [vmem:[#allocation47_spill] sm:$0xff] %v7569_v6 }
 0x256   : > { %v2135_v8 = vadd.f32 %v7243_v28, %v2096_v18  ;;  %v2097_v52 = vmul.f32 %v7234_v46, %v2026_v20  ;;  %v4367_v0 = vadd.f32 %v4366_v54, %v4365_v45  ;;  %5080 = vrot.lane.b32.xlu1 %v5079_v27, %s5451_s9  ;;  %v4368_v51 = vpop.f32.mrb[58].mxu1  ;;  %v2495_v39 = vrot.slane %v7297_v58, 2  ;;  %4523 = vmatprep.subr.bf16.mxu0 %v5331_v14 }
 0x257   : > { %5075 = vrot.lane.b32.xlu0 %v5074_v26, %s5451_s9  ;;  %v2169_v24 = vmax.f32 %v2137_v44, 0.0  ;;  %v2138_v60 = vadd.f32 %v7243_v28, %v2099_v38  ;;  %v4369_v18 = vpop.f32.mrb[59].mxu1  ;;  %v7559_v20 = vsel %vm528_vm2, %v2349_v25, %v2350_v49  ;;  %v7562_v45 = vsel %vm528_vm2, %v2350_v49, %v2352_v53  ;;  %v4675_v54 = vpop.f32.mrb[88].mxu0  ;;  %4524 = vmatpush3.bf16.msra.mxu0 %v5332_v15 }
 0x258   : > { %9022 = vst [vmem:[#allocation38_spill] sm:$0xff] %v7559_v20  ;;  %9023 = vst [vmem:[#allocation39_spill] sm:$0xff] %v7562_v45  ;;  %v2167_v27 = vmax.f32 %v2135_v8, 0.0  ;;  %v2136_v58 = vadd.f32 %v7243_v28, %v2097_v52  ;;  %v7565_v26 = vadd.f32 %v4369_v18, %v4368_v51  ;;  %v5089_v47 = vpack.i.bf16 %v7562_v45, %v7559_v20  ;;  %v2038_v38 = vpop.f32.mrb[89].mxu0 }
 0x259   : > { %2202 = vst.msk [vmem:[#allocation3 + $0x121] sm:$0xff] %vm283_vm0, %v2169_v24  ;;  %v2170_v44 = vmax.f32 %v2138_v60, 0.0  ;;  %v2047_v25 = vadd.f32 %v4675_v54, %v1886_v37  ;;  %v1889_v49 = vadd.f32 %v7505_v41, %v7197_v29  ;;  %v5084_v53 = vpack.i.bf16 %v7548_v7, %v7569_v6  ;;  %v4676_v51 = vpop.f32.mrb[90].mxu0  ;;  %v7585_v60 = vld [vmem:[#allocation3 + $0xd8] sm:$0xff] }
 0x25a   : > { %2200 = vst.msk [vmem:[#allocation3 + $0x109] sm:$0xff] %vm283_vm0, %v2167_v27  ;;  %v2168_v8 = vmax.f32 %v2136_v58, 0.0  ;;  %v2039_v52 = vadd.f32 %v2038_v38, %v1878_v32  ;;  %5090 = vrot.lane.b32.xlu1 %v5089_v47, %s5451_s9  ;;  %v1881_v14 = vadd.f32 %v7433_v21, %v7184_v17  ;;  %v2496_v37 = vrot.slane %v7312_v50, 2  ;;  %v2041_v15 = vpop.f32.mrb[91].mxu0  ;;  %9025 = vst [vmem:[#allocation48_spill] sm:$0xff] %v7585_v60 }
 0x25b   : > { %2203 = vst.msk [vmem:[#allocation3 + $0x129] sm:$0xff] %vm283_vm0, %v2170_v44  ;;  %v2102_v29 = vmul.f32 %v7234_v46, %v2047_v25  ;;  %v2050_v41 = vadd.f32 %v4676_v51, %v1889_v49  ;;  %5085 = vrot.lane.b32.xlu0 %v5084_v53, %s5451_s9  ;;  %v2498_v24 = vrot.slane %v7314_v19, 2  ;;  %v7587_v32 = vld [vmem:[#allocation3 + $0xe0] sm:$0xff]  ;;  %v1894_v47 = vadd.f32 %v4367_v0, %v7205_v4  ;;  %v7597_v58 = vld [vmem:[#allocation3 + $0xd0] sm:$0x3] }
 0x25c   : > { %9026 = vst [vmem:[#allocation49_spill] sm:$0xff] %v7587_v32  ;;  %2201 = vst.msk [vmem:[#allocation3 + $0x111] sm:$0xff] %vm283_vm0, %v2168_v8  ;;  %v2100_v17 = vmul.f32 %v7234_v46, %v2039_v52  ;;  %v2042_v50 = vadd.f32 %v2041_v15, %v1881_v14  ;;  %v4371_v21 = vpop.f32.mrb[60].mxu1  ;;  %v7593_v18 = vsel %vm705_vm3, %v2495_v39, %v2496_v37  ;;  %v2354_v0 = vrot.slane %v7569_v6, 1 }
 0x25d   : > { %v5099_v27 = vpack.i.bf16 %v7587_v32, %v7585_v60  ;;  %v2141_v19 = vadd.f32 %v7243_v28, %v2102_v29  ;;  %v2103_v54 = vmul.f32 %v7234_v46, %v2050_v41  ;;  %v4372_v44 = vpop.f32.mrb[61].mxu1  ;;  %v7602_v4 = vsel %vm705_vm3, %v2496_v37, %v2498_v24 }
 0x25e   : > { %v2139_v25 = vadd.f32 %v7243_v28, %v2100_v17  ;;  %v2101_v39 = vmul.f32 %v7234_v46, %v2042_v50  ;;  %v4373_v38 = vadd.f32 %v4372_v44, %v4371_v21  ;;  %v4374_v49 = vpop.f32.mrb[62].mxu1  ;;  %v5094_v53 = vpack.i.bf16 %v7602_v4, %v7593_v18  ;;  %v7624_v44 = vld [vmem:[#allocation3 + $0xf8] sm:$0xff] }
 0x25f   : > { %5100 = vrot.lane.b32.xlu1 %v5099_v27, %s5451_s9  ;;  %v2173_v8 = vmax.f32 %v2141_v19, 0.0  ;;  %v2142_v52 = vadd.f32 %v7243_v28, %v2103_v54  ;;  %v4375_v51 = vpop.f32.mrb[63].mxu1  ;;  %v2355_v14 = vrot.slane %v7548_v7, 1  ;;  %v2357_v37 = vrot.slane %v7597_v58, 1  ;;  %v4679_v17 = vpop.f32.mrb[92].mxu0  ;;  %9029 = vst [vmem:[#allocation52_spill] sm:$0xff] %v7624_v44 }
 0x260   : > { %v2171_v29 = vmax.f32 %v2139_v25, 0.0  ;;  %v2140_v41 = vadd.f32 %v7243_v28, %v2101_v39  ;;  %5095 = vrot.lane.b32.xlu0 %v5094_v53, %s5451_s9  ;;  %v4376_v15 = vadd.f32 %v4375_v51, %v4374_v49  ;;  %v1902_v24 = vadd.f32 %v4373_v38, %v7218_v33  ;;  %v2054_v21 = vpop.f32.mrb[93].mxu0 }
 0x261   : > { %2206 = vst.msk [vmem:[#allocation3 + $0x151] sm:$0xff] %vm283_vm0, %v2173_v8  ;;  %v2174_v50 = vmax.f32 %v2142_v52, 0.0  ;;  %v7618_v27 = vsel %vm528_vm2, %v2354_v0, %v2355_v14  ;;  %v7621_v19 = vsel %vm528_vm2, %v2355_v14, %v2357_v37  ;;  %v2501_v54 = vrot.slane %v7304_v23, 2  ;;  %v4680_v49 = vpop.f32.mrb[94].mxu0 }
 0x262   : > { %9027 = vst [vmem:[#allocation50_spill] sm:$0xff] %v7618_v27  ;;  %9028 = vst [vmem:[#allocation51_spill] sm:$0xff] %v7621_v19  ;;  %v2172_v25 = vmax.f32 %v2140_v41, 0.0  ;;  %v2063_v39 = vadd.f32 %v4679_v17, %v1902_v24  ;;  %v2055_v33 = vadd.f32 %v2054_v21, %v1894_v47  ;;  %v1905_v38 = vadd.f32 %v4376_v15, %v7223_v5  ;;  %v2057_v51 = vpop.f32.mrb[95].mxu0  ;;  %v7639_v47 = vld [vmem:[#allocation3 + $0xf0] sm:$0xff] }
 0x263   : > { %2204 = vst.msk [vmem:[#allocation3 + $0x139] sm:$0xff] %vm283_vm0, %v2171_v29  ;;  %2207 = vst.msk [vmem:[#allocation3 + $0x159] sm:$0xff] %vm283_vm0, %v2174_v50  ;;  %v5104_v0 = vpack.i.bf16 %v7621_v19, %v7618_v27  ;;  %v9030_v53 = vrot.slane %v7290_v16, 2  ;;  %v2503_v23 = vrot.slane %v7328_v42, 2  ;;  %v1897_v52 = vadd.f32 %v7565_v26, %v7210_v48  ;;  %v7646_v29 = vld [vmem:[#allocation3 + $0xe8] sm:$0x3] }
 0x264   : > { %2205 = vst.msk [vmem:[#allocation3 + $0x141] sm:$0xff] %vm283_vm0, %v2172_v25  ;;  %v2106_v5 = vmul.f32 %v7234_v46, %v2063_v39  ;;  %v2104_v14 = vmul.f32 %v7234_v46, %v2055_v33  ;;  %v2066_v37 = vadd.f32 %v4680_v49, %v1905_v38  ;;  %v5114_v16 = vpack.i.bf16 %v7624_v44, %v7639_v47 }
 0x265   : > { %v7634_v8 = vsel %vm705_vm3, %v9030_v53, %v2501_v54  ;;  %5105 = vrot.lane.b32.xlu0 %v5104_v0, %s5451_s9  ;;  %v7650_v42 = vsel %vm705_vm3, %v2501_v54, %v2503_v23  ;;  %v2058_v48 = vadd.f32 %v2057_v51, %v1897_v52  ;;  %v2359_v26 = vrot.slane %v7585_v60, 1  ;;  %v7668_v53 = vld [vmem:[#allocation3 + $0x100] sm:$0x3] }
 0x266   : > { %v2360_v41 = vrot.slane %v7587_v32, 1  ;;  %v2145_v15 = vadd.f32 %v7243_v28, %v2106_v5  ;;  %v2143_v24 = vadd.f32 %v7243_v28, %v2104_v14  ;;  %v2107_v17 = vmul.f32 %v7234_v46, %v2066_v37  ;;  %v7687_v37 = vld [vmem:[#allocation3 + $0x110] sm:$0xff] }
 0x267   : > { %v5109_v50 = vpack.i.bf16 %v7650_v42, %v7634_v8  ;;  %v2105_v21 = vmul.f32 %v7234_v46, %v2058_v48  ;;  %v2362_v54 = vrot.slane %v7646_v29, 1  ;;  %v2505_v39 = vrot.slane %v7370_v3, 2 }
 0x268   : > { %v7661_v25 = vsel %vm528_vm2, %v2359_v26, %v2360_v41  ;;  %v2177_v33 = vmax.f32 %v2145_v15, 0.0  ;;  %v2175_v38 = vmax.f32 %v2143_v24, 0.0  ;;  %v2146_v49 = vadd.f32 %v7243_v28, %v2107_v17  ;;  %v7699_v15 = vld [vmem:[#allocation3 + $0x108] sm:$0xff] }
 0x269   : > { %9031 = vst [vmem:[#allocation53_spill] sm:$0xff] %v7661_v25  ;;  %5110 = vrot.lane.b32.xlu1 %v5109_v50, %s5451_s9  ;;  %v2506_v0 = vrot.slane %v7390_v22, 2  ;;  %v2144_v23 = vadd.f32 %v7243_v28, %v2105_v21  ;;  %5115 = vrot.lane.b32.xlu0 %v5114_v16, %s5451_s9  ;;  %v7673_v46 = vsel %vm528_vm2, %v2360_v41, %v2362_v54  ;;  %v2508_v52 = vrot.slane %v7392_v36, 2  ;;  %v7696_v41 = vld [vmem:[#allocation3 + $0x118] sm:$0x3] }
 0x26a   : > { %9032 = vst [vmem:[#allocation54_spill] sm:$0xff] %v7673_v46  ;;  %2210 = vst.msk [vmem:[#allocation3 + $0x181] sm:$0xff] %vm283_vm0, %v2177_v33  ;;  %v2178_v3 = vmax.f32 %v2146_v49, 0.0  ;;  %v5119_v51 = vpack.i.bf16 %v7673_v46, %v7661_v25  ;;  %v2364_v28 = vrot.slane %v7639_v47, 1  ;;  %v2365_v36 = vrot.slane %v7624_v44, 1 }
 0x26b   : > { %2208 = vst.msk [vmem:[#allocation3 + $0x169] sm:$0xff] %vm283_vm0, %v2175_v38  ;;  %v7681_v22 = vsel %vm705_vm3, %v2505_v39, %v2506_v0  ;;  %v2176_v5 = vmax.f32 %v2144_v23, 0.0  ;;  %v7685_v14 = vsel %vm705_vm3, %v2506_v0, %v2508_v52  ;;  %v2367_v16 = vrot.slane %v7668_v53, 1 }
 0x26c   : > { %2211 = vst.msk [vmem:[#allocation3 + $0x189] sm:$0xff] %vm283_vm0, %v2178_v3  ;;  %v5124_v48 = vpack.i.bf16 %v7685_v14, %v7681_v22  ;;  %v2511_v26 = vrot.slane %v7383_v2, 2  ;;  %v7702_v24 = vsel %vm528_vm2, %v2364_v28, %v2365_v36  ;;  %v2510_v50 = vrot.slane %v7363_v10, 2  ;;  %v7731_v3 = vld [vmem:[#allocation3 + $0x130] sm:$0x3] }
 0x26d   : > { %5120 = vrot.lane.b32.xlu1 %v5119_v51, %s5451_s9  ;;  %2209 = vst.msk [vmem:[#allocation3 + $0x171] sm:$0xff] %vm283_vm0, %v2176_v5  ;;  %9033 = vst [vmem:[#allocation56_spill] sm:$0xff] %v7702_v24  ;;  %v7705_v17 = vsel %vm528_vm2, %v2365_v36, %v2367_v16  ;;  %v2513_v21 = vrot.slane %v7385_v9, 2  ;;  %v5129_v2 = vpack.i.bf16 %v7687_v37, %v7699_v15  ;;  %v2370_v33 = vrot.slane %v7687_v37, 1  ;;  %v7723_v9 = vld [vmem:[#allocation3 + $0x128] sm:$0xff]  ;;  %v7733_v51 = vld [vmem:[#allocation3 + $0x120] sm:$0xff] }
 0x26e   : > { %9034 = vst [vmem:[#allocation57_spill] sm:$0xff] %v7705_v17  ;;  %5125 = vrot.lane.b32.xlu0 %v5124_v48, %s5451_s9  ;;  %v7713_v54 = vsel %vm705_vm3, %v2510_v50, %v2511_v26  ;;  %v2372_v38 = vrot.slane %v7696_v41, 1  ;;  %v5134_v10 = vpack.i.bf16 %v7705_v17, %v7702_v24  ;;  %9036 = vst [vmem:[#allocation59_spill] sm:$0xff] %v7723_v9  ;;  %v2369_v49 = vrot.slane %v7699_v15, 1 }
 0x26f   : > { %v7716_v39 = vsel %vm705_vm3, %v2511_v26, %v2513_v21  ;;  %v2516_v0 = vrot.slane %v7463_v1, 2  ;;  %v2518_v23 = vrot.slane %v7465_v59, 2  ;;  %v2515_v36 = vrot.slane %v7442_v30, 2  ;;  %v7756_v21 = vld [vmem:[#allocation3 + $0x140] sm:$0xff] }
 0x270   : > { %9035 = vst [vmem:[#allocation58_spill] sm:$0xff] %v7716_v39  ;;  %v5139_v52 = vpack.i.bf16 %v7716_v39, %v7713_v54  ;;  %v7736_v28 = vsel %vm528_vm2, %v2369_v49, %v2370_v33  ;;  %v7739_v5 = vsel %vm528_vm2, %v2370_v33, %v2372_v38  ;;  %v5144_v59 = vpack.i.bf16 %v7723_v9, %v7733_v51  ;;  %v7764_v49 = vld [vmem:[#allocation3 + $0x148] sm:$0x3] }
 0x271   : > { %5130 = vrot.lane.b32.xlu1 %v5129_v2, %s5451_s9  ;;  %9037 = vst [vmem:[#allocation61_spill] sm:$0xff] %v7736_v28  ;;  %9038 = vst [vmem:[#allocation62_spill] sm:$0xff] %v7739_v5  ;;  %v7746_v16 = vsel %vm705_vm3, %v2515_v36, %v2516_v0  ;;  %v7749_v48 = vsel %vm705_vm3, %v2516_v0, %v2518_v23  ;;  %v2375_v26 = vrot.slane %v7723_v9, 1  ;;  %v2377_v50 = vrot.slane %v7731_v3, 1  ;;  %v7766_v0 = vld [vmem:[#allocation3 + $0x138] sm:$0xff]  ;;  %v7855_v45 = vld [vmem:[#allocation3 + $0x180] sm:$0xff] }
 0x272   : > { %5135 = vrot.lane.b32.xlu0 %v5134_v10, %s5451_s9  ;;  %v5149_v30 = vpack.i.bf16 %v7739_v5, %v7736_v28  ;;  %9039 = vst [vmem:[#allocation74_spill] sm:$0xff] %v7756_v21  ;;  %v2374_v2 = vrot.slane %v7733_v51, 1  ;;  %v2521_v33 = vrot.slane %v7458_v31, 2  ;;  %v2523_v38 = vrot.slane %v7488_v56, 2  ;;  %9040 = vst [vmem:[#allocation63_spill] sm:$0xff] %v7766_v0  ;;  %v7799_v5 = vld [vmem:[#allocation3 + $0x150] sm:$0xff] }
 0x273   : > { %v5154_v10 = vpack.i.bf16 %v7749_v48, %v7746_v16  ;;  %v2520_v36 = vrot.slane %v7456_v11, 2  ;;  %v5159_v31 = vpack.i.bf16 %v7756_v21, %v7766_v0  ;;  %9044 = vst [vmem:[#allocation65_spill] sm:$0xff] %v7799_v5  ;;  %v2531_v24 = vrot.slane %v7548_v7, 2  ;;  %v7827_v46 = vld [vmem:[#allocation3 + $0x188] sm:$0xff]  ;;  %9052 = vst [vmem:[#allocation77_spill] sm:$0xff] %v7855_v45 }
 0x274   : > { %v7769_v23 = vsel %vm528_vm2, %v2374_v2, %v2375_v26  ;;  %v2382_v2 = vrot.slane %v7764_v49, 1  ;;  %9048 = vst [vmem:[#allocation70_spill] sm:$0xff] %v7827_v46  ;;  %v2530_v25 = vrot.slane %v7569_v6, 2  ;;  %v2739_v19 = vrot.slane %v7827_v46, 2 }
 0x275   : > { %5140 = vrot.lane.b32.xlu1 %v5139_v52, %s5451_s9  ;;  %9041 = vst [vmem:[#allocation64_spill] sm:$0xff] %v7769_v23  ;;  %v7772_v52 = vsel %vm528_vm2, %v2375_v26, %v2377_v50  ;;  %v7779_v56 = vsel %vm705_vm3, %v2520_v36, %v2521_v33  ;;  %v7789_v26 = vld [vmem:[#allocation3 + $0x158] sm:$0xff]  ;;  %v2379_v50 = vrot.slane %v7766_v0, 1  ;;  %v2528_v36 = vrot.slane %v7530_v40, 2 }
 0x276   : > { %5145 = vrot.lane.b32.xlu0 %v5144_v59, %s5451_s9  ;;  %9042 = vst [vmem:[#allocation75_spill] sm:$0xff] %v7772_v52  ;;  %v7782_v59 = vsel %vm705_vm3, %v2521_v33, %v2523_v38  ;;  %v5164_v11 = vpack.i.bf16 %v7772_v52, %v7769_v23  ;;  %9043 = vst [vmem:[#allocation76_spill] sm:$0xff] %v7789_v26  ;;  %v7797_v38 = vld [vmem:[#allocation3 + $0x160] sm:$0x3]  ;;  %v2525_v23 = vrot.slane %v7514_v62, 2  ;;  %v2385_v17 = vrot.slane %v7789_v26, 1 }
 0x277   : > { %v5169_v33 = vpack.i.bf16 %v7782_v59, %v7779_v56  ;;  %v5174_v40 = vpack.i.bf16 %v7789_v26, %v7799_v5  ;;  %v7850_v27 = vsel %vm705_vm3, %v2530_v25, %v2531_v24  ;;  %v2536_v20 = vrot.slane %v7587_v32, 2 }
 0x278   : > { %v2538_v34 = vrot.slane %v7646_v29, 2  ;;  %v2543_v43 = vrot.slane %v7668_v53, 2  ;;  %v2738_v7 = vrot.slane %v7855_v45, 2  ;;  %v5204_v29 = vpack.i.bf16 %v7827_v46, %v7855_v45 }
 0x279   : > { %5150 = vrot.lane.b32.xlu1 %v5149_v30, %s5451_s9  ;;  %v2380_v30 = vrot.slane %v7756_v21, 1  ;;  %v2540_v53 = vrot.slane %v7639_v47, 2 }
 0x27a   : > { %5155 = vrot.lane.b32.xlu0 %v5154_v10, %s5451_s9  ;;  %v2526_v10 = vrot.slane %v7528_v13, 2 }
 0x27b   : > { %v7805_v52 = vsel %vm528_vm2, %v2380_v30, %v2382_v2  ;;  %v7822_v2 = vld [vmem:[#allocation3 + $0x170] sm:$0xff] }
 0x27c   : > { %9046 = vst [vmem:[#allocation68_spill] sm:$0xff] %v7805_v52  ;;  %v7815_v28 = vsel %vm705_vm3, %v2526_v10, %v2528_v36  ;;  %9047 = vst [vmem:[#allocation69_spill] sm:$0xff] %v7822_v2  ;;  %v7832_v36 = vld [vmem:[#allocation3 + $0x178] sm:$0x3] }
 0x27d   : > { %5160 = vrot.lane.b32.xlu1 %v5159_v31, %s5451_s9  ;;  %v7802_v31 = vsel %vm528_vm2, %v2379_v50, %v2380_v30  ;;  %v2387_v50 = vrot.slane %v7797_v38, 1 }
 0x27e   : > { %5165 = vrot.lane.b32.xlu0 %v5164_v11, %s5451_s9  ;;  %9045 = vst [vmem:[#allocation66_spill] sm:$0xff] %v7802_v31  ;;  %v7812_v11 = vsel %vm705_vm3, %v2525_v23, %v2526_v10  ;;  %v5179_v30 = vpack.i.bf16 %v7805_v52, %v7802_v31  ;;  %v2533_v23 = vrot.slane %v7597_v58, 2  ;;  %v7843_v58 = vld [vmem:[#allocation3 + $0x190] sm:$0x3] }
 0x27f   : > { %v5184_v10 = vpack.i.bf16 %v7815_v28, %v7812_v11  ;;  %v7840_v31 = vsel %vm528_vm2, %v2385_v17, %v2387_v50  ;;  %v2392_v50 = vrot.slane %v7832_v36, 1  ;;  %v2741_v25 = vrot.slane %v7843_v58, 2 }
 0x280   : > { %9051 = vst [vmem:[#allocation55_spill] sm:$0xff] %v7840_v31 }
 0x281   : > { %5170 = vrot.lane.b32.xlu1 %v5169_v33, %s5451_s9  ;;  %v2384_v33 = vrot.slane %v7799_v5, 1  ;;  %v7893_v6 = vsel %vm705_vm3, %v2739_v19, %v2741_v25 }
 0x282   : > { %5175 = vrot.lane.b32.xlu0 %v5174_v40, %s5451_s9  ;;  %v7834_v40 = vld [vmem:[#allocation3 + $0x168] sm:$0xff]  ;;  %9056 = vst [vmem:[#allocation72_spill] sm:$0xff] %v7893_v6 }
 0x283   : > { %9049 = vst [vmem:[#allocation71_spill] sm:$0xff] %v7834_v40  ;;  %v7837_v52 = vsel %vm528_vm2, %v2384_v33, %v2385_v17  ;;  %v7853_v33 = vsel %vm705_vm3, %v2531_v24, %v2533_v23  ;;  %v2390_v17 = vrot.slane %v7822_v2, 1  ;;  %v2389_v24 = vrot.slane %v7834_v40, 1 }
 0x284   : > { %9050 = vst [vmem:[#allocation67_spill] sm:$0xff] %v7837_v52  ;;  %v2541_v23 = vrot.slane %v7624_v44, 2  ;;  %v7887_v44 = vsel %vm705_vm3, %v2536_v20, %v2538_v34 }
 0x285   : > { %5180 = vrot.lane.b32.xlu1 %v5179_v30, %s5451_s9  ;;  %v5189_v30 = vpack.i.bf16 %v7822_v2, %v7834_v40  ;;  %v7879_v32 = vsel %vm528_vm2, %v2390_v17, %v2392_v50  ;;  %v2546_v50 = vrot.slane %v7687_v37, 2 }
 0x286   : > { %5185 = vrot.lane.b32.xlu0 %v5184_v10, %s5451_s9  ;;  %v5194_v10 = vpack.i.bf16 %v7840_v31, %v7837_v52  ;;  %v2535_v31 = vrot.slane %v7585_v60, 2  ;;  %v7876_v52 = vsel %vm528_vm2, %v2389_v24, %v2390_v17  ;;  %9054 = vst [vmem:[#allocation79_spill] sm:$0xff] %v7879_v32  ;;  %v7890_v60 = vsel %vm705_vm3, %v2738_v7, %v2739_v19 }
 0x287   : > { %9053 = vst [vmem:[#allocation78_spill] sm:$0xff] %v7876_v52  ;;  %9055 = vst [vmem:[#allocation73_spill] sm:$0xff] %v7890_v60  ;;  %v7896_v24 = vsel %vm705_vm3, %v2540_v53, %v2541_v23  ;;  %v7899_v17 = vsel %vm705_vm3, %v2541_v23, %v2543_v43  ;;  %v5209_v34 = vpack.i.bf16 %v7879_v32, %v7876_v52  ;;  %v2551_v7 = vrot.slane %v7723_v9, 2 }
 0x288   : > { %v2545_v19 = vrot.slane %v7699_v15, 2  ;;  %v2550_v23 = vrot.slane %v7733_v51, 2  ;;  %v2555_v53 = vrot.slane %v7766_v0, 2  ;;  %v2561_v52 = vrot.slane %v7789_v26, 2 }
 0x289   : > { %5190 = vrot.lane.b32.xlu1 %v5189_v30, %s5451_s9  ;;  %v5199_v30 = vpack.i.bf16 %v7853_v33, %v7850_v27  ;;  %v2704_v26 = vrot.slane %v7843_v58, 1  ;;  %v2566_v0 = vrot.slane %v7822_v2, 2  ;;  %v2568_v9 = vrot.slane %v7832_v36, 2 }
 0x28a   : > { %5195 = vrot.lane.b32.xlu0 %v5194_v10, %s5451_s9  ;;  %v7884_v10 = vsel %vm705_vm3, %v2535_v31, %v2536_v20  ;;  %v2548_v31 = vrot.slane %v7696_v41, 2  ;;  %v2553_v20 = vrot.slane %v7731_v3, 2  ;;  %v5219_v41 = vpack.i.bf16 %v7899_v17, %v7896_v24 }
 0x28b   : > { %v5214_v43 = vpack.i.bf16 %v7887_v44, %v7884_v10  ;;  %v7928_v25 = vsel %vm705_vm3, %v2550_v23, %v2551_v7  ;;  %v7944_v23 = vld [vmem:[#allocation3 + $0x1a0] sm:$0xff] }
 0x28c   : > { %v7922_v3 = vsel %vm705_vm3, %v2546_v50, %v2548_v31  ;;  %v7931_v32 = vsel %vm705_vm3, %v2551_v7, %v2553_v20  ;;  %9058 = vst [vmem:[#allocation81_spill] sm:$0xff] %v7944_v23  ;;  %v7946_v7 = vld [vmem:[#allocation3 + $0x1a8] sm:$0x3] }
 0x28d   : > { %5200 = vrot.lane.b32.xlu1 %v5199_v30, %s5451_s9  ;;  %v2556_v30 = vrot.slane %v7756_v21, 2  ;;  %9059 = vst [vmem:[#allocation82_spill] sm:$0xff] %v7946_v7  ;;  %v5229_v20 = vpack.i.bf16 %v7931_v32, %v7928_v25  ;;  %v2701_v21 = vrot.slane %v7855_v45, 1  ;;  %v2845_v58 = vrot.slane %v7946_v7, 1 }
 0x28e   : > { %5205 = vrot.lane.b32.xlu0 %v5204_v29, %s5451_s9  ;;  %v7919_v29 = vsel %vm705_vm3, %v2545_v19, %v2546_v50  ;;  %v2563_v19 = vrot.slane %v7797_v38, 2 }
 0x28f   : > { %v5224_v50 = vpack.i.bf16 %v7922_v3, %v7919_v29  ;;  %v7939_v31 = vsel %vm705_vm3, %v2555_v53, %v2556_v30 }
 0x291   : > { %5210 = vrot.lane.b32.xlu1 %v5209_v34, %s5451_s9  ;;  %v2558_v34 = vrot.slane %v7764_v49, 2  ;;  %v2560_v49 = vrot.slane %v7799_v5, 2  ;;  %v7960_v5 = vsel %vm705_vm3, %v2561_v52, %v2563_v19 }
 0x292   : > { %5215 = vrot.lane.b32.xlu0 %v5214_v43, %s5451_s9  ;;  %v7942_v43 = vld [vmem:[#allocation3 + $0x198] sm:$0xff] }
 0x293   : > { %9057 = vst [vmem:[#allocation80_spill] sm:$0xff] %v7942_v43  ;;  %v7951_v38 = vsel %vm705_vm3, %v2556_v30, %v2558_v34  ;;  %v7957_v53 = vsel %vm705_vm3, %v2560_v49, %v2561_v52  ;;  %v2842_v30 = vrot.slane %v7942_v43, 1  ;;  %v2843_v34 = vrot.slane %v7944_v23, 1 }
 0x294   : > { %v2565_v49 = vrot.slane %v7834_v40, 2  ;;  %v5239_v36 = vpack.i.bf16 %v7960_v5, %v7957_v53 }
 0x295   : > { %5220 = vrot.lane.b32.xlu1 %v5219_v41, %s5451_s9  ;;  %v2702_v41 = vrot.slane %v7827_v46, 1  ;;  %v2844_v23 = vsel %vm528_vm2, %v2842_v30, %v2843_v34 }
 0x296   : > { %5225 = vrot.lane.b32.xlu0 %v5224_v50, %s5451_s9  ;;  %v5234_v50 = vpack.i.bf16 %v7951_v38, %v7939_v31  ;;  %v7982_v7 = vsel %vm705_vm3, %v2565_v49, %v2566_v0 }
 0x297   : > { %v7972_v52 = vsel %vm528_vm2, %v2701_v21, %v2702_v41  ;;  %v7975_v19 = vsel %vm528_vm2, %v2702_v41, %v2704_v26  ;;  %v2846_v21 = vsel %vm528_vm2, %v2843_v34, %v2845_v58  ;;  %v5021_v34 = vpop.permute.xlu1 %5020 }
 0x298   : > { %9060 = vst [vmem:[#allocation83_spill] sm:$0xff] %v7972_v52  ;;  %9061 = vst [vmem:[#allocation84_spill] sm:$0xff] %v7975_v19  ;;  %v5244_v26 = vpack.i.bf16 %v7975_v19, %v7972_v52  ;;  %v5023_v58 = vunpack.i.h.bf16 %v5021_v34  ;;  %v5022_v49 = vunpack.i.l.bf16 %v5021_v34  ;;  %v5373_v19 = vld [vmem:[#allocation3 + $0x8] sm:$0xff] }
 0x299   : > { %5230 = vrot.lane.b32.xlu1 %v5229_v20, %s5451_s9  ;;  %v7985_v20 = vsel %vm705_vm3, %v2566_v0, %v2568_v9  ;;  %v5259_v9 = vpack.i.bf16 %v7893_v6, %v7890_v60  ;;  %v5371_v0 = vld [vmem:[#allocation3 + $0x10] sm:$0x3]  ;;  %v2491_v52 = vrot.slane %v5373_v19, 2 }
 0x29a   : > { %5235 = vrot.lane.b32.xlu0 %v5234_v50, %s5451_s9  ;;  %9062 = vst [vmem:[#allocation85_spill] sm:$0xff] %v7985_v20  ;;  %v5249_v41 = vpack.i.bf16 %v7985_v20, %v7982_v7  ;;  %v5254_v50 = vpack.i.bf16 %v2846_v21, %v2844_v23  ;;  %v2493_v30 = vrot.slane %v5371_v0, 2  ;;  %v2869_v23 = vsel %vm283_vm0, %v5373_v19, %v5023_v58  ;;  %v5333_v19 = vld [vmem:[%s8689_s4 + $0x108] sm:$0xff]  }
 0x29d   : > { %5240 = vrot.lane.b32.xlu1 %v5239_v36, %s5451_s9  ;;  %v5372_v36 = vld [vmem:[#allocation3] sm:$0xff] }
 0x29e   : > { %5245 = vrot.lane.b32.xlu0 %v5244_v26, %s5451_s9  ;;  %v2490_v26 = vrot.slane %v5372_v36, 2  ;;  %v2868_v21 = vsel %vm283_vm0, %v5372_v36, %v5022_v49 }
 0x29f   : > { %v2968_v43 = vpack.c.bf16 %v2869_v23, %v2868_v21 }
 0x2a0   : > { %v2492_v60 = vsel %vm705_vm3, %v2490_v26, %v2491_v52 }
 0x2a1   : > { %5250 = vrot.lane.b32.xlu1 %v5249_v41, %s5451_s9 }
 0x2a2   : > { %5255 = vrot.lane.b32.xlu0 %v5254_v50, %s5451_s9  ;;  %v2494_v50 = vsel %vm705_vm3, %v2491_v52, %v2493_v30 }
 0x2a5   : > { %5260 = vrot.lane.b32.xlu1 %v5259_v9, %s5451_s9 }
 0x2af   : > { %v5016_v41 = vpop.permute.xlu0 %5015 }
 0x2b0   : > { %v5018_v6 = vunpack.i.h.bf16 %v5016_v41  ;;  %v5017_v9 = vunpack.i.l.bf16 %v5016_v41 }
 0x2b2   : > { %v2900_v0 = vsel %vm283_vm0, %v2492_v60, %v5017_v9  ;;  %v2901_v34 = vsel %vm283_vm0, %v2494_v50, %v5018_v6  ;;  %v5374_v6 = vld [vmem:[%s8689_s4 + $0x100] sm:$0xff]   ;;  %v5378_v50 = vld [vmem:[#allocation3 + $0x38] sm:$0xff] }
 0x2b3   : > { %v5026_v45 = vpop.permute.xlu0 %5025  ;;  %v2969_v2 = vpack.c.bf16 %v2901_v34, %v2900_v0 }
 0x2b4   : > { %v5031_v46 = vpop.permute.xlu1 %5030  ;;  %v5028_v40 = vunpack.i.h.bf16 %v5026_v45  ;;  %v5027_v20 = vunpack.i.l.bf16 %v5026_v45 }
 0x2b5   : > { %v5033_v58 = vunpack.i.h.bf16 %v5031_v46  ;;  %v5032_v49 = vunpack.i.l.bf16 %v5031_v46  ;;  %3409 = vmatprep.mubr.bf16.mxu1 %v2969_v2  ;;  %v5375_v2 = vld [vmem:[#allocation3 + $0x18] sm:$0xff] }
 0x2b6   : > { %3410 = vmatmul.mubr.bf16.vlgmr.msra.gmra.mrb[64].mxu1 %v2968_v43  ;;  %v2902_v52 = vsel %vm283_vm0, %v7593_v18, %v5027_v20  ;;  %v2903_v60 = vsel %vm283_vm0, %v7602_v4, %v5028_v40  ;;  %v5334_v18 = vld [vmem:[%s8689_s4 + $0x110] sm:$0xff]   ;;  %v5377_v20 = vld [vmem:[#allocation3 + $0x30] sm:$0xff] }
 0x2b7   : > { %4682 = vmatpush3.bf16.msra.mxu1 %v5374_v6  ;;  %v2974_v36 = vpack.c.bf16 %v2903_v60, %v2902_v52  ;;  %v2870_v4 = vsel %vm283_vm0, %v5375_v2, %v5032_v49  ;;  %v5376_v40 = vld [vmem:[#allocation3 + $0x20] sm:$0xff] }
 0x2b8   : > { %v5041_v45 = vpop.permute.xlu1 %5040  ;;  %v5036_v30 = vpop.permute.xlu0 %5035  ;;  %4683 = vmatprep.subr.bf16.mxu1 %v5333_v19  ;;  %v2871_v43 = vsel %vm283_vm0, %v5376_v40, %v5033_v58  ;;  %v5335_v58 = vld [vmem:[%s8689_s4 + $0x118] sm:$0xff]  }
 0x2b9   : > { %v5043_v26 = vunpack.i.h.bf16 %v5041_v45  ;;  %v5042_v23 = vunpack.i.l.bf16 %v5041_v45  ;;  %v5038_v21 = vunpack.i.h.bf16 %v5036_v30  ;;  %v5037_v46 = vunpack.i.l.bf16 %v5036_v30  ;;  %3417 = vmatprep.mubr.bf16.mxu1 %v2974_v36 }
 0x2ba   : > { %v2973_v49 = vpack.c.bf16 %v2871_v43, %v2870_v4 }
 0x2bb   : > { %v2872_v41 = vsel %vm283_vm0, %v5377_v20, %v5042_v23  ;;  %v2873_v9 = vsel %vm283_vm0, %v5378_v50, %v5043_v26  ;;  %v2904_v0 = vsel %vm283_vm0, %v7634_v8, %v5037_v46  ;;  %v2905_v34 = vsel %vm283_vm0, %v7650_v42, %v5038_v21  ;;  %4684 = vmatpush3.bf16.msra.mxu1 %v5333_v19 }
 0x2bc   : > { %v5051_v52 = vpop.permute.xlu1 %5050  ;;  %v5046_v60 = vpop.permute.xlu0 %5045  ;;  %v2971_v6 = vpack.c.bf16 %v2873_v9, %v2872_v41  ;;  %4685 = vmatprep.subr.bf16.mxu1 %v5334_v18  ;;  %v2978_v45 = vpack.c.bf16 %v2905_v34, %v2904_v0  ;;  %v5380_v34 = vld [vmem:[#allocation3 + $0x50] sm:$0xff] }
 0x2bd   : > { %v5048_v30 = vunpack.i.h.bf16 %v5046_v60  ;;  %v5047_v36 = vunpack.i.l.bf16 %v5046_v60  ;;  %v5053_v4 = vunpack.i.h.bf16 %v5051_v52  ;;  %v5052_v40 = vunpack.i.l.bf16 %v5051_v52 }
 0x2be   : > { %3570 = vmatprep.mubr.bf16.mxu0 %v2971_v6  ;;  %3418 = vmatmul.mubr.bf16.gmra.mrb[68].mxu1 %v2973_v49 }
 0x2bf   : > { %3425 = vmatprep.mubr.bf16.mxu1 %v2978_v45  ;;  %4686 = vmatpush3.bf16.msra.mxu1 %v5334_v18  ;;  %v2906_v21 = vsel %vm283_vm0, %v7681_v22, %v5047_v36  ;;  %v2907_v19 = vsel %vm283_vm0, %v7685_v14, %v5048_v30  ;;  %v5379_v18 = vld [vmem:[#allocation3 + $0x48] sm:$0xff]  ;;  %v2875_v60 = vsel %vm283_vm0, %v5380_v34, %v5053_v4  ;;  %v5381_v4 = vld [vmem:[#allocation3 + $0x60] sm:$0xff] }
 0x2c0   : > { %v5061_v26 = vpop.permute.xlu1 %5060  ;;  %v5056_v23 = vpop.permute.xlu0 %5055  ;;  %4687 = vmatprep.subr.bf16.mxu1 %v5335_v58  ;;  %v2982_v43 = vpack.c.bf16 %v2907_v19, %v2906_v21  ;;  %v2874_v0 = vsel %vm283_vm0, %v5379_v18, %v5052_v40 }
 0x2c1   : > { %v5058_v20 = vunpack.i.h.bf16 %v5056_v23  ;;  %v5057_v41 = vunpack.i.l.bf16 %v5056_v23  ;;  %v2976_v45 = vpack.c.bf16 %v2875_v60, %v2874_v0  ;;  %v5062_v30 = vunpack.i.l.bf16 %v5061_v26 }
 0x2c3   : > { %4688 = vmatpush3.bf16.msra.mxu1 %v5335_v58  ;;  %v2908_v49 = vsel %vm283_vm0, %v7713_v54, %v5057_v41  ;;  %v2909_v52 = vsel %vm283_vm0, %v7716_v39, %v5058_v20  ;;  %v5382_v41 = vld [vmem:[#allocation3 + $0x68] sm:$0xff] }
 0x2c4   : > { %v5071_v46 = vpop.permute.xlu1 %5070  ;;  %v5066_v2 = vpop.permute.xlu0 %5065  ;;  %v2986_v23 = vpack.c.bf16 %v2909_v52, %v2908_v49 }
 0x2c5   : > { %v5068_v21 = vunpack.i.h.bf16 %v5066_v2  ;;  %v5067_v19 = vunpack.i.l.bf16 %v5066_v2 }
 0x2c6   : > { %3426 = vmatmul.mubr.bf16.gmra.mrb[72].mxu1 %v2971_v6  ;;  %v5063_v6 = vunpack.i.h.bf16 %v5061_v26 }
 0x2c7   : > { %3433 = vmatprep.mubr.bf16.mxu1 %v2982_v43  ;;  %v2876_v43 = vsel %vm283_vm0, %v5381_v4, %v5062_v30  ;;  %v2910_v0 = vsel %vm283_vm0, %v7746_v16, %v5067_v19  ;;  %v2911_v26 = vsel %vm283_vm0, %v7749_v48, %v5068_v21  ;;  %v5073_v30 = vunpack.i.h.bf16 %v5071_v46  ;;  %v5383_v19 = vld [vmem:[#allocation3 + $0x78] sm:$0xff] }
 0x2c8   : > { %v8034_v50 = vpop.permute.xlu1 %5080  ;;  %v2877_v18 = vsel %vm283_vm0, %v5382_v41, %v5063_v6  ;;  %v2990_v4 = vpack.c.bf16 %v2911_v26, %v2910_v0 }
 0x2c9   : > { %v5076_v9 = vpop.permute.xlu0 %5075  ;;  %v2980_v52 = vpack.c.bf16 %v2877_v18, %v2876_v43  ;;  %v5083_v26 = vunpack.i.h.bf16 %v8034_v50 }
 0x2ca   : > { %v5077_v41 = vunpack.i.l.bf16 %v5076_v9 }
 0x2cc   : > { %v8044_v36 = vpop.permute.xlu1 %5090 }
 0x2cd   : > { %v8042_v58 = vpop.permute.xlu0 %5085 }
 0x2ce   : > { %3434 = vmatmul.mubr.bf16.gmra.mrb[76].mxu1 %v2976_v45 }
 0x2cf   : > { %3441 = vmatprep.mubr.bf16.mxu1 %v2986_v23  ;;  %v5072_v23 = vunpack.i.l.bf16 %v5071_v46 }
 0x2d1   : > { %v8052_v60 = vpop.permute.xlu1 %5100 }
 0x2d2   : > { %v5096_v40 = vpop.permute.xlu0 %5095 }
 0x2d3   : > { %v5098_v20 = vunpack.i.h.bf16 %v5096_v40  ;;  %v5097_v34 = vunpack.i.l.bf16 %v5096_v40  ;;  %v5078_v40 = vunpack.i.h.bf16 %v5076_v9  ;;  %v2912_v9 = vsel %vm283_vm0, %v7779_v56, %v5077_v41  ;;  %v5384_v41 = vld [vmem:[#allocation3 + $0x90] sm:$0xff] }
 0x2d5   : > { %v2933_v2 = vsel %vm283_vm0, %v7352_v61, %v5098_v20  ;;  %v2932_v49 = vsel %vm283_vm0, %v7345_v63, %v5097_v34  ;;  %v2878_v61 = vsel %vm283_vm0, %v5383_v19, %v5072_v23  ;;  %v2879_v63 = vsel %vm283_vm0, %v7463_v1, %v5073_v30 }
 0x2d6   : > { %v2970_v6 = vpack.c.bf16 %v2933_v2, %v2932_v49  ;;  %3442 = vmatmul.mubr.bf16.gmra.mrb[80].mxu1 %v2980_v52  ;;  %v2913_v20 = vsel %vm283_vm0, %v7782_v59, %v5078_v40  ;;  %v2984_v0 = vpack.c.bf16 %v2879_v63, %v2878_v61  ;;  %v5082_v1 = vunpack.i.l.bf16 %v8034_v50 }
 0x2d7   : > { %v8058_v39 = vpop.permute.xlu0 %5105  ;;  %3449 = vmatprep.mubr.bf16.mxu1 %v2990_v4  ;;  %v2994_v30 = vpack.c.bf16 %v2913_v20, %v2912_v9  ;;  %v5088_v23 = vunpack.i.h.bf16 %v8042_v58  ;;  %v5093_v9 = vunpack.i.h.bf16 %v8044_v36  ;;  %v5092_v20 = vunpack.i.l.bf16 %v8044_v36 }
 0x2d8   : > { %3571 = vmatmul.mubr.bf16.vlgmr.msra.gmra.mrb[96].mxu0 %v2970_v6  ;;  %v5087_v6 = vunpack.i.l.bf16 %v8042_v58  ;;  %v2880_v50 = vsel %vm283_vm0, %v5384_v41, %v5082_v1 }
 0x2d9   : > { %3578 = vmatprep.mubr.bf16.mxu0 %v2976_v45  ;;  %v2882_v36 = vsel %vm283_vm0, %v7514_v62, %v5092_v20  ;;  %v5107_v62 = vunpack.i.l.bf16 %v8058_v39 }
 0x2da   : > { %v2914_v63 = vsel %vm283_vm0, %v7812_v11, %v5087_v6  ;;  %v2883_v6 = vsel %vm283_vm0, %v7528_v13, %v5093_v9 }
 0x2db   : > { %v5111_v21 = vpop.permute.xlu1 %5110  ;;  %v8063_v46 = vpop.permute.xlu0 %5115 }
 0x2dc   : > { %v5113_v43 = vunpack.i.h.bf16 %v5111_v21  ;;  %v5112_v18 = vunpack.i.l.bf16 %v5111_v21  ;;  %v5385_v21 = vld [vmem:[#allocation3 + $0x98] sm:$0xff] }
 0x2dd   : > { %v2881_v19 = vsel %vm283_vm0, %v5385_v21, %v5083_v26  ;;  %v2992_v21 = vpack.c.bf16 %v2883_v6, %v2882_v36  ;;  %v9068_v36 = vld [vmem:[#allocation30_spill] sm:$0xff] }
 0x2de   : > { %v2934_v45 = vsel %vm283_vm0, %v7337_v55, %v5112_v18  ;;  %v2935_v34 = vsel %vm283_vm0, %v7368_v12, %v5113_v43  ;;  %3450 = vmatmul.mubr.bf16.gmra.mrb[84].mxu1 %v2984_v0  ;;  %v2988_v18 = vpack.c.bf16 %v2881_v19, %v2880_v50  ;;  %v5108_v19 = vunpack.i.h.bf16 %v8058_v39 }
 0x2df   : > { %v8075_v2 = vpop.permute.xlu1 %5120  ;;  %v2975_v49 = vpack.c.bf16 %v2935_v34, %v2934_v45  ;;  %3457 = vmatprep.mubr.bf16.mxu1 %v2994_v30 }
 0x2e0   : > { %v5126_v4 = vpop.permute.xlu0 %5125 }
 0x2e1   : > { %3579 = vmatmul.mubr.bf16.gmra.mrb[100].mxu0 %v2975_v49  ;;  %v5128_v55 = vunpack.i.h.bf16 %v5126_v4  ;;  %v5127_v40 = vunpack.i.l.bf16 %v5126_v4  ;;  %v9063_v4 = vld [vmem:[#allocation60_spill] sm:$0xff] }
 0x2e2   : > { %3586 = vmatprep.mubr.bf16.mxu0 %v2980_v52  ;;  %v2915_v52 = vsel %vm283_vm0, %v7815_v28, %v5088_v23 }
 0x2e3   : > { %v8079_v12 = vpop.permute.xlu1 %5130  ;;  %v2936_v61 = vsel %vm283_vm0, %v7424_v57, %v5127_v40  ;;  %v2937_v58 = vsel %vm283_vm0, %v7427_v35, %v5128_v55  ;;  %v2998_v26 = vpack.c.bf16 %v2915_v52, %v2914_v63  ;;  %v5103_v57 = vunpack.i.h.bf16 %v8052_v60 }
 0x2e4   : > { %v8091_v43 = vpop.permute.xlu0 %5135  ;;  %v2979_v34 = vpack.c.bf16 %v2937_v58, %v2936_v61  ;;  %v5102_v35 = vunpack.i.l.bf16 %v8052_v60  ;;  %v9064_v60 = vld [vmem:[#allocation28_spill] sm:$0xff]  ;;  %v5118_v63 = vunpack.i.h.bf16 %v8063_v46  ;;  %v5117_v52 = vunpack.i.l.bf16 %v8063_v46 }
 0x2e6   : > { %3458 = vmatmul.mubr.bf16.gmra.mrb[88].mxu1 %v2988_v18  ;;  %v2916_v41 = vsel %vm283_vm0, %v7850_v27, %v5102_v35  ;;  %v2918_v6 = vsel %vm283_vm0, %v7884_v10, %v5117_v52  ;;  %v9069_v52 = vld [vmem:[#allocation48_spill] sm:$0xff] }
 0x2e7   : > { %v5141_v45 = vpop.permute.xlu1 %5140  ;;  %3465 = vmatprep.mubr.bf16.mxu1 %v2998_v26  ;;  %v9065_v26 = vld [vmem:[#allocation47_spill] sm:$0xff] }
 0x2e8   : > { %v5143_v1 = vunpack.i.h.bf16 %v5141_v45  ;;  %v5142_v49 = vunpack.i.l.bf16 %v5141_v45  ;;  %v8097_v30 = vpop.permute.xlu0 %5145  ;;  %v2884_v39 = vsel %vm283_vm0, %v9065_v26, %v5107_v62  ;;  %v9071_v26 = vld [vmem:[#allocation31_spill] sm:$0xff] }
 0x2e9   : > { %3587 = vmatmul.mubr.bf16.gmra.mrb[104].mxu0 %v2979_v34 }
 0x2ea   : > { %3594 = vmatprep.mubr.bf16.mxu0 %v2984_v0  ;;  %v2938_v55 = vsel %vm283_vm0, %v9063_v4, %v5142_v49  ;;  %v2939_v40 = vsel %vm283_vm0, %v9064_v60, %v5143_v1  ;;  %v2917_v0 = vsel %vm283_vm0, %v7853_v33, %v5103_v57  ;;  %v9066_v57 = vld [vmem:[#allocation33_spill] sm:$0xff]  ;;  %v2919_v4 = vsel %vm283_vm0, %v7887_v44, %v5118_v63 }
 0x2eb   : > { %v8099_v23 = vpop.permute.xlu1 %5150  ;;  %v2983_v13 = vpack.c.bf16 %v2939_v40, %v2938_v55  ;;  %v3002_v58 = vpack.c.bf16 %v2917_v0, %v2916_v41  ;;  %v2885_v35 = vsel %vm283_vm0, %v9066_v57, %v5108_v19  ;;  %v9067_v1 = vld [vmem:[#allocation29_spill] sm:$0xff]  ;;  %v5123_v60 = vunpack.i.h.bf16 %v8075_v2  ;;  %v9072_v57 = vld [vmem:[#allocation32_spill] sm:$0xff] }
 0x2ec   : > { %v5156_v50 = vpop.permute.xlu0 %5155  ;;  %v2996_v55 = vpack.c.bf16 %v2885_v35, %v2884_v39  ;;  %v5122_v40 = vunpack.i.l.bf16 %v8075_v2  ;;  %v3006_v0 = vpack.c.bf16 %v2919_v4, %v2918_v6  ;;  %v5132_v19 = vunpack.i.l.bf16 %v8079_v12 }
 0x2ed   : > { %v5158_v9 = vunpack.i.h.bf16 %v5156_v50  ;;  %v5157_v20 = vunpack.i.l.bf16 %v5156_v50  ;;  %v5133_v50 = vunpack.i.h.bf16 %v8079_v12  ;;  %v5148_v4 = vunpack.i.h.bf16 %v8097_v30 }
 0x2ee   : > { %3466 = vmatmul.mubr.bf16.gmra.mrb[92].mxu1 %v2992_v21 }
 0x2ef   : > { %v8115_v61 = vpop.permute.xlu1 %5160  ;;  %3473 = vmatprep.mubr.bf16.mxu1 %v3002_v58  ;;  %v2940_v49 = vsel %vm283_vm0, %v9067_v1, %v5157_v20  ;;  %v2941_v46 = vsel %vm283_vm0, %v9068_v36, %v5158_v9  ;;  %v2886_v9 = vsel %vm283_vm0, %v9069_v52, %v5122_v40  ;;  %v9070_v20 = vld [vmem:[#allocation49_spill] sm:$0xff]  ;;  %v2921_v35 = vsel %vm283_vm0, %v7899_v17, %v5133_v50  ;;  %v9075_v52 = vld [vmem:[#allocation39_spill] sm:$0xff] }
 0x2f0   : > { %v8119_v45 = vpop.permute.xlu0 %5165  ;;  %v2987_v41 = vpack.c.bf16 %v2941_v46, %v2940_v49  ;;  %v2887_v2 = vsel %vm283_vm0, %v9070_v20, %v5123_v60  ;;  %v5138_v1 = vunpack.i.h.bf16 %v8091_v43  ;;  %v5137_v49 = vunpack.i.l.bf16 %v8091_v43  ;;  %v9073_v43 = vld [vmem:[#allocation52_spill] sm:$0xff] }
 0x2f1   : > { %3595 = vmatmul.mubr.bf16.gmra.mrb[108].mxu0 %v2983_v13  ;;  %v5147_v60 = vunpack.i.l.bf16 %v8097_v30 }
 0x2f2   : > { %3602 = vmatprep.mubr.bf16.mxu0 %v2988_v18  ;;  %v2888_v50 = vsel %vm283_vm0, %v7639_v47, %v5137_v49  ;;  %v5152_v47 = vunpack.i.l.bf16 %v8099_v23 }
 0x2f3   : > { %v5171_v34 = vpop.permute.xlu1 %5170 }
 0x2f4   : > { %v8133_v18 = vpop.permute.xlu0 %5175  ;;  %v5173_v62 = vunpack.i.h.bf16 %v5171_v34  ;;  %v5172_v13 = vunpack.i.l.bf16 %v5171_v34  ;;  %v2920_v34 = vsel %vm283_vm0, %v7896_v24, %v5132_v19  ;;  %v2889_v19 = vsel %vm283_vm0, %v9073_v43, %v5138_v1 }
 0x2f5   : > { %v3010_v6 = vpack.c.bf16 %v2921_v35, %v2920_v34  ;;  %v5162_v34 = vunpack.i.l.bf16 %v8115_v61  ;;  %v2890_v49 = vsel %vm283_vm0, %v7699_v15, %v5152_v47  ;;  %v5167_v15 = vunpack.i.l.bf16 %v8119_v45  ;;  %v9080_v47 = vld [vmem:[#allocation54_spill] sm:$0xff] }
 0x2f6   : > { %3474 = vmatmul.mubr.bf16.gmra.mrb[96].mxu1 %v2996_v55  ;;  %v2942_v39 = vsel %vm283_vm0, %v9071_v26, %v5172_v13  ;;  %v2943_v12 = vsel %vm283_vm0, %v9072_v57, %v5173_v62  ;;  %v9074_v62 = vld [vmem:[#allocation38_spill] sm:$0xff] }
 0x2f7   : > { %v8139_v58 = vpop.permute.xlu1 %5180  ;;  %3481 = vmatprep.mubr.bf16.mxu1 %v3006_v0  ;;  %v2991_v46 = vpack.c.bf16 %v2943_v12, %v2942_v39  ;;  %v5163_v12 = vunpack.i.h.bf16 %v8115_v61  ;;  %v2924_v61 = vsel %vm283_vm0, %v7928_v25, %v5162_v34 }
 0x2f8   : > { %v5186_v63 = vpop.permute.xlu0 %5185  ;;  %v5183_v34 = vunpack.i.h.bf16 %v8139_v58 }
 0x2f9   : > { %3603 = vmatmul.mubr.bf16.gmra.mrb[112].mxu0 %v2987_v41  ;;  %v5188_v40 = vunpack.i.h.bf16 %v5186_v63  ;;  %v5187_v41 = vunpack.i.l.bf16 %v5186_v63  ;;  %v2922_v63 = vsel %vm283_vm0, %v7919_v29, %v5147_v60 }
 0x2fa   : > { %3610 = vmatprep.mubr.bf16.mxu0 %v2992_v21  ;;  %v3000_v21 = vpack.c.bf16 %v2887_v2, %v2886_v9  ;;  %v2923_v9 = vsel %vm283_vm0, %v7922_v3, %v5148_v4  ;;  %v5153_v2 = vunpack.i.h.bf16 %v8099_v23  ;;  %v9077_v4 = vld [vmem:[#allocation51_spill] sm:$0xff] }
 0x2fb   : > { %v8155_v36 = vpop.permute.xlu1 %5190  ;;  %v2944_v13 = vsel %vm283_vm0, %v9074_v62, %v5187_v41  ;;  %v2945_v30 = vsel %vm283_vm0, %v9075_v52, %v5188_v40  ;;  %v3014_v57 = vpack.c.bf16 %v2923_v9, %v2922_v63  ;;  %v2925_v40 = vsel %vm283_vm0, %v7931_v32, %v5163_v12  ;;  %v9078_v9 = vld [vmem:[#allocation59_spill] sm:$0xff] }
 0x2fc   : > { %v8159_v0 = vpop.permute.xlu0 %5195  ;;  %v2995_v39 = vpack.c.bf16 %v2945_v30, %v2944_v13  ;;  %v2891_v23 = vsel %vm283_vm0, %v7687_v37, %v5153_v2  ;;  %v5178_v62 = vunpack.i.h.bf16 %v8133_v18  ;;  %v5177_v13 = vunpack.i.l.bf16 %v8133_v18 }
 0x2fd   : > { %v2892_v63 = vsel %vm283_vm0, %v7733_v51, %v5167_v15  ;;  %v5182_v51 = vunpack.i.l.bf16 %v8139_v58 }
 0x2fe   : > { %3482 = vmatmul.mubr.bf16.gmra.mrb[100].mxu1 %v3000_v21  ;;  %v2926_v18 = vsel %vm283_vm0, %v7939_v31, %v5177_v13  ;;  %v5197_v13 = vunpack.i.l.bf16 %v8159_v0 }
 0x2ff   : > { %3489 = vmatprep.mubr.bf16.mxu1 %v3010_v6  ;;  %v5201_v20 = vpop.permute.xlu1 %5200 }
 0x300   : > { %v8175_v26 = vpop.permute.xlu0 %5205  ;;  %v5203_v35 = vunpack.i.h.bf16 %v5201_v20  ;;  %v5202_v1 = vunpack.i.l.bf16 %v5201_v20  ;;  %v9079_v20 = vld [vmem:[#allocation53_spill] sm:$0xff] }
 0x301   : > { %3611 = vmatmul.mubr.bf16.gmra.mrb[116].mxu0 %v2991_v46  ;;  %v9076_v46 = vld [vmem:[#allocation50_spill] sm:$0xff] }
 0x302   : > { %3618 = vmatprep.mubr.bf16.mxu0 %v2996_v55  ;;  %v3004_v55 = vpack.c.bf16 %v2889_v19, %v2888_v50  ;;  %v2946_v6 = vsel %vm283_vm0, %v9076_v46, %v5202_v1  ;;  %v2947_v60 = vsel %vm283_vm0, %v9077_v4, %v5203_v35  ;;  %v5168_v50 = vunpack.i.h.bf16 %v8119_v45  ;;  %v9081_v4 = vld [vmem:[#allocation63_spill] sm:$0xff] }
 0x303   : > { %v8193_v43 = vpop.permute.xlu1 %5210  ;;  %v2999_v37 = vpack.c.bf16 %v2947_v60, %v2946_v6  ;;  %v3018_v19 = vpack.c.bf16 %v2925_v40, %v2924_v61  ;;  %v2894_v60 = vsel %vm283_vm0, %v9081_v4, %v5182_v51  ;;  %v9082_v61 = vld [vmem:[#allocation74_spill] sm:$0xff]  ;;  %v9089_v51 = vld [vmem:[#allocation85_spill] sm:$0xff] }
 0x304   : > { %v5216_v41 = vpop.permute.xlu0 %5215  ;;  %v2893_v45 = vsel %vm283_vm0, %v9078_v9, %v5168_v50  ;;  %v2895_v40 = vsel %vm283_vm0, %v9082_v61, %v5183_v34  ;;  %v9084_v50 = vld [vmem:[#allocation57_spill] sm:$0xff]  ;;  %v5207_v9 = vunpack.i.l.bf16 %v8175_v26  ;;  %v9090_v61 = vld [vmem:[#allocation71_spill] sm:$0xff] }
 0x305   : > { %v5218_v52 = vunpack.i.h.bf16 %v5216_v41  ;;  %v5217_v30 = vunpack.i.l.bf16 %v5216_v41  ;;  %v9083_v41 = vld [vmem:[#allocation56_spill] sm:$0xff] }
 0x306   : > { %3490 = vmatmul.mubr.bf16.gmra.mrb[104].mxu1 %v3004_v55 }
 0x307   : > { %3497 = vmatprep.mubr.bf16.mxu1 %v3014_v57  ;;  %v2948_v2 = vsel %vm283_vm0, %v9079_v20, %v5217_v30  ;;  %v2927_v57 = vsel %vm283_vm0, %v7951_v38, %v5178_v62  ;;  %v5221_v12 = vpop.permute.xlu1 %5220  ;;  %v5198_v62 = vunpack.i.h.bf16 %v8159_v0 }
 0x308   : > { %v3022_v1 = vpack.c.bf16 %v2927_v57, %v2926_v18  ;;  %v5223_v46 = vunpack.i.h.bf16 %v5221_v12  ;;  %v5222_v6 = vunpack.i.l.bf16 %v5221_v12  ;;  %v9087_v57 = vld [vmem:[#allocation61_spill] sm:$0xff]  ;;  %v9088_v12 = vld [vmem:[#allocation62_spill] sm:$0xff] }
 0x309   : > { %3619 = vmatmul.mubr.bf16.gmra.mrb[120].mxu0 %v2995_v39  ;;  %v2949_v39 = vsel %vm283_vm0, %v9080_v47, %v5218_v52 }
 0x30a   : > { %3626 = vmatprep.mubr.bf16.mxu0 %v3000_v21  ;;  %v3008_v21 = vpack.c.bf16 %v2891_v23, %v2890_v49  ;;  %v3003_v35 = vpack.c.bf16 %v2949_v39, %v2948_v2  ;;  %v5193_v49 = vunpack.i.h.bf16 %v8155_v36  ;;  %v5192_v23 = vunpack.i.l.bf16 %v8155_v36  ;;  %v9085_v2 = vld [vmem:[#allocation65_spill] sm:$0xff]  ;;  %v9086_v39 = vld [vmem:[#allocation76_spill] sm:$0xff] }
 0x30b   : > { %v2950_v58 = vsel %vm283_vm0, %v9083_v41, %v5222_v6  ;;  %v2951_v15 = vsel %vm283_vm0, %v9084_v50, %v5223_v46  ;;  %v2896_v47 = vsel %vm283_vm0, %v9085_v2, %v5197_v13  ;;  %v2897_v18 = vsel %vm283_vm0, %v9086_v39, %v5198_v62  ;;  %v9091_v41 = vld [vmem:[#allocation69_spill] sm:$0xff]  ;;  %v9092_v50 = vld [vmem:[#allocation64_spill] sm:$0xff] }
 0x30c   : > { %v2928_v36 = vsel %vm283_vm0, %v7957_v53, %v5192_v23  ;;  %v3007_v52 = vpack.c.bf16 %v2951_v15, %v2950_v58  ;;  %v5212_v23 = vunpack.i.l.bf16 %v8193_v43  ;;  %v2972_v13 = vpack.c.bf16 %v7650_v42, %v7634_v8  ;;  %v9096_v8 = vld [vmem:[#allocation58_spill] sm:$0xff] }
 0x30d   : > { %v2977_v2 = vpack.c.bf16 %v7685_v14, %v7681_v22  ;;  %v2981_v42 = vpack.c.bf16 %v9096_v8, %v7713_v54 }
 0x30e   : > { %3498 = vmatmul.mubr.bf16.gmra.mrb[108].mxu1 %v3008_v21 }
 0x30f   : > { %3505 = vmatprep.mubr.bf16.mxu1 %v3018_v19  ;;  %v5226_v19 = vpop.permute.xlu0 %5225 }
 0x310   : > { %v5227_v20 = vunpack.i.l.bf16 %v5226_v19 }
 0x311   : > { %3627 = vmatmul.mubr.bf16.gmra.mrb[124].mxu0 %v2999_v37  ;;  %v2929_v37 = vsel %vm283_vm0, %v7960_v5, %v5193_v49  ;;  %v5213_v49 = vunpack.i.h.bf16 %v8193_v43 }
 0x312   : > { %3634 = vmatprep.mubr.bf16.mxu0 %v3004_v55  ;;  %v3012_v55 = vpack.c.bf16 %v2893_v45, %v2892_v63  ;;  %v3026_v30 = vpack.c.bf16 %v2929_v37, %v2928_v36  ;;  %v5208_v63 = vunpack.i.h.bf16 %v8175_v26  ;;  %v5228_v45 = vunpack.i.h.bf16 %v5226_v19  ;;  %v9093_v36 = vld [vmem:[#allocation75_spill] sm:$0xff] }
 0x313   : > { %v2952_v0 = vsel %vm283_vm0, %v9087_v57, %v5227_v20  ;;  %v2930_v26 = vsel %vm283_vm0, %v7982_v7, %v5207_v9  ;;  %v2899_v58 = vsel %vm283_vm0, %v9091_v41, %v5213_v49  ;;  %v5236_v37 = vpop.permute.xlu0 %5235  ;;  %v9095_v9 = vld [vmem:[#allocation68_spill] sm:$0xff]  ;;  %v9100_v49 = vld [vmem:[#allocation70_spill] sm:$0xff] }
 0x314   : > { %v2953_v34 = vsel %vm283_vm0, %v9088_v12, %v5228_v45 }
 0x315   : > { %v3011_v46 = vpack.c.bf16 %v2953_v34, %v2952_v0  ;;  %v9097_v34 = vld [vmem:[#allocation67_spill] sm:$0xff] }
 0x316   : > { %3506 = vmatmul.mubr.bf16.gmra.mrb[112].mxu1 %v3012_v55 }
 0x317   : > { %3513 = vmatprep.mubr.bf16.mxu1 %v3022_v1  ;;  %v5231_v1 = vpop.permute.xlu1 %5230 }
 0x318   : > { %v5233_v4 = vunpack.i.h.bf16 %v5231_v1 }
 0x319   : > { %3635 = vmatmul.mubr.bf16.gmra.mrb[128].mxu0 %v3003_v35  ;;  %v2931_v35 = vsel %vm283_vm0, %v9089_v51, %v5208_v63 }
 0x31a   : > { %3642 = vmatprep.mubr.bf16.mxu0 %v3008_v21  ;;  %v3016_v21 = vpack.c.bf16 %v2895_v40, %v2894_v60  ;;  %v3030_v6 = vpack.c.bf16 %v2931_v35, %v2930_v26  ;;  %v5232_v60 = vunpack.i.l.bf16 %v5231_v1  ;;  %v2898_v40 = vsel %vm283_vm0, %v9090_v61, %v5212_v23  ;;  %v9098_v35 = vld [vmem:[#allocation55_spill] sm:$0xff] }
 0x31b   : > { %v2955_v43 = vsel %vm283_vm0, %v9093_v36, %v5233_v4  ;;  %v3024_v19 = vpack.c.bf16 %v2899_v58, %v2898_v40  ;;  %v5241_v20 = vpop.permute.xlu1 %5240  ;;  %v2989_v4 = vpack.c.bf16 %v7782_v59, %v7779_v56  ;;  %v9102_v36 = vld [vmem:[#allocation81_spill] sm:$0xff]  ;;  %v9104_v59 = vld [vmem:[#allocation79_spill] sm:$0xff] }
 0x31c   : > { %v2954_v15 = vsel %vm283_vm0, %v9092_v50, %v5232_v60  ;;  %v5242_v57 = vunpack.i.l.bf16 %v5241_v20  ;;  %v9101_v50 = vld [vmem:[#allocation80_spill] sm:$0xff] }
 0x31d   : > { %v3015_v62 = vpack.c.bf16 %v2955_v43, %v2954_v15 }
 0x31e   : > { %3514 = vmatmul.mubr.bf16.gmra.mrb[116].mxu1 %v3016_v21  ;;  %v2958_v26 = vsel %vm283_vm0, %v9097_v34, %v5242_v57 }
 0x31f   : > { %3521 = vmatprep.mubr.bf16.mxu1 %v3026_v30  ;;  %v9094_v30 = vld [vmem:[#allocation66_spill] sm:$0xff]  ;;  %v5251_v1 = vpop.permute.xlu1 %5250 }
 0x320   : > { %v5253_v40 = vunpack.i.h.bf16 %v5251_v1  ;;  %v5252_v41 = vunpack.i.l.bf16 %v5251_v1 }
 0x321   : > { %3643 = vmatmul.mubr.bf16.gmra.mrb[132].mxu0 %v3007_v52  ;;  %v5238_v52 = vunpack.i.h.bf16 %v5236_v37 }
 0x322   : > { %3650 = vmatprep.mubr.bf16.mxu0 %v3012_v55  ;;  %v3020_v55 = vpack.c.bf16 %v2897_v18, %v2896_v47  ;;  %v5246_v47 = vpop.permute.xlu0 %5245  ;;  %v5243_v18 = vunpack.i.h.bf16 %v5241_v20  ;;  %v2961_v43 = vsel %vm283_vm0, %v9104_v59, %v5253_v40  ;;  %v8330_v40 = vld [vmem:[%s8690_s5] ss:$0 sm:$0xff] }
 0x323   : > { %v2957_v45 = vsel %vm283_vm0, %v9095_v9, %v5238_v52  ;;  %v5248_v0 = vunpack.i.h.bf16 %v5246_v47  ;;  %v5247_v12 = vunpack.i.l.bf16 %v5246_v47  ;;  %v2997_v52 = vpack.c.bf16 %v7853_v33, %v7850_v27 }
 0x324   : > { %v2959_v22 = vsel %vm283_vm0, %v9098_v35, %v5243_v18  ;;  %v3005_v27 = vpack.c.bf16 %v7899_v17, %v7896_v24  ;;  %v3009_v33 = vpack.c.bf16 %v7922_v3, %v7919_v29  ;;  %v2859_v24 = vrot.slane %v9101_v50, 2  ;;  %v9107_v29 = vld [vmem:[#allocation82_spill] sm:$0xff]  ;;  %v9108_v3 = vld [vmem:[#allocation72_spill] sm:$0xff] }
 0x325   : > { %v2965_v23 = vsel %vm283_vm0, %v9100_v49, %v5248_v0  ;;  %v2860_v17 = vrot.slane %v9102_v36, 2 }
 0x326   : > { %3522 = vmatmul.mubr.bf16.gmra.mrb[120].mxu1 %v3020_v55  ;;  %v5256_v14 = vpop.permute.xlu0 %5255 }
 0x327   : > { %3529 = vmatprep.mubr.bf16.mxu1 %v3030_v6  ;;  %v3023_v6 = vpack.c.bf16 %v2959_v22, %v2958_v26  ;;  %v5258_v60 = vunpack.i.h.bf16 %v5256_v14  ;;  %v5257_v61 = vunpack.i.l.bf16 %v5256_v14 }
 0x329   : > { %3651 = vmatmul.mubr.bf16.gmra.mrb[136].mxu0 %v3011_v46  ;;  %v2985_v46 = vpack.c.bf16 %v7749_v48, %v7746_v16  ;;  %v2966_v15 = vsel %vm283_vm0, %v9101_v50, %v5257_v61  ;;  %v2967_v16 = vsel %vm283_vm0, %v9102_v36, %v5258_v60  ;;  %v9103_v48 = vld [vmem:[#allocation78_spill] sm:$0xff] }
 0x32a   : > { %3658 = vmatprep.mubr.bf16.mxu0 %v3016_v21  ;;  %v5237_v21 = vunpack.i.l.bf16 %v5236_v37  ;;  %v2960_v56 = vsel %vm283_vm0, %v9103_v48, %v5252_v41  ;;  %v5261_v37 = vpop.permute.xlu1 %5260 }
 0x32c   : > { %v2956_v63 = vsel %vm283_vm0, %v9094_v30, %v5237_v21  ;;  %v5263_v21 = vunpack.i.h.bf16 %v5261_v37  ;;  %v5262_v30 = vunpack.i.l.bf16 %v5261_v37 }
 0x32d   : > { %v3019_v39 = vpack.c.bf16 %v2957_v45, %v2956_v63  ;;  %v9105_v63 = vld [vmem:[#allocation83_spill] sm:$0xff]  ;;  %v9106_v45 = vld [vmem:[#allocation84_spill] sm:$0xff] }
 0x32e   : > { %3530 = vmatmul.mubr.bf16.gmra.mrb[124].mxu1 %v3024_v19  ;;  %v2962_v9 = vsel %vm283_vm0, %v9105_v63, %v5262_v30  ;;  %v2963_v20 = vsel %vm283_vm0, %v9106_v45, %v5263_v21 }
 0x32f   : > { %4689 = vmatprep.mubr.msk.bf16.mxu1 %vm283_vm0, %v2972_v13  ;;  %v3027_v13 = vpack.c.bf16 %v2961_v43, %v2960_v56 }
 0x331   : > { %3659 = vmatmul.mubr.bf16.gmra.mrb[140].mxu0 %v3015_v62  ;;  %v3032_v62 = vpack.c.bf16 %v2967_v16, %v2966_v15 }
 0x332   : > { %3666 = vmatprep.mubr.bf16.mxu0 %v3020_v55  ;;  %v9099_v55 = vld [vmem:[#allocation77_spill] sm:$0xff] }
 0x333   : > { %v2964_v54 = vsel %vm283_vm0, %v9099_v55, %v5247_v12 }
 0x334   : > { %v3028_v58 = vpack.c.bf16 %v2965_v23, %v2964_v54 }
 0x336   : > { %4690 = vmatmul.mubr.msk.bf16.vlgmr.msra.gmra.mrb[128].mxu1 %vm283_vm0, %v2977_v2  ;;  %v3013_v2 = vpack.c.bf16 %v7931_v32, %v7928_v25  ;;  %v2862_v32 = vrot.slane %v9107_v29, 2  ;;  %v3025_v25 = vpack.c.bf16 %v9089_v51, %v7982_v7 }
 0x337   : > { %4693 = vmatprep.mubr.msk.bf16.mxu1 %vm283_vm0, %v2981_v42 }
 0x339   : > { %3667 = vmatmul.mubr.bf16.gmra.mrb[144].mxu0 %v3019_v39 }
 0x33a   : > { %3674 = vmatprep.mubr.bf16.mxu0 %v3024_v19  ;;  %v2993_v19 = vpack.c.bf16 %v7815_v28, %v7812_v11  ;;  %v3001_v28 = vpack.c.bf16 %v7887_v44, %v7884_v10  ;;  %v3031_v11 = vpack.c.bf16 %v2963_v20, %v2962_v9  ;;  %v3017_v44 = vpack.c.bf16 %v7951_v38, %v7939_v31  ;;  %v9109_v31 = vld [vmem:[#allocation73_spill] sm:$0xff] }
 0x33b   : > { %v3021_v10 = vpack.c.bf16 %v7960_v5, %v7957_v53  ;;  %v9110_v38 = vpack.c.bf16 %v9108_v3, %v9109_v31  ;;  %v2861_v5 = vsel %vm705_vm3, %v2859_v24, %v2860_v17  ;;  %v2863_v53 = vsel %vm705_vm3, %v2860_v17, %v2862_v32 }
 0x33c   : > { %v3033_v47 = vpack.c.bf16 %v2863_v53, %v2861_v5 }
 0x33e   : > { %4694 = vmatmul.mubr.msk.bf16.gmra.mrb[132].mxu1 %vm283_vm0, %v2985_v46 }
 0x33f   : > { %4697 = vmatprep.mubr.msk.bf16.mxu1 %vm283_vm0, %v2989_v4 }
 0x341   : > { %3675 = vmatmul.mubr.bf16.gmra.mrb[148].mxu0 %v3023_v6 }
 0x342   : > { %3682 = vmatprep.mubr.bf16.mxu0 %v3028_v58 }
 0x346   : > { %4698 = vmatmul.mubr.msk.bf16.gmra.mrb[136].mxu1 %vm283_vm0, %v2993_v19 }
 0x347   : > { %4701 = vmatprep.mubr.msk.bf16.mxu1 %vm283_vm0, %v2997_v52 }
 0x349   : > { %3683 = vmatmul.mubr.bf16.gmra.mrb[152].mxu0 %v3027_v13 }
 0x34a   : > { %3690 = vmatprep.mubr.bf16.mxu0 %v3032_v62 }
 0x34e   : > { %4702 = vmatmul.mubr.msk.bf16.gmra.mrb[140].mxu1 %vm283_vm0, %v3001_v28 }
 0x34f   : > { %4705 = vmatprep.mubr.msk.bf16.mxu1 %vm283_vm0, %v3005_v27 }
 0x351   : > { %3691 = vmatmul.mubr.bf16.gmra.mrb[156].mxu0 %v3031_v11 }
 0x356   : > { %4706 = vmatmul.mubr.msk.bf16.gmra.mrb[144].mxu1 %vm283_vm0, %v3009_v33 }
 0x357   : > { %4709 = vmatprep.mubr.msk.bf16.mxu1 %vm283_vm0, %v3013_v2 }
 0x35e   : > { %4710 = vmatmul.mubr.msk.bf16.gmra.mrb[148].mxu1 %vm283_vm0, %v3017_v44 }
 0x35f   : > { %4713 = vmatprep.mubr.msk.bf16.mxu1 %vm283_vm0, %v3021_v10 }
 0x366   : > { %4714 = vmatmul.mubr.msk.bf16.gmra.mrb[152].mxu1 %vm283_vm0, %v3025_v25 }
 0x367   : > { %4717 = vmatprep.mubr.msk.bf16.mxu1 %vm283_vm0, %v9110_v38 }
 0x36e   : > { %4718 = vmatmul.mubr.msk.bf16.gmra.mrb[156].mxu1 %vm283_vm0, %v3033_v47 }
 0x389   : > { %v4413_v39 = vpop.f32.mrb[64].mxu1 }
 0x38a   : > { %v4414_v8 = vpop.f32.mrb[65].mxu1 }
 0x38b   : > { %v4415_v42 = vadd.f32 %v4414_v8, %v4413_v39  ;;  %v4416_v18 = vpop.f32.mrb[66].mxu1 }
 0x38c   : > { %v4417_v57 = vpop.f32.mrb[67].mxu1 }
 0x38d   : > { %v4418_v7 = vadd.f32 %v4417_v57, %v4416_v18  ;;  %v3412_v48 = vadd.f32 %v4415_v42, %v8330_v40 }
 0x38f   : > { %v3415_v62 = vadd.f32 %v4418_v7, %v8330_v40 }
 0x391   : > { %v4419_v51 = vpop.f32.mrb[68].mxu1 }
 0x392   : > { %v4420_v0 = vpop.f32.mrb[69].mxu1 }
 0x393   : > { %v4421_v12 = vadd.f32 %v4420_v0, %v4419_v51  ;;  %v4422_v34 = vpop.f32.mrb[70].mxu1 }
 0x394   : > { %v4423_v26 = vpop.f32.mrb[71].mxu1 }
 0x395   : > { %v4424_v35 = vadd.f32 %v4423_v26, %v4422_v34  ;;  %v3420_v11 = vadd.f32 %v4421_v12, %v8330_v40 }
 0x397   : > { %v3423_v24 = vadd.f32 %v4424_v35, %v8330_v40 }
 0x399   : > { %v4425_v22 = vpop.f32.mrb[72].mxu1 }
 0x39a   : > { %v4426_v14 = vpop.f32.mrb[73].mxu1 }
 0x39b   : > { %v4427_v1 = vadd.f32 %v4426_v14, %v4425_v22  ;;  %v4428_v55 = vpop.f32.mrb[74].mxu1 }
 0x39c   : > { %v4429_v54 = vpop.f32.mrb[75].mxu1 }
 0x39d   : > { %v4430_v49 = vadd.f32 %v4429_v54, %v4428_v55  ;;  %v3428_v47 = vadd.f32 %v4427_v1, %v8330_v40 }
 0x39f   : > { %v3431_v7 = vadd.f32 %v4430_v49, %v8330_v40 }
 0x3a1   : > { %v4431_v23 = vpop.f32.mrb[76].mxu1 }
 0x3a2   : > { %v4432_v46 = vpop.f32.mrb[77].mxu1 }
 0x3a3   : > { %v4433_v6 = vadd.f32 %v4432_v46, %v4431_v23  ;;  %v4434_v4 = vpop.f32.mrb[78].mxu1 }
 0x3a4   : > { %v4435_v60 = vpop.f32.mrb[79].mxu1 }
 0x3a5   : > { %v4436_v61 = vadd.f32 %v4435_v60, %v4434_v4  ;;  %v3436_v55 = vadd.f32 %v4433_v6, %v8330_v40 }
 0x3a7   : > { %v3439_v49 = vadd.f32 %v4436_v61, %v8330_v40 }
 0x3a9   : > { %v4437_v41 = vpop.f32.mrb[80].mxu1 }
 0x3aa   : > { %v4438_v50 = vpop.f32.mrb[81].mxu1 }
 0x3ab   : > { %v4525_v58 = vpop.f32.mrb[96].mxu0  ;;  %v8332_v36 = vadd.f32 %v4438_v50, %v4437_v41  ;;  %v4440_v16 = vpop.f32.mrb[82].mxu1 }
 0x3ac   : > { %v4526_v15 = vpop.f32.mrb[97].mxu0  ;;  %v4441_v43 = vpop.f32.mrb[83].mxu1 }
 0x3ad   : > { %v4527_v56 = vadd.f32 %v4526_v15, %v4525_v58  ;;  %v4528_v59 = vpop.f32.mrb[98].mxu0  ;;  %v8335_v19 = vadd.f32 %v4441_v43, %v4440_v16  ;;  %v3444_v43 = vadd.f32 %v8332_v36, %v8330_v40 }
 0x3ae   : > { %v4529_v37 = vpop.f32.mrb[99].mxu0 }
 0x3af   : > { %v4530_v13 = vadd.f32 %v4529_v37, %v4528_v59  ;;  %v8338_v52 = vadd.f32 %v4527_v56, %v3412_v48 }
 0x3b1   : > { %v8340_v21 = vadd.f32 %v4530_v13, %v3415_v62  ;;  %v4443_v30 = vpop.f32.mrb[84].mxu1 }
 0x3b2   : > { %v4444_v9 = vpop.f32.mrb[85].mxu1 }
 0x3b3   : > { %v8342_v20 = vadd.f32 %v4444_v9, %v4443_v30  ;;  %v4446_v28 = vpop.f32.mrb[86].mxu1 }
 0x3b4   : > { %v4531_v63 = vpop.f32.mrb[100].mxu0  ;;  %v4447_v2 = vpop.f32.mrb[87].mxu1 }
 0x3b5   : > { %v4532_v45 = vpop.f32.mrb[101].mxu0  ;;  %v8345_v10 = vadd.f32 %v4447_v2, %v4446_v28 }
 0x3b6   : > { %v4533_v27 = vadd.f32 %v4532_v45, %v4531_v63  ;;  %v4534_v33 = vpop.f32.mrb[102].mxu0  ;;  %v3447_v63 = vadd.f32 %v8335_v19, %v8330_v40 }
 0x3b7   : > { %v4535_v44 = vpop.f32.mrb[103].mxu0 }
 0x3b8   : > { %v4536_v17 = vadd.f32 %v4535_v44, %v4534_v33  ;;  %v8348_v29 = vadd.f32 %v4533_v27, %v3420_v11 }
 0x3b9   : > { %v4449_v25 = vpop.f32.mrb[88].mxu1 }
 0x3ba   : > { %v8350_v32 = vadd.f32 %v4536_v17, %v3423_v24  ;;  %v4450_v31 = vpop.f32.mrb[89].mxu1  ;;  %v3452_v24 = vadd.f32 %v8342_v20, %v8330_v40 }
 0x3bb   : > { %v8352_v5 = vadd.f32 %v4450_v31, %v4449_v25  ;;  %v4452_v53 = vpop.f32.mrb[90].mxu1 }
 0x3bc   : > { %v4537_v3 = vpop.f32.mrb[104].mxu0  ;;  %v4453_v42 = vpop.f32.mrb[91].mxu1 }
 0x3bd   : > { %v4538_v38 = vpop.f32.mrb[105].mxu0  ;;  %v8355_v57 = vadd.f32 %v4453_v42, %v4452_v53 }
 0x3be   : > { %v4539_v39 = vadd.f32 %v4538_v38, %v4537_v3  ;;  %v4540_v8 = vpop.f32.mrb[106].mxu0  ;;  %v3455_v38 = vadd.f32 %v8345_v10, %v8330_v40 }
 0x3bf   : > { %v4541_v18 = vpop.f32.mrb[107].mxu0 }
 0x3c0   : > { %v4542_v51 = vadd.f32 %v4541_v18, %v4540_v8  ;;  %v8358_v0 = vadd.f32 %v4539_v39, %v3428_v47 }
 0x3c1   : > { %v4455_v34 = vpop.f32.mrb[92].mxu1 }
 0x3c2   : > { %v8360_v12 = vadd.f32 %v4542_v51, %v3431_v7  ;;  %v4456_v35 = vpop.f32.mrb[93].mxu1 }
 0x3c3   : > { %v8362_v14 = vadd.f32 %v4456_v35, %v4455_v34  ;;  %v4458_v1 = vpop.f32.mrb[94].mxu1  ;;  %v3460_v34 = vadd.f32 %v8352_v5, %v8330_v40 }
 0x3c4   : > { %v4543_v26 = vpop.f32.mrb[108].mxu0  ;;  %v4459_v46 = vpop.f32.mrb[95].mxu1 }
 0x3c5   : > { %v4544_v22 = vpop.f32.mrb[109].mxu0  ;;  %v8365_v60 = vadd.f32 %v4459_v46, %v4458_v1 }
 0x3c6   : > { %v4545_v54 = vadd.f32 %v4544_v22, %v4543_v26  ;;  %v4546_v23 = vpop.f32.mrb[110].mxu0 }
 0x3c7   : > { %v4547_v4 = vpop.f32.mrb[111].mxu0 }
 0x3c8   : > { %v4548_v41 = vadd.f32 %v4547_v4, %v4546_v23  ;;  %v8368_v58 = vadd.f32 %v4545_v54, %v3436_v55  ;;  %v3463_v55 = vadd.f32 %v8355_v57, %v8330_v40 }
 0x3c9   : > { %v4461_v15 = vpop.f32.mrb[96].mxu1 }
 0x3ca   : > { %v8370_v50 = vadd.f32 %v4548_v41, %v3439_v49  ;;  %v4462_v48 = vpop.f32.mrb[97].mxu1 }
 0x3cb   : > { %v8372_v59 = vadd.f32 %v4462_v48, %v4461_v15  ;;  %v4464_v6 = vpop.f32.mrb[98].mxu1  ;;  %v3468_v48 = vadd.f32 %v8362_v14, %v8330_v40 }
 0x3cc   : > { %v4549_v16 = vpop.f32.mrb[112].mxu0  ;;  %v4465_v13 = vpop.f32.mrb[99].mxu1 }
 0x3cd   : > { %v4550_v56 = vpop.f32.mrb[113].mxu0  ;;  %v8376_v61 = vadd.f32 %v4465_v13, %v4464_v6 }
 0x3ce   : > { %v4551_v37 = vadd.f32 %v4550_v56, %v4549_v16  ;;  %v4552_v62 = vpop.f32.mrb[114].mxu0 }
 0x3cf   : > { %v4553_v30 = vpop.f32.mrb[115].mxu0 }
 0x3d0   : > { %v4554_v9 = vadd.f32 %v4553_v30, %v4552_v62  ;;  %v8380_v45 = vadd.f32 %v4551_v37, %v3444_v43  ;;  %v3471_v62 = vadd.f32 %v8365_v60, %v8330_v40 }
 0x3d1   : > { %v4467_v11 = vpop.f32.mrb[100].mxu1 }
 0x3d2   : > { %v8382_v28 = vadd.f32 %v4554_v9, %v3447_v63  ;;  %v4468_v33 = vpop.f32.mrb[101].mxu1 }
 0x3d3   : > { %v8384_v44 = vadd.f32 %v4468_v33, %v4467_v11  ;;  %v4470_v36 = vpop.f32.mrb[102].mxu1 }
 0x3d4   : > { %v4555_v27 = vpop.f32.mrb[116].mxu0  ;;  %v4471_v3 = vpop.f32.mrb[103].mxu1 }
 0x3d5   : > { %v4556_v2 = vpop.f32.mrb[117].mxu0  ;;  %v8388_v19 = vadd.f32 %v4471_v3, %v4470_v36  ;;  %v3476_v36 = vadd.f32 %v8372_v59, %v8330_v40 }
 0x3d6   : > { %v4557_v17 = vadd.f32 %v4556_v2, %v4555_v27  ;;  %v4558_v25 = vpop.f32.mrb[118].mxu0 }
 0x3d7   : > { %v4559_v31 = vpop.f32.mrb[119].mxu0 }
 0x3d8   : > { %v4560_v53 = vadd.f32 %v4559_v31, %v4558_v25  ;;  %v8392_v47 = vadd.f32 %v4557_v17, %v3452_v24  ;;  %v3479_v31 = vadd.f32 %v8376_v61, %v8330_v40 }
 0x3d9   : > { %v4473_v8 = vpop.f32.mrb[104].mxu1 }
 0x3da   : > { %v8394_v39 = vadd.f32 %v4560_v53, %v3455_v38  ;;  %v4474_v18 = vpop.f32.mrb[105].mxu1 }
 0x3db   : > { %v8396_v51 = vadd.f32 %v4474_v18, %v4473_v8  ;;  %v4476_v20 = vpop.f32.mrb[106].mxu1 }
 0x3dc   : > { %v4561_v42 = vpop.f32.mrb[120].mxu0  ;;  %v4477_v22 = vpop.f32.mrb[107].mxu1 }
 0x3dd   : > { %v4562_v7 = vpop.f32.mrb[121].mxu0  ;;  %v8400_v10 = vadd.f32 %v4477_v22, %v4476_v20 }
 0x3de   : > { %v4563_v26 = vadd.f32 %v4562_v7, %v4561_v42  ;;  %v4564_v35 = vpop.f32.mrb[122].mxu0 }
 0x3df   : > { %v4565_v1 = vpop.f32.mrb[123].mxu0 }
 0x3e0   : > { %v4566_v54 = vadd.f32 %v4565_v1, %v4564_v35  ;;  %v8404_v23 = vadd.f32 %v4563_v26, %v3460_v34  ;;  %v3484_v26 = vadd.f32 %v8384_v44, %v8330_v40 }
 0x3e1   : > { %v4479_v4 = vpop.f32.mrb[108].mxu1 }
 0x3e2   : > { %v8406_v46 = vadd.f32 %v4566_v54, %v3463_v55  ;;  %v4480_v41 = vpop.f32.mrb[109].mxu1  ;;  %v3487_v54 = vadd.f32 %v8388_v19, %v8330_v40 }
 0x3e3   : > { %v8408_v16 = vadd.f32 %v4480_v41, %v4479_v4  ;;  %v4482_v5 = vpop.f32.mrb[110].mxu1 }
 0x3e4   : > { %v4567_v49 = vpop.f32.mrb[124].mxu0  ;;  %v4483_v43 = vpop.f32.mrb[111].mxu1 }
 0x3e5   : > { %v4568_v15 = vpop.f32.mrb[125].mxu0  ;;  %v8412_v57 = vadd.f32 %v4483_v43, %v4482_v5  ;;  %v3492_v43 = vadd.f32 %v8396_v51, %v8330_v40 }
 0x3e6   : > { %v4569_v56 = vadd.f32 %v4568_v15, %v4567_v49  ;;  %v4570_v6 = vpop.f32.mrb[126].mxu0 }
 0x3e7   : > { %v4571_v37 = vpop.f32.mrb[127].mxu0 }
 0x3e8   : > { %v4572_v13 = vadd.f32 %v4571_v37, %v4570_v6  ;;  %v8416_v30 = vadd.f32 %v4569_v56, %v3468_v48 }
 0x3e9   : > { %v4485_v9 = vpop.f32.mrb[112].mxu1 }
 0x3ea   : > { %v8418_v63 = vadd.f32 %v4572_v13, %v3471_v62  ;;  %v4486_v27 = vpop.f32.mrb[113].mxu1 }
 0x3eb   : > { %v8420_v2 = vadd.f32 %v4486_v27, %v4485_v9  ;;  %v4488_v14 = vpop.f32.mrb[114].mxu1 }
 0x3ec   : > { %v4573_v11 = vpop.f32.mrb[128].mxu0  ;;  %v4489_v25 = vpop.f32.mrb[115].mxu1 }
 0x3ed   : > { %v4574_v33 = vpop.f32.mrb[129].mxu0  ;;  %v8424_v60 = vadd.f32 %v4489_v25, %v4488_v14 }
 0x3ee   : > { %v4575_v24 = vadd.f32 %v4574_v33, %v4573_v11  ;;  %v4576_v17 = vpop.f32.mrb[130].mxu0  ;;  %v3495_v11 = vadd.f32 %v8400_v10, %v8330_v40 }
 0x3ef   : > { %v4577_v3 = vpop.f32.mrb[131].mxu0 }
 0x3f0   : > { %v4578_v38 = vadd.f32 %v4577_v3, %v4576_v17  ;;  %v8428_v53 = vadd.f32 %v4575_v24, %v3476_v36 }
 0x3f1   : > { %v4491_v42 = vpop.f32.mrb[116].mxu1 }
 0x3f2   : > { %v8430_v8 = vadd.f32 %v4578_v38, %v3479_v31  ;;  %v4492_v7 = vpop.f32.mrb[117].mxu1  ;;  %v3500_v31 = vadd.f32 %v8408_v16, %v8330_v40 }
 0x3f3   : > { %v8432_v34 = vadd.f32 %v4492_v7, %v4491_v42  ;;  %v4494_v59 = vpop.f32.mrb[118].mxu1 }
 0x3f4   : > { %v4579_v18 = vpop.f32.mrb[132].mxu0  ;;  %v4495_v1 = vpop.f32.mrb[119].mxu1 }
 0x3f5   : > { %v4580_v20 = vpop.f32.mrb[133].mxu0  ;;  %v8436_v61 = vadd.f32 %v4495_v1, %v4494_v59 }
 0x3f6   : > { %v4581_v35 = vadd.f32 %v4580_v20, %v4579_v18  ;;  %v4582_v22 = vpop.f32.mrb[134].mxu0  ;;  %v3503_v20 = vadd.f32 %v8412_v57, %v8330_v40  ;;  %v3508_v57 = vadd.f32 %v8420_v2, %v8330_v40 }
 0x3f7   : > { %v4583_v55 = vpop.f32.mrb[135].mxu0 }
 0x3f8   : > { %v4584_v4 = vadd.f32 %v4583_v55, %v4582_v22  ;;  %v8440_v49 = vadd.f32 %v4581_v35, %v3484_v26 }
 0x3f9   : > { %v4497_v15 = vpop.f32.mrb[120].mxu1 }
 0x3fa   : > { %v8442_v41 = vadd.f32 %v4584_v4, %v3487_v54  ;;  %v4498_v48 = vpop.f32.mrb[121].mxu1 }
 0x3fb   : > { %v8444_v6 = vadd.f32 %v4498_v48, %v4497_v15  ;;  %v4500_v44 = vpop.f32.mrb[122].mxu1  ;;  %v9111_v48 = vld [vmem:[#allocation9_spill] sm:$0xff] }
 0x3fc   : > { %v4585_v5 = vpop.f32.mrb[136].mxu0  ;;  %v4501_v13 = vpop.f32.mrb[123].mxu1 }
 0x3fd   : > { %v4586_v56 = vpop.f32.mrb[137].mxu0  ;;  %v8448_v19 = vadd.f32 %v4501_v13, %v4500_v44  ;;  %v9112_v13 = vld [vmem:[#allocation7_spill] sm:$0xff] }
 0x3fe   : > { %v4587_v37 = vadd.f32 %v4586_v56, %v4585_v5  ;;  %v4588_v62 = vpop.f32.mrb[138].mxu0 }
 0x3ff   : > { %v4589_v9 = vpop.f32.mrb[139].mxu0 }
 0x400   : > { %v4590_v27 = vadd.f32 %v4589_v9, %v4588_v62  ;;  %v8452_v33 = vadd.f32 %v4587_v37, %v3492_v43  ;;  %v3511_v62 = vadd.f32 %v8424_v60, %v8330_v40 }
 0x401   : > { %v4503_v36 = vpop.f32.mrb[124].mxu1 }
 0x402   : > { %v8454_v14 = vadd.f32 %v4590_v27, %v3495_v11  ;;  %v4504_v17 = vpop.f32.mrb[125].mxu1 }
 0x403   : > { %v8456_v51 = vadd.f32 %v4504_v17, %v4503_v36  ;;  %v4506_v3 = vpop.f32.mrb[126].mxu1  ;;  %v9113_v36 = vld [vmem:[#allocation10_spill] sm:$0xff] }
 0x404   : > { %v4591_v24 = vpop.f32.mrb[140].mxu0  ;;  %v4507_v10 = vpop.f32.mrb[127].mxu1 }
 0x405   : > { %v4592_v25 = vpop.f32.mrb[141].mxu0  ;;  %v8460_v7 = vadd.f32 %v4507_v10, %v4506_v3 }
 0x406   : > { %v4593_v38 = vadd.f32 %v4592_v25, %v4591_v24  ;;  %v4594_v42 = vpop.f32.mrb[142].mxu0  ;;  %v9114_v25 = vld [vmem:[#allocation8_spill] sm:$0xff] }
 0x407   : > { %v4595_v18 = vpop.f32.mrb[143].mxu0 }
 0x408   : > { %v4596_v59 = vadd.f32 %v4595_v18, %v4594_v42  ;;  %v8464_v26 = vadd.f32 %v4593_v38, %v3500_v31 }
 0x409   : > { %v4691_v22 = vpop.f32.mrb[128].mxu1 }
 0x40a   : > { %v8467_v35 = vadd.f32 %v4596_v59, %v3503_v20  ;;  %v3742_v16 = vadd.f32 %v4691_v22, %v8348_v29  ;;  %v3733_v55 = vpop.f32.mrb[129].mxu1  ;;  %v3516_v22 = vadd.f32 %v8432_v34, %v8330_v40 }
 0x40b   : > { %v3734_v4 = vadd.f32 %v3733_v55, %v8338_v52  ;;  %v4692_v15 = vpop.f32.mrb[130].mxu1 }
 0x40c   : > { %v4597_v1 = vpop.f32.mrb[144].mxu0  ;;  %v3862_v56 = vadd.f32 %v3742_v16, %v9111_v48  ;;  %v3745_v43 = vadd.f32 %v4692_v15, %v8350_v32  ;;  %v3736_v37 = vpop.f32.mrb[131].mxu1  ;;  %v9115_v16 = vld [vmem:[#allocation13_spill] sm:$0xff] }
 0x40d   : > { %v4598_v54 = vpop.f32.mrb[145].mxu0  ;;  %v3860_v29 = vadd.f32 %v3734_v4, %v9112_v13  ;;  %v3737_v11 = vadd.f32 %v3736_v37, %v8340_v21  ;;  %v9118_v13 = vld [vmem:[#allocation12_spill] sm:$0xff] }
 0x40e   : > { %v4599_v5 = vadd.f32 %v4598_v54, %v4597_v1  ;;  %v4600_v44 = vpop.f32.mrb[146].mxu0  ;;  %v3894_v52 = vmax.f32 %v3862_v56, 0.0  ;;  %v3863_v24 = vadd.f32 %v3745_v43, %v9113_v36 }
 0x40f   : > { %v4601_v9 = vpop.f32.mrb[147].mxu0  ;;  %v3892_v17 = vmax.f32 %v3860_v29, 0.0  ;;  %v3861_v3 = vadd.f32 %v3737_v11, %v9114_v25  ;;  %v3524_v25 = vadd.f32 %v8444_v6, %v8330_v40 }
 0x410   : > { %v4602_v27 = vadd.f32 %v4601_v9, %v4600_v44  ;;  %v8482_v2 = vadd.f32 %v4599_v5, %v3508_v57  ;;  %3926 = vst.msk [vmem:[%s8485_s13 + $0x10] sm:$0xff] %vm283_vm0, %v3894_v52  ;;  %v3895_v32 = vmax.f32 %v3863_v24, 0.0  ;;  %v9116_v57 = vld [vmem:[#allocation11_spill] sm:$0xff]  ;;  %v9117_v44 = vld [vmem:[#allocation14_spill] sm:$0xff] }
 0x411   : > { %3924 = vst.msk [vmem:[%s8485_s13] sm:$0xff] %vm283_vm0, %v3892_v17  ;;  %v3893_v21 = vmax.f32 %v3861_v3, 0.0  ;;  %v4695_v31 = vpop.f32.mrb[132].mxu1 }
 0x412   : > { %v8489_v60 = vadd.f32 %v4602_v27, %v3511_v62  ;;  %3927 = vst.msk [vmem:[%s8485_s13 + $0x18] sm:$0xff] %vm283_vm0, %v3895_v32  ;;  %v3758_v42 = vadd.f32 %v4695_v31, %v8368_v58  ;;  %v3749_v10 = vpop.f32.mrb[133].mxu1  ;;  %v3519_v58 = vadd.f32 %v8436_v61, %v8330_v40  ;;  %v9119_v32 = vld [vmem:[#allocation17_spill] sm:$0xff] }
 0x413   : > { %3925 = vst.msk [vmem:[%s8485_s13 + $0x8] sm:$0xff] %vm283_vm0, %v3893_v21  ;;  %v3750_v20 = vadd.f32 %v3749_v10, %v8358_v0  ;;  %v4696_v59 = vpop.f32.mrb[134].mxu1  ;;  %v9120_v10 = vld [vmem:[#allocation15_spill] sm:$0xff] }
 0x414   : > { %v4603_v38 = vpop.f32.mrb[148].mxu0  ;;  %v3866_v55 = vadd.f32 %v3758_v42, %v9115_v16  ;;  %v3761_v4 = vadd.f32 %v4696_v59, %v8370_v50  ;;  %v3752_v15 = vpop.f32.mrb[135].mxu1 }
 0x415   : > { %v4604_v18 = vpop.f32.mrb[149].mxu0  ;;  %v3864_v5 = vadd.f32 %v3750_v20, %v9116_v57  ;;  %v3753_v48 = vadd.f32 %v3752_v15, %v8360_v12 }
 0x416   : > { %v4605_v1 = vadd.f32 %v4604_v18, %v4603_v38  ;;  %v4606_v54 = vpop.f32.mrb[150].mxu0  ;;  %v3898_v56 = vmax.f32 %v3866_v55, 0.0  ;;  %v3867_v43 = vadd.f32 %v3761_v4, %v9117_v44 }
 0x417   : > { %v4607_v0 = vpop.f32.mrb[151].mxu0  ;;  %v3896_v62 = vmax.f32 %v3864_v5, 0.0  ;;  %v3865_v50 = vadd.f32 %v3753_v48, %v9118_v13 }
 0x418   : > { %v4608_v34 = vadd.f32 %v4607_v0, %v4606_v54  ;;  %v8508_v37 = vadd.f32 %v4605_v1, %v3516_v22  ;;  %3930 = vst.msk [vmem:[%s8485_s13 + $0x30] sm:$0xff] %vm283_vm0, %v3898_v56  ;;  %v3899_v29 = vmax.f32 %v3867_v43, 0.0  ;;  %v9121_v22 = vld [vmem:[#allocation18_spill] sm:$0xff]  ;;  %v9122_v54 = vld [vmem:[#allocation16_spill] sm:$0xff]  ;;  %v9123_v43 = vld [vmem:[#allocation21_spill] sm:$0xff] }
 0x419   : > { %3928 = vst.msk [vmem:[%s8485_s13 + $0x20] sm:$0xff] %vm283_vm0, %v3896_v62  ;;  %v3897_v9 = vmax.f32 %v3865_v50, 0.0  ;;  %v4699_v11 = vpop.f32.mrb[136].mxu1 }
 0x41a   : > { %v8513_v61 = vadd.f32 %v4608_v34, %v3519_v58  ;;  %3931 = vst.msk [vmem:[%s8485_s13 + $0x38] sm:$0xff] %vm283_vm0, %v3899_v29  ;;  %v3774_v52 = vadd.f32 %v4699_v11, %v8392_v47  ;;  %v3765_v27 = vpop.f32.mrb[137].mxu1  ;;  %v3527_v47 = vadd.f32 %v8448_v19, %v8330_v40  ;;  %v3532_v34 = vadd.f32 %v8456_v51, %v8330_v40 }
 0x41b   : > { %3929 = vst.msk [vmem:[%s8485_s13 + $0x28] sm:$0xff] %vm283_vm0, %v3897_v9  ;;  %v3766_v24 = vadd.f32 %v3765_v27, %v8380_v45  ;;  %v4700_v17 = vpop.f32.mrb[138].mxu1  ;;  %v9124_v9 = vld [vmem:[#allocation19_spill] sm:$0xff]  ;;  %v9125_v27 = vld [vmem:[#allocation22_spill] sm:$0xff] }
 0x41c   : > { %v4609_v12 = vpop.f32.mrb[152].mxu0  ;;  %v3870_v21 = vadd.f32 %v3774_v52, %v9119_v32  ;;  %v3777_v38 = vadd.f32 %v4700_v17, %v8394_v39  ;;  %v3768_v42 = vpop.f32.mrb[139].mxu1 }
 0x41d   : > { %v4610_v36 = vpop.f32.mrb[153].mxu0  ;;  %v3868_v18 = vadd.f32 %v3766_v24, %v9120_v10  ;;  %v3769_v20 = vadd.f32 %v3768_v42, %v8382_v28  ;;  %v9127_v42 = vld [vmem:[#allocation25_spill] sm:$0xff] }
 0x41e   : > { %v4611_v3 = vadd.f32 %v4610_v36, %v4609_v12  ;;  %v4612_v31 = vpop.f32.mrb[154].mxu0  ;;  %v3902_v59 = vmax.f32 %v3870_v21, 0.0  ;;  %v3871_v1 = vadd.f32 %v3777_v38, %v9121_v22 }
 0x41f   : > { %v4613_v45 = vpop.f32.mrb[155].mxu0  ;;  %v3900_v55 = vmax.f32 %v3868_v18, 0.0  ;;  %v3869_v39 = vadd.f32 %v3769_v20, %v9122_v54 }
 0x420   : > { %v4614_v6 = vadd.f32 %v4613_v45, %v4612_v31  ;;  %v8532_v16 = vadd.f32 %v4611_v3, %v3524_v25  ;;  %3934 = vst.msk [vmem:[%s8485_s13 + $0x50] sm:$0xff] %vm283_vm0, %v3902_v59  ;;  %v3903_v4 = vmax.f32 %v3871_v1, 0.0  ;;  %v9126_v25 = vld [vmem:[#allocation20_spill] sm:$0xff]  ;;  %v9128_v45 = vld [vmem:[#allocation23_spill] sm:$0xff] }
 0x421   : > { %3932 = vst.msk [vmem:[%s8485_s13 + $0x40] sm:$0xff] %vm283_vm0, %v3900_v55  ;;  %v3901_v15 = vmax.f32 %v3869_v39, 0.0  ;;  %v4703_v58 = vpop.f32.mrb[140].mxu1  ;;  %v9130_v55 = vld [vmem:[#allocation24_spill] sm:$0xff] }
 0x422   : > { %v8537_v19 = vadd.f32 %v4614_v6, %v3527_v47  ;;  %3935 = vst.msk [vmem:[%s8485_s13 + $0x58] sm:$0xff] %vm283_vm0, %v3903_v4  ;;  %v3790_v57 = vadd.f32 %v4703_v58, %v8416_v30  ;;  %v3781_v5 = vpop.f32.mrb[141].mxu1  ;;  %v3535_v30 = vadd.f32 %v8460_v7, %v8330_v40 }
 0x423   : > { %3933 = vst.msk [vmem:[%s8485_s13 + $0x48] sm:$0xff] %vm283_vm0, %v3901_v15  ;;  %v3782_v48 = vadd.f32 %v3781_v5, %v8404_v23  ;;  %v4704_v56 = vpop.f32.mrb[142].mxu1 }
 0x424   : > { %v4615_v28 = vpop.f32.mrb[156].mxu0  ;;  %v3874_v62 = vadd.f32 %v3790_v57, %v9123_v43  ;;  %v3793_v50 = vadd.f32 %v4704_v56, %v8418_v63  ;;  %v3784_v29 = vpop.f32.mrb[143].mxu1 }
 0x425   : > { %v4616_v0 = vpop.f32.mrb[157].mxu0  ;;  %v3872_v11 = vadd.f32 %v3782_v48, %v9124_v9  ;;  %v3785_v12 = vadd.f32 %v3784_v29, %v8406_v46  ;;  %v9132_v48 = vld [vmem:[#allocation27_spill] sm:$0xff] }
 0x426   : > { %v4617_v44 = vadd.f32 %v4616_v0, %v4615_v28  ;;  %v4618_v13 = vpop.f32.mrb[158].mxu0  ;;  %v3906_v51 = vmax.f32 %v3874_v62, 0.0  ;;  %v3875_v36 = vadd.f32 %v3793_v50, %v9125_v27  ;;  %v9131_v28 = vld [vmem:[#allocation35_spill] sm:$0xff]  ;;  %v9136_v27 = vld [vmem:[#allocation37_spill] sm:$0xff] }
 0x427   : > { %v4619_v23 = vpop.f32.mrb[159].mxu0  ;;  %v3904_v17 = vmax.f32 %v3872_v11, 0.0  ;;  %v3873_v63 = vadd.f32 %v3785_v12, %v9126_v25 }
 0x428   : > { %v4620_v52 = vadd.f32 %v4619_v23, %v4618_v13  ;;  %v8556_v24 = vadd.f32 %v4617_v44, %v3532_v34  ;;  %3938 = vst.msk [vmem:[%s8485_s13 + $0x70] sm:$0xff] %vm283_vm0, %v3906_v51  ;;  %v3907_v3 = vmax.f32 %v3875_v36, 0.0  ;;  %v9134_v13 = vld [vmem:[#allocation34_spill] sm:$0xff]  ;;  %v9135_v23 = vld [vmem:[#allocation41_spill] sm:$0xff] }
 0x429   : > { %3936 = vst.msk [vmem:[%s8485_s13 + $0x60] sm:$0xff] %vm283_vm0, %v3904_v17  ;;  %v3905_v7 = vmax.f32 %v3873_v63, 0.0  ;;  %v4707_v32 = vpop.f32.mrb[144].mxu1 }
 0x42a   : > { %v8561_v40 = vadd.f32 %v4620_v52, %v3535_v30  ;;  %3939 = vst.msk [vmem:[%s8485_s13 + $0x78] sm:$0xff] %vm283_vm0, %v3907_v3  ;;  %v3806_v46 = vadd.f32 %v4707_v32, %v8440_v49  ;;  %v3797_v21 = vpop.f32.mrb[145].mxu1  ;;  %v9129_v49 = vld [vmem:[#allocation26_spill] sm:$0xff] }
 0x42b   : > { %3937 = vst.msk [vmem:[%s8485_s13 + $0x68] sm:$0xff] %vm283_vm0, %v3905_v7  ;;  %v3798_v31 = vadd.f32 %v3797_v21, %v8428_v53  ;;  %v4708_v38 = vpop.f32.mrb[146].mxu1  ;;  %v9138_v7 = vld [vmem:[#allocation40_spill] sm:$0xff] }
 0x42c   : > { %v3878_v47 = vadd.f32 %v3806_v46, %v9127_v42  ;;  %v3809_v10 = vadd.f32 %v4708_v38, %v8442_v41  ;;  %v3800_v18 = vpop.f32.mrb[147].mxu1  ;;  %v9139_v42 = vld [vmem:[#allocation45_spill] sm:$0xff] }
 0x42d   : > { %v3876_v20 = vadd.f32 %v3798_v31, %v9128_v45  ;;  %v3801_v59 = vadd.f32 %v3800_v18, %v8430_v8  ;;  %v9140_v45 = vld [vmem:[#allocation43_spill] sm:$0xff] }
 0x42e   : > { %v3910_v6 = vmax.f32 %v3878_v47, 0.0  ;;  %v3879_v22 = vadd.f32 %v3809_v10, %v9129_v49 }
 0x42f   : > { %v3908_v1 = vmax.f32 %v3876_v20, 0.0  ;;  %v3877_v54 = vadd.f32 %v3801_v59, %v9130_v55 }
 0x430   : > { %3942 = vst.msk [vmem:[%s8485_s13 + $0x90] sm:$0xff] %vm283_vm0, %v3910_v6  ;;  %v3911_v53 = vmax.f32 %v3879_v22, 0.0  ;;  %v9141_v6 = vld [vmem:[#allocation46_spill] sm:$0xff]  ;;  %v9142_v22 = vld [vmem:[#allocation44_spill] sm:$0xff] }
 0x431   : > { %3940 = vst.msk [vmem:[%s8485_s13 + $0x80] sm:$0xff] %vm283_vm0, %v3908_v1  ;;  %v3909_v39 = vmax.f32 %v3877_v54, 0.0  ;;  %v4711_v4 = vpop.f32.mrb[148].mxu1 }
 0x432   : > { %3943 = vst.msk [vmem:[%s8485_s13 + $0x98] sm:$0xff] %vm283_vm0, %v3911_v53  ;;  %v3822_v41 = vadd.f32 %v4711_v4, %v8464_v26  ;;  %v3813_v8 = vpop.f32.mrb[149].mxu1  ;;  %v9133_v26 = vld [vmem:[#allocation36_spill] sm:$0xff] }
 0x433   : > { %3941 = vst.msk [vmem:[%s8485_s13 + $0x88] sm:$0xff] %vm283_vm0, %v3909_v39  ;;  %v3814_v15 = vadd.f32 %v3813_v8, %v8452_v33  ;;  %v4712_v58 = vpop.f32.mrb[150].mxu1 }
 0x434   : > { %v3882_v57 = vadd.f32 %v3822_v41, %v9131_v28  ;;  %v3825_v5 = vadd.f32 %v4712_v58, %v8467_v35  ;;  %v3816_v0 = vpop.f32.mrb[151].mxu1 }
 0x435   : > { %v3880_v56 = vadd.f32 %v3814_v15, %v9132_v48  ;;  %v3817_v34 = vadd.f32 %v3816_v0, %v8454_v14 }
 0x436   : > { %v3914_v44 = vmax.f32 %v3882_v57, 0.0  ;;  %v3883_v43 = vadd.f32 %v3825_v5, %v9133_v26 }
 0x437   : > { %v3912_v62 = vmax.f32 %v3880_v56, 0.0  ;;  %v3881_v50 = vadd.f32 %v3817_v34, %v9134_v13 }
 0x438   : > { %3946 = vst.msk [vmem:[%s8485_s13 + $0xb0] sm:$0xff] %vm283_vm0, %v3914_v44  ;;  %v3915_v33 = vmax.f32 %v3883_v43, 0.0 }
 0x439   : > { %3944 = vst.msk [vmem:[%s8485_s13 + $0xa0] sm:$0xff] %vm283_vm0, %v3912_v62  ;;  %v3913_v29 = vmax.f32 %v3881_v50, 0.0  ;;  %v4715_v30 = vpop.f32.mrb[152].mxu1 }
 0x43a   : > { %3947 = vst.msk [vmem:[%s8485_s13 + $0xb8] sm:$0xff] %vm283_vm0, %v3915_v33  ;;  %v3838_v35 = vadd.f32 %v4715_v30, %v8508_v37  ;;  %v3829_v14 = vpop.f32.mrb[153].mxu1  ;;  %v9137_v37 = vld [vmem:[#allocation42_spill] sm:$0xff] }
 0x43b   : > { %3945 = vst.msk [vmem:[%s8485_s13 + $0xa8] sm:$0xff] %vm283_vm0, %v3913_v29  ;;  %v3830_v9 = vadd.f32 %v3829_v14, %v8482_v2  ;;  %v4716_v11 = vpop.f32.mrb[154].mxu1 }
 0x43c   : > { %v3886_v12 = vadd.f32 %v3838_v35, %v9135_v23  ;;  %v3841_v51 = vadd.f32 %v4716_v11, %v8513_v61  ;;  %v3832_v52 = vpop.f32.mrb[155].mxu1 }
 0x43d   : > { %v3884_v36 = vadd.f32 %v3830_v9, %v9136_v27  ;;  %v3833_v17 = vadd.f32 %v3832_v52, %v8489_v60 }
 0x43e   : > { %v3918_v25 = vmax.f32 %v3886_v12, 0.0  ;;  %v3887_v63 = vadd.f32 %v3841_v51, %v9137_v37 }
 0x43f   : > { %v3916_v3 = vmax.f32 %v3884_v36, 0.0  ;;  %v3885_v32 = vadd.f32 %v3833_v17, %v9138_v7 }
 0x440   : > { %3950 = vst.msk [vmem:[%s8485_s13 + $0xd0] sm:$0xff] %vm283_vm0, %v3918_v25  ;;  %v3919_v2 = vmax.f32 %v3887_v63, 0.0 }
 0x441   : > { %3948 = vst.msk [vmem:[%s8485_s13 + $0xc0] sm:$0xff] %vm283_vm0, %v3916_v3  ;;  %v3917_v61 = vmax.f32 %v3885_v32, 0.0  ;;  %v4719_v46 = vpop.f32.mrb[156].mxu1 }
 0x442   : > { %3951 = vst.msk [vmem:[%s8485_s13 + $0xd8] sm:$0xff] %vm283_vm0, %v3919_v2  ;;  %v3854_v21 = vadd.f32 %v4719_v46, %v8556_v24  ;;  %v3845_v60 = vpop.f32.mrb[157].mxu1 }
 0x443   : > { %3949 = vst.msk [vmem:[%s8485_s13 + $0xc8] sm:$0xff] %vm283_vm0, %v3917_v61  ;;  %v3846_v31 = vadd.f32 %v3845_v60, %v8532_v16  ;;  %v4720_v38 = vpop.f32.mrb[158].mxu1 }
 0x444   : > { %v3890_v47 = vadd.f32 %v3854_v21, %v9139_v42  ;;  %v3857_v10 = vadd.f32 %v4720_v38, %v8561_v40  ;;  %v3848_v18 = vpop.f32.mrb[159].mxu1 }
 0x445   : > { %v3888_v20 = vadd.f32 %v3846_v31, %v9140_v45  ;;  %v3849_v24 = vadd.f32 %v3848_v18, %v8537_v19 }
 0x446   : > { %v3922_v59 = vmax.f32 %v3890_v47, 0.0  ;;  %v3891_v16 = vadd.f32 %v3857_v10, %v9141_v6 }
 0x447   : > { %v3920_v49 = vmax.f32 %v3888_v20, 0.0  ;;  %v3889_v1 = vadd.f32 %v3849_v24, %v9142_v22 }
 0x448   : > { %3954 = vst.msk [vmem:[%s8485_s13 + $0xf0] sm:$0xff] %vm283_vm0, %v3922_v59  ;;  %v3923_v40 = vmax.f32 %v3891_v16, 0.0 }
 0x449   : > { %3952 = vst.msk [vmem:[%s8485_s13 + $0xe0] sm:$0xff] %vm283_vm0, %v3920_v49  ;;  %v3921_v19 = vmax.f32 %v3889_v1, 0.0 }
 0x44a   : > { %3955 = vst.msk [vmem:[%s8485_s13 + $0xf8] sm:$0xff] %vm283_vm0, %v3923_v40 }
 0x44b   : > { %3953 = vst.msk [vmem:[%s8485_s13 + $0xe8] sm:$0xff] %vm283_vm0, %v3921_v19 }
 0x44c   : > { %5399 = shalt.err (!%p5396_p3)
}
 0x44d   : > { %s5400_s28 = scalar_lea.hbm %s8632_s17, 4096  ;;  %s5404_s11 = scalar_lea.hbm %s8691_s6, 8192 }
 0x44e   : > { %p5401_p4 = scmp.ne.s32.totalorder %s8632_s17, %s5400_s28  ;;  %p5405_p9 = scmp.lt.u32.totalorder %s8632_s17, %s8691_s6 }
 0x44f   : > { %p5406_p10 = scmp.lt.u32.totalorder %s5404_s11, %s5400_s28  ;;  %p5408_p12 = scmp.lt.u32.totalorder %s5400_s28, %s8632_s17 }
 0x450   : > { %p5402_p7 = pnand %p5401_p4, %p5528_p5 }
 0x451   : > { %p5407_p11 = por %p5406_p10, %p5405_p9 }
 0x452   : > { %p5403_p8 = pneg %p5402_p7 }
 0x453   : > { %p5409_p13 = por %p5408_p12, %p5407_p11 }
 0x455   : > { %p5410_p0 = pnand %p5409_p13, %p5403_p8 }
 0x457   : > { %5413 = shalt.err (!%p5410_p0)
}
 0x458   : > { %s5453_s14 = smov 128   ;;  %s5454_s9 = smov 8  }
 0x459   : > { %4721 = dma.vmem_to_hbm [thread:$0]  (%p5528_p5), %s8634_s15, 4096, %s8632_s17, %s8644_s25, %s5453_s14, %s5453_s14, %s5454_s9  }
 0x45a PF: > { %p4727_p1 = scmp.ge.s32.totalorder %s5448_s24, 2  ;;  %s3985_s16 = sand.u32 1, %s5436_s21  }
 0x45b   : > { %s3986_s18 = scalar_lea.sflag [#allocation5], %s3985_s16 }
 0x45c   : > { %p4724_p2 = pnand %p4727_p1, %p5532_p6 }
 0x45e   : > { %5431 = dma.done.wait (!%p4724_p2), %s3986_s18, 4096  }
 0x45f   : > { %5433 = vsyncadd (!%p4724_p2), %s3986_s18, 4294963200  ;;  %p16_p3 = scmp.ge.s32.totalorder %s5515_s27, 4   ;;  %s9143_s21 = smov %s5440_s22 }
 0x460   : > { %s9144_s22 = smov %s5444_s23  ;;  %s9145_s23 = smov %s5526_s30 }
 0x461   : > { %s9146_s24 = smov %s5515_s27  ;;  %18 = sbr.rel (!%p16_p3) target bundleno = 3 (0x3), region = 81 }
 0x468   :  { %3991 = vsyncpa [#allocation5], 1 }
 0x469   :  { %3993 = vsyncpa [#allocation5 + $0x1], 1 }

</bundles_post_ra>
